<compile_context>
chip_gen: v7x
topology: tpu7x:2x2x1
jax: 0.10.0
libtpu: 0.0.40
codegen_flags: <defaults>
</compile_context>

<pallas_src>
import jax
import jax.numpy as jnp
from jax import lax
from jax.experimental import pallas as pl
from jax.experimental.pallas import tpu as pltpu


# ----------------------------------------------------------------------------
# Fused Pallas kernel
# ----------------------------------------------------------------------------
def _make_fused_kernel(num_layers, T, Bb, H):
    """Fused LSTM-stack + Linear kernel (one batch block per grid step).

    Positional refs:
      x_ref                     (D0, T*Bb) bf16   feature-major, time-flattened
      [wih_l (4H, Din_l) bf16, whh_l (4H, H) bf16, b_l (4H, 1) f32] * num_layers
      fcw_ref (C, H) bf16, fcb_ref (C, 1) f32
      out_ref (C, Bb) f32
      gx_scr  (4H, T*Bb) f32    scratch: per-layer input-projection pre-acts
      act_scr (H, T*Bb) bf16    scratch: inter-layer activations (VMEM only)
    """

    def kernel(*refs):
        x_ref = refs[0]
        layer_refs = refs[1:1 + 3 * num_layers]
        fcw_ref = refs[1 + 3 * num_layers]
        fcb_ref = refs[2 + 3 * num_layers]
        out_ref = refs[3 + 3 * num_layers]
        gx_scr = refs[4 + 3 * num_layers]
        act_scr = refs[5 + 3 * num_layers]

        cur_in = x_ref                       # (Din, T*Bb) bf16 ref
        h_last = None
        for layer in range(num_layers):
            wih_ref, whh_ref, b_ref = layer_refs[3 * layer:3 * layer + 3]

            # Hoisted weight / bias loads (resident for the whole recurrence).
            wih = wih_ref[...]               # (4H, Din) bf16
            whh = whh_ref[...]               # (4H, H)   bf16
            bias = b_ref[...]                # (4H, 1)   f32

            # Input projection for ALL timesteps as one MXU GEMM (+bias),
            # hoisted out of the serial per-timestep loop.
            gx_scr[...] = (
                jnp.dot(wih, cur_in[...], preferred_element_type=jnp.float32)
                + bias
            )                                # (4H, T*Bb) f32

            h = jnp.zeros((H, Bb), jnp.float32)
            c = jnp.zeros((H, Bb), jnp.float32)
            is_last = layer == num_layers - 1

            # frame_size is small & static -> full unroll (scheduler can overlap
            # the recurrent matmul with the gate/EUP math of adjacent steps).
            # For very long sequences one would switch to a fori_loop over
            # T-chunks with carried h/c to bound code size and VMEM.
            for t in range(T):
                col = t * Bb                 # static offset
                gates = gx_scr[:, col:col + Bb] + jnp.dot(
                    whh, h.astype(jnp.bfloat16),
                    preferred_element_type=jnp.float32)          # (4H, Bb) f32
                # PyTorch gate order i, f, g, o -> 8-sublane-aligned row blocks.
                i_g = jax.nn.sigmoid(gates[0 * H:1 * H])
                f_g = jax.nn.sigmoid(gates[1 * H:2 * H])
                g_g = jnp.tanh(gates[2 * H:3 * H])
                o_g = jax.nn.sigmoid(gates[3 * H:4 * H])
                c = f_g * c + i_g * g_g
                h = o_g * jnp.tanh(c)
                if not is_last:
                    # Stage this layer's hidden state for the next layer's GEMM.
                    # The LAST layer's sequence is never materialized.
                    act_scr[:, col:col + Bb] = h.astype(jnp.bfloat16)

            if is_last:
                h_last = h
            else:
                cur_in = act_scr

        # hidden2tag on the last timestep only: (C, H) @ (H, Bb) + (C, 1).
        out_ref[...] = (
            jnp.dot(fcw_ref[...], h_last.astype(jnp.bfloat16),
                    preferred_element_type=jnp.float32)
            + fcb_ref[...]
        )

    return kernel


# ----------------------------------------------------------------------------
# Wrapper
# ----------------------------------------------------------------------------
def eye_tracking_classifier_forward(eye_input, params, *, batch_blocks=None):
    """eye_input: (T, B, input_dim) float32 -> tag_space: (B, tagset_size) f32."""
    T, B, D = eye_input.shape
    lstm_params = params["lstm"]
    num_layers = len(lstm_params)
    H = lstm_params[0][1].shape[1]           # w_hh: (4H, H)
    fc_w, fc_b = params["fc"]
    C = fc_w.shape[0]

    # Batch blocking:
    #  * Use 2 blocks (v7x dual-TensorCore sharding via dimension_semantics)
    #    only when each block stays lane-aligned (Bb % 128 == 0).
    #  * Otherwise keep a single block so per-timestep column slices of the
    #    (4H, T*Bb) scratch stay on 128-lane tile boundaries whenever B is a
    #    multiple of 128 (e.g. the module's BATCH_SIZE=128).
    if batch_blocks is None:
        batch_blocks = 2 if (B % 256 == 0) else 1
    G = batch_blocks
    assert B % G == 0, "batch must divide evenly into batch_blocks"
    Bb = B // G

    # Feature-major, time-flattened input, one slab per batch block:
    # (T, B, D) -> (G, D, T*Bb), column index = t*Bb + local_batch.
    x = eye_input.astype(jnp.bfloat16)
    x = x.reshape(T, G, Bb, D).transpose(1, 3, 0, 2).reshape(G, D, T * Bb)

    inputs = [x]
    in_specs = [pl.BlockSpec((pl.Squeezed(), D, T * Bb), lambda g: (g, 0, 0))]

    def _resident(arr):
        # Whole-array VMEM-resident operand (constant block index across grid).
        arr = jnp.asarray(arr)
        assert arr.ndim == 2
        inputs.append(arr)
        in_specs.append(pl.BlockSpec(arr.shape, lambda g: (0, 0)))

    for (w_ih, w_hh, b_ih, b_hh) in lstm_params:
        _resident(jnp.asarray(w_ih, jnp.bfloat16))                       # (4H, Din)
        _resident(jnp.asarray(w_hh, jnp.bfloat16))                       # (4H, H)
        _resident((b_ih + b_hh).astype(jnp.float32).reshape(4 * H, 1))   # (4H, 1)
    _resident(jnp.asarray(fc_w, jnp.bfloat16))                           # (C, H)
    _resident(jnp.asarray(fc_b, jnp.float32).reshape(C, 1))              # (C, 1)

    # VMEM scratch scales with T*Bb (f32 4H*T*Bb + bf16 H*T*Bb); for very long
    # sequences on v7x (64 MiB VMEM) add a T-chunk grid axis with carried h/c.
    out = pl.pallas_call(
        _make_fused_kernel(num_layers, T, Bb, H),
        grid=(G,),
        out_shape=jax.ShapeDtypeStruct((G, C, Bb), jnp.float32),
        in_specs=in_specs,
        out_specs=pl.BlockSpec((pl.Squeezed(), C, Bb), lambda g: (g, 0, 0)),
        scratch_shapes=[
            pltpu.VMEM((4 * H, T * Bb), jnp.float32),   # gate pre-activations
            pltpu.VMEM((H, T * Bb), jnp.bfloat16),      # inter-layer activations
        ],
        compiler_params=pltpu.CompilerParams(
            dimension_semantics=("parallel",),
        ),
    )(*inputs)

    # (G, C, Bb) -> (B, C)
    return out.transpose(0, 2, 1).reshape(B, C)


def init_params(key, input_dim, hidden_dim, tagset_size, num_layers):
    """Deterministic init mimicking PyTorch's U(-1/sqrt(H), 1/sqrt(H))."""
    bound = 1.0 / jnp.sqrt(jnp.float32(hidden_dim))
    lstm_params = []
    for layer in range(num_layers):
        d_in = input_dim if layer == 0 else hidden_dim
        key, k1, k2, k3, k4 = jax.random.split(key, 5)
        w_ih = jax.random.uniform(k1, (4 * hidden_dim, d_in), jnp.float32, -bound, bound)
        w_hh = jax.random.uniform(k2, (4 * hidden_dim, hidden_dim), jnp.float32, -bound, bound)
        b_ih = jax.random.uniform(k3, (4 * hidden_dim,), jnp.float32, -bound, bound)
        b_hh = jax.random.uniform(k4, (4 * hidden_dim,), jnp.float32, -bound, bound)
        lstm_params.append((w_ih, w_hh, b_ih, b_hh))
    key, k1, k2 = jax.random.split(key, 3)
    fc_w = jax.random.uniform(k1, (tagset_size, hidden_dim), jnp.float32, -bound, bound)
    fc_b = jax.random.uniform(k2, (tagset_size,), jnp.float32, -bound, bound)
    return {"lstm": lstm_params, "fc": (fc_w, fc_b)}


# ----------------------------------------------------------------------------
# Pure-JAX f32 reference (PyTorch semantics) for the silent correctness check
# ----------------------------------------------------------------------------
def _reference_forward(eye_input, params):
    def one_layer(x, w_ih, w_hh, b_ih, b_hh):
        H = w_hh.shape[1]

        def step(carry, x_t):
            h, c = carry
            gates = x_t @ w_ih.T + h @ w_hh.T + b_ih + b_hh
            i = jax.nn.sigmoid(gates[:, 0 * H:1 * H])
            f = jax.nn.sigmoid(gates[:, 1 * H:2 * H])
            g = jnp.tanh(gates[:, 2 * H:3 * H])
            o = jax.nn.sigmoid(gates[:, 3 * H:4 * H])
            c_new = f * c + i * g
            h_new = o * jnp.tanh(c_new)
            return (h_new, c_new), h_new

        B = x.shape[1]
        init = (jnp.zeros((B, H), jnp.float32), jnp.zeros((B, H), jnp.float32))
        _, hs = lax.scan(step, init, x)
        return hs

    h = eye_input
    for layer_params in params["lstm"]:
        h = one_layer(h, *layer_params)
    fc_w, fc_b = params["fc"]
    return h[-1] @ fc_w.T + fc_b


# ----------------------------------------------------------------------------
if __name__ == "__main__":
    # Small shapes consistent with the module's forward signature.
    seq_len = 8        # frame_size (time steps)
    batch = 8          # small stand-in for BATCH_SIZE=128
    input_dim = 16
    hidden_dim = 32
    tagset_size = 4
    num_layers = 2

    key = jax.random.PRNGKey(0)
    key_x, key_p = jax.random.split(key)
    eye_input = jax.random.normal(key_x, (seq_len, batch, input_dim), jnp.float32)
    params = init_params(key_p, input_dim, hidden_dim, tagset_size, num_layers)

    tag_space = eye_tracking_classifier_forward(eye_input, params)
    tag_space = jax.block_until_ready(tag_space)
    assert tag_space.shape == (batch, tagset_size)

    ref = jax.block_until_ready(_reference_forward(eye_input, params))
    err = float(jnp.max(jnp.abs(tag_space - ref)))
    # bf16 MXU operands (f32 accumulation / f32 state) -> loosened tolerance.
    assert err < 1.5e-1, f"mismatch vs reference: max abs err {err}"

    # Also exercise the multi-block (v7x dual-TensorCore) grid path explicitly.
    batch2 = 64
    key_x2, _ = jax.random.split(key_x)
    eye_input2 = jax.random.normal(key_x2, (seq_len, batch2, input_dim), jnp.float32)
    tag2 = jax.block_until_ready(
        eye_tracking_classifier_forward(eye_input2, params, batch_blocks=2))
    ref2 = jax.block_until_ready(_reference_forward(eye_input2, params))
    assert tag2.shape == (batch2, tagset_size)
    err2 = float(jnp.max(jnp.abs(tag2 - ref2)))
    assert err2 < 1.5e-1, f"mismatch vs reference (2 batch blocks): max abs err {err2}"

    print("KERNEL_OK")
</pallas_src>

<mosaic_0001>
module attributes {stable_mosaic.version = 11 : i64} {
  func.func @kernel(%arg0: i32, %arg1: memref<1x16x64xbf16, #tpu.memory_space<vmem>>, %arg2: memref<128x16xbf16, #tpu.memory_space<vmem>>, %arg3: memref<128x32xbf16, #tpu.memory_space<vmem>>, %arg4: memref<128x1xf32, #tpu.memory_space<vmem>>, %arg5: memref<128x32xbf16, #tpu.memory_space<vmem>>, %arg6: memref<128x32xbf16, #tpu.memory_space<vmem>>, %arg7: memref<128x1xf32, #tpu.memory_space<vmem>>, %arg8: memref<4x32xbf16, #tpu.memory_space<vmem>>, %arg9: memref<4x1xf32, #tpu.memory_space<vmem>>, %arg10: memref<1x4x8xf32, #tpu.memory_space<vmem>>, %arg11: memref<128x64xf32, #tpu.memory_space<vmem>>, %arg12: memref<32x64xbf16, #tpu.memory_space<vmem>>) attributes {dimension_semantics = [#tpu.dimension_semantics<parallel>], iteration_bounds = array<i64: 1>, scalar_prefetch = 0 : i64, scratch_operands = 2 : i64, tpu.core_type = #tpu.core_type<tc>, window_params = [{transform_indices = @transform_0, window_bounds = array<i64: 1, 16, 64>}, {pipeline_mode = #tpu.pipeline_mode<synchronous>, transform_indices = @transform_1, window_bounds = array<i64: 128, 16>}, {pipeline_mode = #tpu.pipeline_mode<synchronous>, transform_indices = @transform_2, window_bounds = array<i64: 128, 32>}, {pipeline_mode = #tpu.pipeline_mode<synchronous>, transform_indices = @transform_3, window_bounds = array<i64: 128, 1>}, {pipeline_mode = #tpu.pipeline_mode<synchronous>, transform_indices = @transform_4, window_bounds = array<i64: 128, 32>}, {pipeline_mode = #tpu.pipeline_mode<synchronous>, transform_indices = @transform_5, window_bounds = array<i64: 128, 32>}, {pipeline_mode = #tpu.pipeline_mode<synchronous>, transform_indices = @transform_6, window_bounds = array<i64: 128, 1>}, {pipeline_mode = #tpu.pipeline_mode<synchronous>, transform_indices = @transform_7, window_bounds = array<i64: 4, 32>}, {pipeline_mode = #tpu.pipeline_mode<synchronous>, transform_indices = @transform_8, window_bounds = array<i64: 4, 1>}, {transform_indices = @transform_9, window_bounds = array<i64: 1, 4, 8>}]} {
    %c0 = arith.constant 0 : index
    %c0_0 = arith.constant 0 : index
    %0 = vector.load %arg2[%c0, %c0_0] : memref<128x16xbf16, #tpu.memory_space<vmem>>, vector<128x16xbf16>
    %c0_1 = arith.constant 0 : index
    %c0_2 = arith.constant 0 : index
    %1 = vector.load %arg3[%c0_1, %c0_2] : memref<128x32xbf16, #tpu.memory_space<vmem>>, vector<128x32xbf16>
    %c0_3 = arith.constant 0 : index
    %c0_4 = arith.constant 0 : index
    %2 = vector.load %arg4[%c0_3, %c0_4] : memref<128x1xf32, #tpu.memory_space<vmem>>, vector<128x1xf32>
    %c0_5 = arith.constant 0 : index
    %c0_6 = arith.constant 0 : index
    %c0_7 = arith.constant 0 : index
    %3 = vector.load %arg1[%c0_5, %c0_6, %c0_7] : memref<1x16x64xbf16, #tpu.memory_space<vmem>>, vector<1x16x64xbf16>
    %4 = vector.shape_cast %3 : vector<1x16x64xbf16> to vector<16x64xbf16>
    %cst = arith.constant dense<0.000000e+00> : vector<128x64xf32>
    %5 = tpu.matmul %0, %4, %cst {dimension_numbers = #tpu.dot_dimension_numbers<[1], [0], [0], [1], [0, 0, 1, 1], [], []>} : vector<128x16xbf16>, vector<16x64xbf16>, vector<128x64xf32> -> vector<128x64xf32>
    %6 = vector.broadcast %2 : vector<128x1xf32> to vector<128x64xf32>
    %7 = arith.addf %5, %6 : vector<128x64xf32>
    %c0_8 = arith.constant 0 : index
    %c0_9 = arith.constant 0 : index
    %8 = vector.load %arg11[%c0_8, %c0_9] : memref<128x64xf32, #tpu.memory_space<vmem>>, vector<128x64xf32>
    tpu.vector_store %arg11[%c0_8, %c0_9], %7 {strides = array<i32>} : memref<128x64xf32, #tpu.memory_space<vmem>>, vector<128x64xf32>,
    %cst_10 = arith.constant 0.000000e+00 : f32
    %9 = vector.broadcast %cst_10 : f32 to vector<32x8xf32>
    %cst_11 = arith.constant 0.000000e+00 : f32
    %10 = vector.broadcast %cst_11 : f32 to vector<32x8xf32>
    %c0_12 = arith.constant 0 : index
    %c0_13 = arith.constant 0 : index
    %11 = vector.load %arg11[%c0_12, %c0_13] : memref<128x64xf32, #tpu.memory_space<vmem>>, vector<128x8xf32>
    %12 = arith.truncf %9 : vector<32x8xf32> to vector<32x8xbf16>
    %cst_14 = arith.constant dense<0.000000e+00> : vector<128x8xf32>
    %13 = tpu.matmul %1, %12, %cst_14 {dimension_numbers = #tpu.dot_dimension_numbers<[1], [0], [0], [1], [0, 0, 1, 1], [], []>} : vector<128x32xbf16>, vector<32x8xbf16>, vector<128x8xf32> -> vector<128x8xf32>
    %14 = arith.addf %11, %13 : vector<128x8xf32>
    %15 = vector.extract_strided_slice %14 {offsets = [0, 0], sizes = [32, 8], strides = [1, 1]} : vector<128x8xf32> to vector<32x8xf32>
    %16 = arith.negf %15 : vector<32x8xf32>
    %17 = math.exp %16 : vector<32x8xf32>
    %cst_15 = arith.constant 1.000000e+00 : f32
    %18 = vector.broadcast %cst_15 : f32 to vector<32x8xf32>
    %19 = arith.addf %18, %17 : vector<32x8xf32>
    %20 = arith.divf %18, %19 : vector<32x8xf32>
    %21 = vector.extract_strided_slice %14 {offsets = [32, 0], sizes = [32, 8], strides = [1, 1]} : vector<128x8xf32> to vector<32x8xf32>
    %22 = arith.negf %21 : vector<32x8xf32>
    %23 = math.exp %22 : vector<32x8xf32>
    %cst_16 = arith.constant 1.000000e+00 : f32
    %24 = vector.broadcast %cst_16 : f32 to vector<32x8xf32>
    %25 = arith.addf %24, %23 : vector<32x8xf32>
    %26 = arith.divf %24, %25 : vector<32x8xf32>
    %27 = vector.extract_strided_slice %14 {offsets = [64, 0], sizes = [32, 8], strides = [1, 1]} : vector<128x8xf32> to vector<32x8xf32>
    %28 = math.tanh %27 : vector<32x8xf32>
    %29 = vector.extract_strided_slice %14 {offsets = [96, 0], sizes = [32, 8], strides = [1, 1]} : vector<128x8xf32> to vector<32x8xf32>
    %30 = arith.negf %29 : vector<32x8xf32>
    %31 = math.exp %30 : vector<32x8xf32>
    %cst_17 = arith.constant 1.000000e+00 : f32
    %32 = vector.broadcast %cst_17 : f32 to vector<32x8xf32>
    %33 = arith.addf %32, %31 : vector<32x8xf32>
    %34 = arith.divf %32, %33 : vector<32x8xf32>
    %35 = arith.mulf %26, %10 : vector<32x8xf32>
    %36 = arith.mulf %20, %28 : vector<32x8xf32>
    %37 = arith.addf %35, %36 : vector<32x8xf32>
    %38 = math.tanh %37 : vector<32x8xf32>
    %39 = arith.mulf %34, %38 : vector<32x8xf32>
    %40 = arith.truncf %39 : vector<32x8xf32> to vector<32x8xbf16>
    %c0_18 = arith.constant 0 : index
    %c0_19 = arith.constant 0 : index
    %41 = vector.load %arg12[%c0_18, %c0_19] : memref<32x64xbf16, #tpu.memory_space<vmem>>, vector<32x8xbf16>
    tpu.vector_store %arg12[%c0_18, %c0_19], %40 {strides = array<i32>} : memref<32x64xbf16, #tpu.memory_space<vmem>>, vector<32x8xbf16>,
    %c0_20 = arith.constant 0 : index
    %c8 = arith.constant 8 : index
    %42 = vector.load %arg11[%c0_20, %c8] : memref<128x64xf32, #tpu.memory_space<vmem>>, vector<128x8xf32>
    %43 = arith.truncf %39 : vector<32x8xf32> to vector<32x8xbf16>
    %cst_21 = arith.constant dense<0.000000e+00> : vector<128x8xf32>
    %44 = tpu.matmul %1, %43, %cst_21 {dimension_numbers = #tpu.dot_dimension_numbers<[1], [0], [0], [1], [0, 0, 1, 1], [], []>} : vector<128x32xbf16>, vector<32x8xbf16>, vector<128x8xf32> -> vector<128x8xf32>
    %45 = arith.addf %42, %44 : vector<128x8xf32>
    %46 = vector.extract_strided_slice %45 {offsets = [0, 0], sizes = [32, 8], strides = [1, 1]} : vector<128x8xf32> to vector<32x8xf32>
    %47 = arith.negf %46 : vector<32x8xf32>
    %48 = math.exp %47 : vector<32x8xf32>
    %cst_22 = arith.constant 1.000000e+00 : f32
    %49 = vector.broadcast %cst_22 : f32 to vector<32x8xf32>
    %50 = arith.addf %49, %48 : vector<32x8xf32>
    %51 = arith.divf %49, %50 : vector<32x8xf32>
    %52 = vector.extract_strided_slice %45 {offsets = [32, 0], sizes = [32, 8], strides = [1, 1]} : vector<128x8xf32> to vector<32x8xf32>
    %53 = arith.negf %52 : vector<32x8xf32>
    %54 = math.exp %53 : vector<32x8xf32>
    %cst_23 = arith.constant 1.000000e+00 : f32
    %55 = vector.broadcast %cst_23 : f32 to vector<32x8xf32>
    %56 = arith.addf %55, %54 : vector<32x8xf32>
    %57 = arith.divf %55, %56 : vector<32x8xf32>
    %58 = vector.extract_strided_slice %45 {offsets = [64, 0], sizes = [32, 8], strides = [1, 1]} : vector<128x8xf32> to vector<32x8xf32>
    %59 = math.tanh %58 : vector<32x8xf32>
    %60 = vector.extract_strided_slice %45 {offsets = [96, 0], sizes = [32, 8], strides = [1, 1]} : vector<128x8xf32> to vector<32x8xf32>
    %61 = arith.negf %60 : vector<32x8xf32>
    %62 = math.exp %61 : vector<32x8xf32>
    %cst_24 = arith.constant 1.000000e+00 : f32
    %63 = vector.broadcast %cst_24 : f32 to vector<32x8xf32>
    %64 = arith.addf %63, %62 : vector<32x8xf32>
    %65 = arith.divf %63, %64 : vector<32x8xf32>
    %66 = arith.mulf %57, %37 : vector<32x8xf32>
    %67 = arith.mulf %51, %59 : vector<32x8xf32>
    %68 = arith.addf %66, %67 : vector<32x8xf32>
    %69 = math.tanh %68 : vector<32x8xf32>
    %70 = arith.mulf %65, %69 : vector<32x8xf32>
    %71 = arith.truncf %70 : vector<32x8xf32> to vector<32x8xbf16>
    %c0_25 = arith.constant 0 : index
    %c8_26 = arith.constant 8 : index
    %72 = vector.load %arg12[%c0_25, %c8_26] : memref<32x64xbf16, #tpu.memory_space<vmem>>, vector<32x8xbf16>
    tpu.vector_store %arg12[%c0_25, %c8_26], %71 {strides = array<i32>} : memref<32x64xbf16, #tpu.memory_space<vmem>>, vector<32x8xbf16>,
    %c0_27 = arith.constant 0 : index
    %c16 = arith.constant 16 : index
    %73 = vector.load %arg11[%c0_27, %c16] : memref<128x64xf32, #tpu.memory_space<vmem>>, vector<128x8xf32>
    %74 = arith.truncf %70 : vector<32x8xf32> to vector<32x8xbf16>
    %cst_28 = arith.constant dense<0.000000e+00> : vector<128x8xf32>
    %75 = tpu.matmul %1, %74, %cst_28 {dimension_numbers = #tpu.dot_dimension_numbers<[1], [0], [0], [1], [0, 0, 1, 1], [], []>} : vector<128x32xbf16>, vector<32x8xbf16>, vector<128x8xf32> -> vector<128x8xf32>
    %76 = arith.addf %73, %75 : vector<128x8xf32>
    %77 = vector.extract_strided_slice %76 {offsets = [0, 0], sizes = [32, 8], strides = [1, 1]} : vector<128x8xf32> to vector<32x8xf32>
    %78 = arith.negf %77 : vector<32x8xf32>
    %79 = math.exp %78 : vector<32x8xf32>
    %cst_29 = arith.constant 1.000000e+00 : f32
    %80 = vector.broadcast %cst_29 : f32 to vector<32x8xf32>
    %81 = arith.addf %80, %79 : vector<32x8xf32>
    %82 = arith.divf %80, %81 : vector<32x8xf32>
    %83 = vector.extract_strided_slice %76 {offsets = [32, 0], sizes = [32, 8], strides = [1, 1]} : vector<128x8xf32> to vector<32x8xf32>
    %84 = arith.negf %83 : vector<32x8xf32>
    %85 = math.exp %84 : vector<32x8xf32>
    %cst_30 = arith.constant 1.000000e+00 : f32
    %86 = vector.broadcast %cst_30 : f32 to vector<32x8xf32>
    %87 = arith.addf %86, %85 : vector<32x8xf32>
    %88 = arith.divf %86, %87 : vector<32x8xf32>
    %89 = vector.extract_strided_slice %76 {offsets = [64, 0], sizes = [32, 8], strides = [1, 1]} : vector<128x8xf32> to vector<32x8xf32>
    %90 = math.tanh %89 : vector<32x8xf32>
    %91 = vector.extract_strided_slice %76 {offsets = [96, 0], sizes = [32, 8], strides = [1, 1]} : vector<128x8xf32> to vector<32x8xf32>
    %92 = arith.negf %91 : vector<32x8xf32>
    %93 = math.exp %92 : vector<32x8xf32>
    %cst_31 = arith.constant 1.000000e+00 : f32
    %94 = vector.broadcast %cst_31 : f32 to vector<32x8xf32>
    %95 = arith.addf %94, %93 : vector<32x8xf32>
    %96 = arith.divf %94, %95 : vector<32x8xf32>
    %97 = arith.mulf %88, %68 : vector<32x8xf32>
    %98 = arith.mulf %82, %90 : vector<32x8xf32>
    %99 = arith.addf %97, %98 : vector<32x8xf32>
    %100 = math.tanh %99 : vector<32x8xf32>
    %101 = arith.mulf %96, %100 : vector<32x8xf32>
    %102 = arith.truncf %101 : vector<32x8xf32> to vector<32x8xbf16>
    %c0_32 = arith.constant 0 : index
    %c16_33 = arith.constant 16 : index
    %103 = vector.load %arg12[%c0_32, %c16_33] : memref<32x64xbf16, #tpu.memory_space<vmem>>, vector<32x8xbf16>
    tpu.vector_store %arg12[%c0_32, %c16_33], %102 {strides = array<i32>} : memref<32x64xbf16, #tpu.memory_space<vmem>>, vector<32x8xbf16>,
    %c0_34 = arith.constant 0 : index
    %c24 = arith.constant 24 : index
    %104 = vector.load %arg11[%c0_34, %c24] : memref<128x64xf32, #tpu.memory_space<vmem>>, vector<128x8xf32>
    %105 = arith.truncf %101 : vector<32x8xf32> to vector<32x8xbf16>
    %cst_35 = arith.constant dense<0.000000e+00> : vector<128x8xf32>
    %106 = tpu.matmul %1, %105, %cst_35 {dimension_numbers = #tpu.dot_dimension_numbers<[1], [0], [0], [1], [0, 0, 1, 1], [], []>} : vector<128x32xbf16>, vector<32x8xbf16>, vector<128x8xf32> -> vector<128x8xf32>
    %107 = arith.addf %104, %106 : vector<128x8xf32>
    %108 = vector.extract_strided_slice %107 {offsets = [0, 0], sizes = [32, 8], strides = [1, 1]} : vector<128x8xf32> to vector<32x8xf32>
    %109 = arith.negf %108 : vector<32x8xf32>
    %110 = math.exp %109 : vector<32x8xf32>
    %cst_36 = arith.constant 1.000000e+00 : f32
    %111 = vector.broadcast %cst_36 : f32 to vector<32x8xf32>
    %112 = arith.addf %111, %110 : vector<32x8xf32>
    %113 = arith.divf %111, %112 : vector<32x8xf32>
    %114 = vector.extract_strided_slice %107 {offsets = [32, 0], sizes = [32, 8], strides = [1, 1]} : vector<128x8xf32> to vector<32x8xf32>
    %115 = arith.negf %114 : vector<32x8xf32>
    %116 = math.exp %115 : vector<32x8xf32>
    %cst_37 = arith.constant 1.000000e+00 : f32
    %117 = vector.broadcast %cst_37 : f32 to vector<32x8xf32>
    %118 = arith.addf %117, %116 : vector<32x8xf32>
    %119 = arith.divf %117, %118 : vector<32x8xf32>
    %120 = vector.extract_strided_slice %107 {offsets = [64, 0], sizes = [32, 8], strides = [1, 1]} : vector<128x8xf32> to vector<32x8xf32>
    %121 = math.tanh %120 : vector<32x8xf32>
    %122 = vector.extract_strided_slice %107 {offsets = [96, 0], sizes = [32, 8], strides = [1, 1]} : vector<128x8xf32> to vector<32x8xf32>
    %123 = arith.negf %122 : vector<32x8xf32>
    %124 = math.exp %123 : vector<32x8xf32>
    %cst_38 = arith.constant 1.000000e+00 : f32
    %125 = vector.broadcast %cst_38 : f32 to vector<32x8xf32>
    %126 = arith.addf %125, %124 : vector<32x8xf32>
    %127 = arith.divf %125, %126 : vector<32x8xf32>
    %128 = arith.mulf %119, %99 : vector<32x8xf32>
    %129 = arith.mulf %113, %121 : vector<32x8xf32>
    %130 = arith.addf %128, %129 : vector<32x8xf32>
    %131 = math.tanh %130 : vector<32x8xf32>
    %132 = arith.mulf %127, %131 : vector<32x8xf32>
    %133 = arith.truncf %132 : vector<32x8xf32> to vector<32x8xbf16>
    %c0_39 = arith.constant 0 : index
    %c24_40 = arith.constant 24 : index
    %134 = vector.load %arg12[%c0_39, %c24_40] : memref<32x64xbf16, #tpu.memory_space<vmem>>, vector<32x8xbf16>
    tpu.vector_store %arg12[%c0_39, %c24_40], %133 {strides = array<i32>} : memref<32x64xbf16, #tpu.memory_space<vmem>>, vector<32x8xbf16>,
    %c0_41 = arith.constant 0 : index
    %c32 = arith.constant 32 : index
    %135 = vector.load %arg11[%c0_41, %c32] : memref<128x64xf32, #tpu.memory_space<vmem>>, vector<128x8xf32>
    %136 = arith.truncf %132 : vector<32x8xf32> to vector<32x8xbf16>
    %cst_42 = arith.constant dense<0.000000e+00> : vector<128x8xf32>
    %137 = tpu.matmul %1, %136, %cst_42 {dimension_numbers = #tpu.dot_dimension_numbers<[1], [0], [0], [1], [0, 0, 1, 1], [], []>} : vector<128x32xbf16>, vector<32x8xbf16>, vector<128x8xf32> -> vector<128x8xf32>
    %138 = arith.addf %135, %137 : vector<128x8xf32>
    %139 = vector.extract_strided_slice %138 {offsets = [0, 0], sizes = [32, 8], strides = [1, 1]} : vector<128x8xf32> to vector<32x8xf32>
    %140 = arith.negf %139 : vector<32x8xf32>
    %141 = math.exp %140 : vector<32x8xf32>
    %cst_43 = arith.constant 1.000000e+00 : f32
    %142 = vector.broadcast %cst_43 : f32 to vector<32x8xf32>
    %143 = arith.addf %142, %141 : vector<32x8xf32>
    %144 = arith.divf %142, %143 : vector<32x8xf32>
    %145 = vector.extract_strided_slice %138 {offsets = [32, 0], sizes = [32, 8], strides = [1, 1]} : vector<128x8xf32> to vector<32x8xf32>
    %146 = arith.negf %145 : vector<32x8xf32>
    %147 = math.exp %146 : vector<32x8xf32>
    %cst_44 = arith.constant 1.000000e+00 : f32
    %148 = vector.broadcast %cst_44 : f32 to vector<32x8xf32>
    %149 = arith.addf %148, %147 : vector<32x8xf32>
    %150 = arith.divf %148, %149 : vector<32x8xf32>
    %151 = vector.extract_strided_slice %138 {offsets = [64, 0], sizes = [32, 8], strides = [1, 1]} : vector<128x8xf32> to vector<32x8xf32>
    %152 = math.tanh %151 : vector<32x8xf32>
    %153 = vector.extract_strided_slice %138 {offsets = [96, 0], sizes = [32, 8], strides = [1, 1]} : vector<128x8xf32> to vector<32x8xf32>
    %154 = arith.negf %153 : vector<32x8xf32>
    %155 = math.exp %154 : vector<32x8xf32>
    %cst_45 = arith.constant 1.000000e+00 : f32
    %156 = vector.broadcast %cst_45 : f32 to vector<32x8xf32>
    %157 = arith.addf %156, %155 : vector<32x8xf32>
    %158 = arith.divf %156, %157 : vector<32x8xf32>
    %159 = arith.mulf %150, %130 : vector<32x8xf32>
    %160 = arith.mulf %144, %152 : vector<32x8xf32>
    %161 = arith.addf %159, %160 : vector<32x8xf32>
    %162 = math.tanh %161 : vector<32x8xf32>
    %163 = arith.mulf %158, %162 : vector<32x8xf32>
    %164 = arith.truncf %163 : vector<32x8xf32> to vector<32x8xbf16>
    %c0_46 = arith.constant 0 : index
    %c32_47 = arith.constant 32 : index
    %165 = vector.load %arg12[%c0_46, %c32_47] : memref<32x64xbf16, #tpu.memory_space<vmem>>, vector<32x8xbf16>
    tpu.vector_store %arg12[%c0_46, %c32_47], %164 {strides = array<i32>} : memref<32x64xbf16, #tpu.memory_space<vmem>>, vector<32x8xbf16>,
    %c0_48 = arith.constant 0 : index
    %c40 = arith.constant 40 : index
    %166 = vector.load %arg11[%c0_48, %c40] : memref<128x64xf32, #tpu.memory_space<vmem>>, vector<128x8xf32>
    %167 = arith.truncf %163 : vector<32x8xf32> to vector<32x8xbf16>
    %cst_49 = arith.constant dense<0.000000e+00> : vector<128x8xf32>
    %168 = tpu.matmul %1, %167, %cst_49 {dimension_numbers = #tpu.dot_dimension_numbers<[1], [0], [0], [1], [0, 0, 1, 1], [], []>} : vector<128x32xbf16>, vector<32x8xbf16>, vector<128x8xf32> -> vector<128x8xf32>
    %169 = arith.addf %166, %168 : vector<128x8xf32>
    %170 = vector.extract_strided_slice %169 {offsets = [0, 0], sizes = [32, 8], strides = [1, 1]} : vector<128x8xf32> to vector<32x8xf32>
    %171 = arith.negf %170 : vector<32x8xf32>
    %172 = math.exp %171 : vector<32x8xf32>
    %cst_50 = arith.constant 1.000000e+00 : f32
    %173 = vector.broadcast %cst_50 : f32 to vector<32x8xf32>
    %174 = arith.addf %173, %172 : vector<32x8xf32>
    %175 = arith.divf %173, %174 : vector<32x8xf32>
    %176 = vector.extract_strided_slice %169 {offsets = [32, 0], sizes = [32, 8], strides = [1, 1]} : vector<128x8xf32> to vector<32x8xf32>
    %177 = arith.negf %176 : vector<32x8xf32>
    %178 = math.exp %177 : vector<32x8xf32>
    %cst_51 = arith.constant 1.000000e+00 : f32
    %179 = vector.broadcast %cst_51 : f32 to vector<32x8xf32>
    %180 = arith.addf %179, %178 : vector<32x8xf32>
    %181 = arith.divf %179, %180 : vector<32x8xf32>
    %182 = vector.extract_strided_slice %169 {offsets = [64, 0], sizes = [32, 8], strides = [1, 1]} : vector<128x8xf32> to vector<32x8xf32>
    %183 = math.tanh %182 : vector<32x8xf32>
    %184 = vector.extract_strided_slice %169 {offsets = [96, 0], sizes = [32, 8], strides = [1, 1]} : vector<128x8xf32> to vector<32x8xf32>
    %185 = arith.negf %184 : vector<32x8xf32>
    %186 = math.exp %185 : vector<32x8xf32>
    %cst_52 = arith.constant 1.000000e+00 : f32
    %187 = vector.broadcast %cst_52 : f32 to vector<32x8xf32>
    %188 = arith.addf %187, %186 : vector<32x8xf32>
    %189 = arith.divf %187, %188 : vector<32x8xf32>
    %190 = arith.mulf %181, %161 : vector<32x8xf32>
    %191 = arith.mulf %175, %183 : vector<32x8xf32>
    %192 = arith.addf %190, %191 : vector<32x8xf32>
    %193 = math.tanh %192 : vector<32x8xf32>
    %194 = arith.mulf %189, %193 : vector<32x8xf32>
    %195 = arith.truncf %194 : vector<32x8xf32> to vector<32x8xbf16>
    %c0_53 = arith.constant 0 : index
    %c40_54 = arith.constant 40 : index
    %196 = vector.load %arg12[%c0_53, %c40_54] : memref<32x64xbf16, #tpu.memory_space<vmem>>, vector<32x8xbf16>
    tpu.vector_store %arg12[%c0_53, %c40_54], %195 {strides = array<i32>} : memref<32x64xbf16, #tpu.memory_space<vmem>>, vector<32x8xbf16>,
    %c0_55 = arith.constant 0 : index
    %c48 = arith.constant 48 : index
    %197 = vector.load %arg11[%c0_55, %c48] : memref<128x64xf32, #tpu.memory_space<vmem>>, vector<128x8xf32>
    %198 = arith.truncf %194 : vector<32x8xf32> to vector<32x8xbf16>
    %cst_56 = arith.constant dense<0.000000e+00> : vector<128x8xf32>
    %199 = tpu.matmul %1, %198, %cst_56 {dimension_numbers = #tpu.dot_dimension_numbers<[1], [0], [0], [1], [0, 0, 1, 1], [], []>} : vector<128x32xbf16>, vector<32x8xbf16>, vector<128x8xf32> -> vector<128x8xf32>
    %200 = arith.addf %197, %199 : vector<128x8xf32>
    %201 = vector.extract_strided_slice %200 {offsets = [0, 0], sizes = [32, 8], strides = [1, 1]} : vector<128x8xf32> to vector<32x8xf32>
    %202 = arith.negf %201 : vector<32x8xf32>
    %203 = math.exp %202 : vector<32x8xf32>
    %cst_57 = arith.constant 1.000000e+00 : f32
    %204 = vector.broadcast %cst_57 : f32 to vector<32x8xf32>
    %205 = arith.addf %204, %203 : vector<32x8xf32>
    %206 = arith.divf %204, %205 : vector<32x8xf32>
    %207 = vector.extract_strided_slice %200 {offsets = [32, 0], sizes = [32, 8], strides = [1, 1]} : vector<128x8xf32> to vector<32x8xf32>
    %208 = arith.negf %207 : vector<32x8xf32>
    %209 = math.exp %208 : vector<32x8xf32>
    %cst_58 = arith.constant 1.000000e+00 : f32
    %210 = vector.broadcast %cst_58 : f32 to vector<32x8xf32>
    %211 = arith.addf %210, %209 : vector<32x8xf32>
    %212 = arith.divf %210, %211 : vector<32x8xf32>
    %213 = vector.extract_strided_slice %200 {offsets = [64, 0], sizes = [32, 8], strides = [1, 1]} : vector<128x8xf32> to vector<32x8xf32>
    %214 = math.tanh %213 : vector<32x8xf32>
    %215 = vector.extract_strided_slice %200 {offsets = [96, 0], sizes = [32, 8], strides = [1, 1]} : vector<128x8xf32> to vector<32x8xf32>
    %216 = arith.negf %215 : vector<32x8xf32>
    %217 = math.exp %216 : vector<32x8xf32>
    %cst_59 = arith.constant 1.000000e+00 : f32
    %218 = vector.broadcast %cst_59 : f32 to vector<32x8xf32>
    %219 = arith.addf %218, %217 : vector<32x8xf32>
    %220 = arith.divf %218, %219 : vector<32x8xf32>
    %221 = arith.mulf %212, %192 : vector<32x8xf32>
    %222 = arith.mulf %206, %214 : vector<32x8xf32>
    %223 = arith.addf %221, %222 : vector<32x8xf32>
    %224 = math.tanh %223 : vector<32x8xf32>
    %225 = arith.mulf %220, %224 : vector<32x8xf32>
    %226 = arith.truncf %225 : vector<32x8xf32> to vector<32x8xbf16>
    %c0_60 = arith.constant 0 : index
    %c48_61 = arith.constant 48 : index
    %227 = vector.load %arg12[%c0_60, %c48_61] : memref<32x64xbf16, #tpu.memory_space<vmem>>, vector<32x8xbf16>
    tpu.vector_store %arg12[%c0_60, %c48_61], %226 {strides = array<i32>} : memref<32x64xbf16, #tpu.memory_space<vmem>>, vector<32x8xbf16>,
    %c0_62 = arith.constant 0 : index
    %c56 = arith.constant 56 : index
    %228 = vector.load %arg11[%c0_62, %c56] : memref<128x64xf32, #tpu.memory_space<vmem>>, vector<128x8xf32>
    %229 = arith.truncf %225 : vector<32x8xf32> to vector<32x8xbf16>
    %cst_63 = arith.constant dense<0.000000e+00> : vector<128x8xf32>
    %230 = tpu.matmul %1, %229, %cst_63 {dimension_numbers = #tpu.dot_dimension_numbers<[1], [0], [0], [1], [0, 0, 1, 1], [], []>} : vector<128x32xbf16>, vector<32x8xbf16>, vector<128x8xf32> -> vector<128x8xf32>
    %231 = arith.addf %228, %230 : vector<128x8xf32>
    %232 = vector.extract_strided_slice %231 {offsets = [0, 0], sizes = [32, 8], strides = [1, 1]} : vector<128x8xf32> to vector<32x8xf32>
    %233 = arith.negf %232 : vector<32x8xf32>
    %234 = math.exp %233 : vector<32x8xf32>
    %cst_64 = arith.constant 1.000000e+00 : f32
    %235 = vector.broadcast %cst_64 : f32 to vector<32x8xf32>
    %236 = arith.addf %235, %234 : vector<32x8xf32>
    %237 = arith.divf %235, %236 : vector<32x8xf32>
    %238 = vector.extract_strided_slice %231 {offsets = [32, 0], sizes = [32, 8], strides = [1, 1]} : vector<128x8xf32> to vector<32x8xf32>
    %239 = arith.negf %238 : vector<32x8xf32>
    %240 = math.exp %239 : vector<32x8xf32>
    %cst_65 = arith.constant 1.000000e+00 : f32
    %241 = vector.broadcast %cst_65 : f32 to vector<32x8xf32>
    %242 = arith.addf %241, %240 : vector<32x8xf32>
    %243 = arith.divf %241, %242 : vector<32x8xf32>
    %244 = vector.extract_strided_slice %231 {offsets = [64, 0], sizes = [32, 8], strides = [1, 1]} : vector<128x8xf32> to vector<32x8xf32>
    %245 = math.tanh %244 : vector<32x8xf32>
    %246 = vector.extract_strided_slice %231 {offsets = [96, 0], sizes = [32, 8], strides = [1, 1]} : vector<128x8xf32> to vector<32x8xf32>
    %247 = arith.negf %246 : vector<32x8xf32>
    %248 = math.exp %247 : vector<32x8xf32>
    %cst_66 = arith.constant 1.000000e+00 : f32
    %249 = vector.broadcast %cst_66 : f32 to vector<32x8xf32>
    %250 = arith.addf %249, %248 : vector<32x8xf32>
    %251 = arith.divf %249, %250 : vector<32x8xf32>
    %252 = arith.mulf %243, %223 : vector<32x8xf32>
    %253 = arith.mulf %237, %245 : vector<32x8xf32>
    %254 = arith.addf %252, %253 : vector<32x8xf32>
    %255 = math.tanh %254 : vector<32x8xf32>
    %256 = arith.mulf %251, %255 : vector<32x8xf32>
    %257 = arith.truncf %256 : vector<32x8xf32> to vector<32x8xbf16>
    %c0_67 = arith.constant 0 : index
    %c56_68 = arith.constant 56 : index
    %258 = vector.load %arg12[%c0_67, %c56_68] : memref<32x64xbf16, #tpu.memory_space<vmem>>, vector<32x8xbf16>
    tpu.vector_store %arg12[%c0_67, %c56_68], %257 {strides = array<i32>} : memref<32x64xbf16, #tpu.memory_space<vmem>>, vector<32x8xbf16>,
    %c0_69 = arith.constant 0 : index
    %c0_70 = arith.constant 0 : index
    %259 = vector.load %arg5[%c0_69, %c0_70] : memref<128x32xbf16, #tpu.memory_space<vmem>>, vector<128x32xbf16>
    %c0_71 = arith.constant 0 : index
    %c0_72 = arith.constant 0 : index
    %260 = vector.load %arg6[%c0_71, %c0_72] : memref<128x32xbf16, #tpu.memory_space<vmem>>, vector<128x32xbf16>
    %c0_73 = arith.constant 0 : index
    %c0_74 = arith.constant 0 : index
    %261 = vector.load %arg7[%c0_73, %c0_74] : memref<128x1xf32, #tpu.memory_space<vmem>>, vector<128x1xf32>
    %c0_75 = arith.constant 0 : index
    %c0_76 = arith.constant 0 : index
    %262 = vector.load %arg12[%c0_75, %c0_76] : memref<32x64xbf16, #tpu.memory_space<vmem>>, vector<32x64xbf16>
    %cst_77 = arith.constant dense<0.000000e+00> : vector<128x64xf32>
    %263 = tpu.matmul %259, %262, %cst_77 {dimension_numbers = #tpu.dot_dimension_numbers<[1], [0], [0], [1], [0, 0, 1, 1], [], []>} : vector<128x32xbf16>, vector<32x64xbf16>, vector<128x64xf32> -> vector<128x64xf32>
    %264 = vector.broadcast %261 : vector<128x1xf32> to vector<128x64xf32>
    %265 = arith.addf %263, %264 : vector<128x64xf32>
    %c0_78 = arith.constant 0 : index
    %c0_79 = arith.constant 0 : index
    %266 = vector.load %arg11[%c0_78, %c0_79] : memref<128x64xf32, #tpu.memory_space<vmem>>, vector<128x64xf32>
    tpu.vector_store %arg11[%c0_78, %c0_79], %265 {strides = array<i32>} : memref<128x64xf32, #tpu.memory_space<vmem>>, vector<128x64xf32>,
    %cst_80 = arith.constant 0.000000e+00 : f32
    %267 = vector.broadcast %cst_80 : f32 to vector<32x8xf32>
    %cst_81 = arith.constant 0.000000e+00 : f32
    %268 = vector.broadcast %cst_81 : f32 to vector<32x8xf32>
    %c0_82 = arith.constant 0 : index
    %c0_83 = arith.constant 0 : index
    %269 = vector.load %arg11[%c0_82, %c0_83] : memref<128x64xf32, #tpu.memory_space<vmem>>, vector<128x8xf32>
    %270 = arith.truncf %267 : vector<32x8xf32> to vector<32x8xbf16>
    %cst_84 = arith.constant dense<0.000000e+00> : vector<128x8xf32>
    %271 = tpu.matmul %260, %270, %cst_84 {dimension_numbers = #tpu.dot_dimension_numbers<[1], [0], [0], [1], [0, 0, 1, 1], [], []>} : vector<128x32xbf16>, vector<32x8xbf16>, vector<128x8xf32> -> vector<128x8xf32>
    %272 = arith.addf %269, %271 : vector<128x8xf32>
    %273 = vector.extract_strided_slice %272 {offsets = [0, 0], sizes = [32, 8], strides = [1, 1]} : vector<128x8xf32> to vector<32x8xf32>
    %274 = arith.negf %273 : vector<32x8xf32>
    %275 = math.exp %274 : vector<32x8xf32>
    %cst_85 = arith.constant 1.000000e+00 : f32
    %276 = vector.broadcast %cst_85 : f32 to vector<32x8xf32>
    %277 = arith.addf %276, %275 : vector<32x8xf32>
    %278 = arith.divf %276, %277 : vector<32x8xf32>
    %279 = vector.extract_strided_slice %272 {offsets = [32, 0], sizes = [32, 8], strides = [1, 1]} : vector<128x8xf32> to vector<32x8xf32>
    %280 = arith.negf %279 : vector<32x8xf32>
    %281 = math.exp %280 : vector<32x8xf32>
    %cst_86 = arith.constant 1.000000e+00 : f32
    %282 = vector.broadcast %cst_86 : f32 to vector<32x8xf32>
    %283 = arith.addf %282, %281 : vector<32x8xf32>
    %284 = arith.divf %282, %283 : vector<32x8xf32>
    %285 = vector.extract_strided_slice %272 {offsets = [64, 0], sizes = [32, 8], strides = [1, 1]} : vector<128x8xf32> to vector<32x8xf32>
    %286 = math.tanh %285 : vector<32x8xf32>
    %287 = vector.extract_strided_slice %272 {offsets = [96, 0], sizes = [32, 8], strides = [1, 1]} : vector<128x8xf32> to vector<32x8xf32>
    %288 = arith.negf %287 : vector<32x8xf32>
    %289 = math.exp %288 : vector<32x8xf32>
    %cst_87 = arith.constant 1.000000e+00 : f32
    %290 = vector.broadcast %cst_87 : f32 to vector<32x8xf32>
    %291 = arith.addf %290, %289 : vector<32x8xf32>
    %292 = arith.divf %290, %291 : vector<32x8xf32>
    %293 = arith.mulf %284, %268 : vector<32x8xf32>
    %294 = arith.mulf %278, %286 : vector<32x8xf32>
    %295 = arith.addf %293, %294 : vector<32x8xf32>
    %296 = math.tanh %295 : vector<32x8xf32>
    %297 = arith.mulf %292, %296 : vector<32x8xf32>
    %c0_88 = arith.constant 0 : index
    %c8_89 = arith.constant 8 : index
    %298 = vector.load %arg11[%c0_88, %c8_89] : memref<128x64xf32, #tpu.memory_space<vmem>>, vector<128x8xf32>
    %299 = arith.truncf %297 : vector<32x8xf32> to vector<32x8xbf16>
    %cst_90 = arith.constant dense<0.000000e+00> : vector<128x8xf32>
    %300 = tpu.matmul %260, %299, %cst_90 {dimension_numbers = #tpu.dot_dimension_numbers<[1], [0], [0], [1], [0, 0, 1, 1], [], []>} : vector<128x32xbf16>, vector<32x8xbf16>, vector<128x8xf32> -> vector<128x8xf32>
    %301 = arith.addf %298, %300 : vector<128x8xf32>
    %302 = vector.extract_strided_slice %301 {offsets = [0, 0], sizes = [32, 8], strides = [1, 1]} : vector<128x8xf32> to vector<32x8xf32>
    %303 = arith.negf %302 : vector<32x8xf32>
    %304 = math.exp %303 : vector<32x8xf32>
    %cst_91 = arith.constant 1.000000e+00 : f32
    %305 = vector.broadcast %cst_91 : f32 to vector<32x8xf32>
    %306 = arith.addf %305, %304 : vector<32x8xf32>
    %307 = arith.divf %305, %306 : vector<32x8xf32>
    %308 = vector.extract_strided_slice %301 {offsets = [32, 0], sizes = [32, 8], strides = [1, 1]} : vector<128x8xf32> to vector<32x8xf32>
    %309 = arith.negf %308 : vector<32x8xf32>
    %310 = math.exp %309 : vector<32x8xf32>
    %cst_92 = arith.constant 1.000000e+00 : f32
    %311 = vector.broadcast %cst_92 : f32 to vector<32x8xf32>
    %312 = arith.addf %311, %310 : vector<32x8xf32>
    %313 = arith.divf %311, %312 : vector<32x8xf32>
    %314 = vector.extract_strided_slice %301 {offsets = [64, 0], sizes = [32, 8], strides = [1, 1]} : vector<128x8xf32> to vector<32x8xf32>
    %315 = math.tanh %314 : vector<32x8xf32>
    %316 = vector.extract_strided_slice %301 {offsets = [96, 0], sizes = [32, 8], strides = [1, 1]} : vector<128x8xf32> to vector<32x8xf32>
    %317 = arith.negf %316 : vector<32x8xf32>
    %318 = math.exp %317 : vector<32x8xf32>
    %cst_93 = arith.constant 1.000000e+00 : f32
    %319 = vector.broadcast %cst_93 : f32 to vector<32x8xf32>
    %320 = arith.addf %319, %318 : vector<32x8xf32>
    %321 = arith.divf %319, %320 : vector<32x8xf32>
    %322 = arith.mulf %313, %295 : vector<32x8xf32>
    %323 = arith.mulf %307, %315 : vector<32x8xf32>
    %324 = arith.addf %322, %323 : vector<32x8xf32>
    %325 = math.tanh %324 : vector<32x8xf32>
    %326 = arith.mulf %321, %325 : vector<32x8xf32>
    %c0_94 = arith.constant 0 : index
    %c16_95 = arith.constant 16 : index
    %327 = vector.load %arg11[%c0_94, %c16_95] : memref<128x64xf32, #tpu.memory_space<vmem>>, vector<128x8xf32>
    %328 = arith.truncf %326 : vector<32x8xf32> to vector<32x8xbf16>
    %cst_96 = arith.constant dense<0.000000e+00> : vector<128x8xf32>
    %329 = tpu.matmul %260, %328, %cst_96 {dimension_numbers = #tpu.dot_dimension_numbers<[1], [0], [0], [1], [0, 0, 1, 1], [], []>} : vector<128x32xbf16>, vector<32x8xbf16>, vector<128x8xf32> -> vector<128x8xf32>
    %330 = arith.addf %327, %329 : vector<128x8xf32>
    %331 = vector.extract_strided_slice %330 {offsets = [0, 0], sizes = [32, 8], strides = [1, 1]} : vector<128x8xf32> to vector<32x8xf32>
    %332 = arith.negf %331 : vector<32x8xf32>
    %333 = math.exp %332 : vector<32x8xf32>
    %cst_97 = arith.constant 1.000000e+00 : f32
    %334 = vector.broadcast %cst_97 : f32 to vector<32x8xf32>
    %335 = arith.addf %334, %333 : vector<32x8xf32>
    %336 = arith.divf %334, %335 : vector<32x8xf32>
    %337 = vector.extract_strided_slice %330 {offsets = [32, 0], sizes = [32, 8], strides = [1, 1]} : vector<128x8xf32> to vector<32x8xf32>
    %338 = arith.negf %337 : vector<32x8xf32>
    %339 = math.exp %338 : vector<32x8xf32>
    %cst_98 = arith.constant 1.000000e+00 : f32
    %340 = vector.broadcast %cst_98 : f32 to vector<32x8xf32>
    %341 = arith.addf %340, %339 : vector<32x8xf32>
    %342 = arith.divf %340, %341 : vector<32x8xf32>
    %343 = vector.extract_strided_slice %330 {offsets = [64, 0], sizes = [32, 8], strides = [1, 1]} : vector<128x8xf32> to vector<32x8xf32>
    %344 = math.tanh %343 : vector<32x8xf32>
    %345 = vector.extract_strided_slice %330 {offsets = [96, 0], sizes = [32, 8], strides = [1, 1]} : vector<128x8xf32> to vector<32x8xf32>
    %346 = arith.negf %345 : vector<32x8xf32>
    %347 = math.exp %346 : vector<32x8xf32>
    %cst_99 = arith.constant 1.000000e+00 : f32
    %348 = vector.broadcast %cst_99 : f32 to vector<32x8xf32>
    %349 = arith.addf %348, %347 : vector<32x8xf32>
    %350 = arith.divf %348, %349 : vector<32x8xf32>
    %351 = arith.mulf %342, %324 : vector<32x8xf32>
    %352 = arith.mulf %336, %344 : vector<32x8xf32>
    %353 = arith.addf %351, %352 : vector<32x8xf32>
    %354 = math.tanh %353 : vector<32x8xf32>
    %355 = arith.mulf %350, %354 : vector<32x8xf32>
    %c0_100 = arith.constant 0 : index
    %c24_101 = arith.constant 24 : index
    %356 = vector.load %arg11[%c0_100, %c24_101] : memref<128x64xf32, #tpu.memory_space<vmem>>, vector<128x8xf32>
    %357 = arith.truncf %355 : vector<32x8xf32> to vector<32x8xbf16>
    %cst_102 = arith.constant dense<0.000000e+00> : vector<128x8xf32>
    %358 = tpu.matmul %260, %357, %cst_102 {dimension_numbers = #tpu.dot_dimension_numbers<[1], [0], [0], [1], [0, 0, 1, 1], [], []>} : vector<128x32xbf16>, vector<32x8xbf16>, vector<128x8xf32> -> vector<128x8xf32>
    %359 = arith.addf %356, %358 : vector<128x8xf32>
    %360 = vector.extract_strided_slice %359 {offsets = [0, 0], sizes = [32, 8], strides = [1, 1]} : vector<128x8xf32> to vector<32x8xf32>
    %361 = arith.negf %360 : vector<32x8xf32>
    %362 = math.exp %361 : vector<32x8xf32>
    %cst_103 = arith.constant 1.000000e+00 : f32
    %363 = vector.broadcast %cst_103 : f32 to vector<32x8xf32>
    %364 = arith.addf %363, %362 : vector<32x8xf32>
    %365 = arith.divf %363, %364 : vector<32x8xf32>
    %366 = vector.extract_strided_slice %359 {offsets = [32, 0], sizes = [32, 8], strides = [1, 1]} : vector<128x8xf32> to vector<32x8xf32>
    %367 = arith.negf %366 : vector<32x8xf32>
    %368 = math.exp %367 : vector<32x8xf32>
    %cst_104 = arith.constant 1.000000e+00 : f32
    %369 = vector.broadcast %cst_104 : f32 to vector<32x8xf32>
    %370 = arith.addf %369, %368 : vector<32x8xf32>
    %371 = arith.divf %369, %370 : vector<32x8xf32>
    %372 = vector.extract_strided_slice %359 {offsets = [64, 0], sizes = [32, 8], strides = [1, 1]} : vector<128x8xf32> to vector<32x8xf32>
    %373 = math.tanh %372 : vector<32x8xf32>
    %374 = vector.extract_strided_slice %359 {offsets = [96, 0], sizes = [32, 8], strides = [1, 1]} : vector<128x8xf32> to vector<32x8xf32>
    %375 = arith.negf %374 : vector<32x8xf32>
    %376 = math.exp %375 : vector<32x8xf32>
    %cst_105 = arith.constant 1.000000e+00 : f32
    %377 = vector.broadcast %cst_105 : f32 to vector<32x8xf32>
    %378 = arith.addf %377, %376 : vector<32x8xf32>
    %379 = arith.divf %377, %378 : vector<32x8xf32>
    %380 = arith.mulf %371, %353 : vector<32x8xf32>
    %381 = arith.mulf %365, %373 : vector<32x8xf32>
    %382 = arith.addf %380, %381 : vector<32x8xf32>
    %383 = math.tanh %382 : vector<32x8xf32>
    %384 = arith.mulf %379, %383 : vector<32x8xf32>
    %c0_106 = arith.constant 0 : index
    %c32_107 = arith.constant 32 : index
    %385 = vector.load %arg11[%c0_106, %c32_107] : memref<128x64xf32, #tpu.memory_space<vmem>>, vector<128x8xf32>
    %386 = arith.truncf %384 : vector<32x8xf32> to vector<32x8xbf16>
    %cst_108 = arith.constant dense<0.000000e+00> : vector<128x8xf32>
    %387 = tpu.matmul %260, %386, %cst_108 {dimension_numbers = #tpu.dot_dimension_numbers<[1], [0], [0], [1], [0, 0, 1, 1], [], []>} : vector<128x32xbf16>, vector<32x8xbf16>, vector<128x8xf32> -> vector<128x8xf32>
    %388 = arith.addf %385, %387 : vector<128x8xf32>
    %389 = vector.extract_strided_slice %388 {offsets = [0, 0], sizes = [32, 8], strides = [1, 1]} : vector<128x8xf32> to vector<32x8xf32>
    %390 = arith.negf %389 : vector<32x8xf32>
    %391 = math.exp %390 : vector<32x8xf32>
    %cst_109 = arith.constant 1.000000e+00 : f32
    %392 = vector.broadcast %cst_109 : f32 to vector<32x8xf32>
    %393 = arith.addf %392, %391 : vector<32x8xf32>
    %394 = arith.divf %392, %393 : vector<32x8xf32>
    %395 = vector.extract_strided_slice %388 {offsets = [32, 0], sizes = [32, 8], strides = [1, 1]} : vector<128x8xf32> to vector<32x8xf32>
    %396 = arith.negf %395 : vector<32x8xf32>
    %397 = math.exp %396 : vector<32x8xf32>
    %cst_110 = arith.constant 1.000000e+00 : f32
    %398 = vector.broadcast %cst_110 : f32 to vector<32x8xf32>
    %399 = arith.addf %398, %397 : vector<32x8xf32>
    %400 = arith.divf %398, %399 : vector<32x8xf32>
    %401 = vector.extract_strided_slice %388 {offsets = [64, 0], sizes = [32, 8], strides = [1, 1]} : vector<128x8xf32> to vector<32x8xf32>
    %402 = math.tanh %401 : vector<32x8xf32>
    %403 = vector.extract_strided_slice %388 {offsets = [96, 0], sizes = [32, 8], strides = [1, 1]} : vector<128x8xf32> to vector<32x8xf32>
    %404 = arith.negf %403 : vector<32x8xf32>
    %405 = math.exp %404 : vector<32x8xf32>
    %cst_111 = arith.constant 1.000000e+00 : f32
    %406 = vector.broadcast %cst_111 : f32 to vector<32x8xf32>
    %407 = arith.addf %406, %405 : vector<32x8xf32>
    %408 = arith.divf %406, %407 : vector<32x8xf32>
    %409 = arith.mulf %400, %382 : vector<32x8xf32>
    %410 = arith.mulf %394, %402 : vector<32x8xf32>
    %411 = arith.addf %409, %410 : vector<32x8xf32>
    %412 = math.tanh %411 : vector<32x8xf32>
    %413 = arith.mulf %408, %412 : vector<32x8xf32>
    %c0_112 = arith.constant 0 : index
    %c40_113 = arith.constant 40 : index
    %414 = vector.load %arg11[%c0_112, %c40_113] : memref<128x64xf32, #tpu.memory_space<vmem>>, vector<128x8xf32>
    %415 = arith.truncf %413 : vector<32x8xf32> to vector<32x8xbf16>
    %cst_114 = arith.constant dense<0.000000e+00> : vector<128x8xf32>
    %416 = tpu.matmul %260, %415, %cst_114 {dimension_numbers = #tpu.dot_dimension_numbers<[1], [0], [0], [1], [0, 0, 1, 1], [], []>} : vector<128x32xbf16>, vector<32x8xbf16>, vector<128x8xf32> -> vector<128x8xf32>
    %417 = arith.addf %414, %416 : vector<128x8xf32>
    %418 = vector.extract_strided_slice %417 {offsets = [0, 0], sizes = [32, 8], strides = [1, 1]} : vector<128x8xf32> to vector<32x8xf32>
    %419 = arith.negf %418 : vector<32x8xf32>
    %420 = math.exp %419 : vector<32x8xf32>
    %cst_115 = arith.constant 1.000000e+00 : f32
    %421 = vector.broadcast %cst_115 : f32 to vector<32x8xf32>
    %422 = arith.addf %421, %420 : vector<32x8xf32>
    %423 = arith.divf %421, %422 : vector<32x8xf32>
    %424 = vector.extract_strided_slice %417 {offsets = [32, 0], sizes = [32, 8], strides = [1, 1]} : vector<128x8xf32> to vector<32x8xf32>
    %425 = arith.negf %424 : vector<32x8xf32>
    %426 = math.exp %425 : vector<32x8xf32>
    %cst_116 = arith.constant 1.000000e+00 : f32
    %427 = vector.broadcast %cst_116 : f32 to vector<32x8xf32>
    %428 = arith.addf %427, %426 : vector<32x8xf32>
    %429 = arith.divf %427, %428 : vector<32x8xf32>
    %430 = vector.extract_strided_slice %417 {offsets = [64, 0], sizes = [32, 8], strides = [1, 1]} : vector<128x8xf32> to vector<32x8xf32>
    %431 = math.tanh %430 : vector<32x8xf32>
    %432 = vector.extract_strided_slice %417 {offsets = [96, 0], sizes = [32, 8], strides = [1, 1]} : vector<128x8xf32> to vector<32x8xf32>
    %433 = arith.negf %432 : vector<32x8xf32>
    %434 = math.exp %433 : vector<32x8xf32>
    %cst_117 = arith.constant 1.000000e+00 : f32
    %435 = vector.broadcast %cst_117 : f32 to vector<32x8xf32>
    %436 = arith.addf %435, %434 : vector<32x8xf32>
    %437 = arith.divf %435, %436 : vector<32x8xf32>
    %438 = arith.mulf %429, %411 : vector<32x8xf32>
    %439 = arith.mulf %423, %431 : vector<32x8xf32>
    %440 = arith.addf %438, %439 : vector<32x8xf32>
    %441 = math.tanh %440 : vector<32x8xf32>
    %442 = arith.mulf %437, %441 : vector<32x8xf32>
    %c0_118 = arith.constant 0 : index
    %c48_119 = arith.constant 48 : index
    %443 = vector.load %arg11[%c0_118, %c48_119] : memref<128x64xf32, #tpu.memory_space<vmem>>, vector<128x8xf32>
    %444 = arith.truncf %442 : vector<32x8xf32> to vector<32x8xbf16>
    %cst_120 = arith.constant dense<0.000000e+00> : vector<128x8xf32>
    %445 = tpu.matmul %260, %444, %cst_120 {dimension_numbers = #tpu.dot_dimension_numbers<[1], [0], [0], [1], [0, 0, 1, 1], [], []>} : vector<128x32xbf16>, vector<32x8xbf16>, vector<128x8xf32> -> vector<128x8xf32>
    %446 = arith.addf %443, %445 : vector<128x8xf32>
    %447 = vector.extract_strided_slice %446 {offsets = [0, 0], sizes = [32, 8], strides = [1, 1]} : vector<128x8xf32> to vector<32x8xf32>
    %448 = arith.negf %447 : vector<32x8xf32>
    %449 = math.exp %448 : vector<32x8xf32>
    %cst_121 = arith.constant 1.000000e+00 : f32
    %450 = vector.broadcast %cst_121 : f32 to vector<32x8xf32>
    %451 = arith.addf %450, %449 : vector<32x8xf32>
    %452 = arith.divf %450, %451 : vector<32x8xf32>
    %453 = vector.extract_strided_slice %446 {offsets = [32, 0], sizes = [32, 8], strides = [1, 1]} : vector<128x8xf32> to vector<32x8xf32>
    %454 = arith.negf %453 : vector<32x8xf32>
    %455 = math.exp %454 : vector<32x8xf32>
    %cst_122 = arith.constant 1.000000e+00 : f32
    %456 = vector.broadcast %cst_122 : f32 to vector<32x8xf32>
    %457 = arith.addf %456, %455 : vector<32x8xf32>
    %458 = arith.divf %456, %457 : vector<32x8xf32>
    %459 = vector.extract_strided_slice %446 {offsets = [64, 0], sizes = [32, 8], strides = [1, 1]} : vector<128x8xf32> to vector<32x8xf32>
    %460 = math.tanh %459 : vector<32x8xf32>
    %461 = vector.extract_strided_slice %446 {offsets = [96, 0], sizes = [32, 8], strides = [1, 1]} : vector<128x8xf32> to vector<32x8xf32>
    %462 = arith.negf %461 : vector<32x8xf32>
    %463 = math.exp %462 : vector<32x8xf32>
    %cst_123 = arith.constant 1.000000e+00 : f32
    %464 = vector.broadcast %cst_123 : f32 to vector<32x8xf32>
    %465 = arith.addf %464, %463 : vector<32x8xf32>
    %466 = arith.divf %464, %465 : vector<32x8xf32>
    %467 = arith.mulf %458, %440 : vector<32x8xf32>
    %468 = arith.mulf %452, %460 : vector<32x8xf32>
    %469 = arith.addf %467, %468 : vector<32x8xf32>
    %470 = math.tanh %469 : vector<32x8xf32>
    %471 = arith.mulf %466, %470 : vector<32x8xf32>
    %c0_124 = arith.constant 0 : index
    %c56_125 = arith.constant 56 : index
    %472 = vector.load %arg11[%c0_124, %c56_125] : memref<128x64xf32, #tpu.memory_space<vmem>>, vector<128x8xf32>
    %473 = arith.truncf %471 : vector<32x8xf32> to vector<32x8xbf16>
    %cst_126 = arith.constant dense<0.000000e+00> : vector<128x8xf32>
    %474 = tpu.matmul %260, %473, %cst_126 {dimension_numbers = #tpu.dot_dimension_numbers<[1], [0], [0], [1], [0, 0, 1, 1], [], []>} : vector<128x32xbf16>, vector<32x8xbf16>, vector<128x8xf32> -> vector<128x8xf32>
    %475 = arith.addf %472, %474 : vector<128x8xf32>
    %476 = vector.extract_strided_slice %475 {offsets = [0, 0], sizes = [32, 8], strides = [1, 1]} : vector<128x8xf32> to vector<32x8xf32>
    %477 = arith.negf %476 : vector<32x8xf32>
    %478 = math.exp %477 : vector<32x8xf32>
    %cst_127 = arith.constant 1.000000e+00 : f32
    %479 = vector.broadcast %cst_127 : f32 to vector<32x8xf32>
    %480 = arith.addf %479, %478 : vector<32x8xf32>
    %481 = arith.divf %479, %480 : vector<32x8xf32>
    %482 = vector.extract_strided_slice %475 {offsets = [32, 0], sizes = [32, 8], strides = [1, 1]} : vector<128x8xf32> to vector<32x8xf32>
    %483 = arith.negf %482 : vector<32x8xf32>
    %484 = math.exp %483 : vector<32x8xf32>
    %cst_128 = arith.constant 1.000000e+00 : f32
    %485 = vector.broadcast %cst_128 : f32 to vector<32x8xf32>
    %486 = arith.addf %485, %484 : vector<32x8xf32>
    %487 = arith.divf %485, %486 : vector<32x8xf32>
    %488 = vector.extract_strided_slice %475 {offsets = [64, 0], sizes = [32, 8], strides = [1, 1]} : vector<128x8xf32> to vector<32x8xf32>
    %489 = math.tanh %488 : vector<32x8xf32>
    %490 = vector.extract_strided_slice %475 {offsets = [96, 0], sizes = [32, 8], strides = [1, 1]} : vector<128x8xf32> to vector<32x8xf32>
    %491 = arith.negf %490 : vector<32x8xf32>
    %492 = math.exp %491 : vector<32x8xf32>
    %cst_129 = arith.constant 1.000000e+00 : f32
    %493 = vector.broadcast %cst_129 : f32 to vector<32x8xf32>
    %494 = arith.addf %493, %492 : vector<32x8xf32>
    %495 = arith.divf %493, %494 : vector<32x8xf32>
    %496 = arith.mulf %487, %469 : vector<32x8xf32>
    %497 = arith.mulf %481, %489 : vector<32x8xf32>
    %498 = arith.addf %496, %497 : vector<32x8xf32>
    %499 = math.tanh %498 : vector<32x8xf32>
    %500 = arith.mulf %495, %499 : vector<32x8xf32>
    %c0_130 = arith.constant 0 : index
    %c0_131 = arith.constant 0 : index
    %501 = vector.load %arg8[%c0_130, %c0_131] : memref<4x32xbf16, #tpu.memory_space<vmem>>, vector<4x32xbf16>
    %502 = arith.truncf %500 : vector<32x8xf32> to vector<32x8xbf16>
    %cst_132 = arith.constant dense<0.000000e+00> : vector<4x8xf32>
    %503 = tpu.matmul %501, %502, %cst_132 {dimension_numbers = #tpu.dot_dimension_numbers<[1], [0], [0], [1], [0, 0, 1, 1], [], []>} : vector<4x32xbf16>, vector<32x8xbf16>, vector<4x8xf32> -> vector<4x8xf32>
    %c0_133 = arith.constant 0 : index
    %c0_134 = arith.constant 0 : index
    %504 = vector.load %arg9[%c0_133, %c0_134] : memref<4x1xf32, #tpu.memory_space<vmem>>, vector<4x1xf32>
    %505 = vector.broadcast %504 : vector<4x1xf32> to vector<4x8xf32>
    %506 = arith.addf %503, %505 : vector<4x8xf32>
    %c0_135 = arith.constant 0 : index
    %c0_136 = arith.constant 0 : index
    %c0_137 = arith.constant 0 : index
    %507 = vector.load %arg10[%c0_135, %c0_136, %c0_137] : memref<1x4x8xf32, #tpu.memory_space<vmem>>, vector<1x4x8xf32>
    %508 = vector.shape_cast %507 : vector<1x4x8xf32> to vector<4x8xf32>
    %509 = vector.shape_cast %506 : vector<4x8xf32> to vector<1x4x8xf32>
    tpu.vector_store %arg10[%c0_135, %c0_136, %c0_137], %509 {strides = array<i32>} : memref<1x4x8xf32, #tpu.memory_space<vmem>>, vector<1x4x8xf32>,
    return
  }
  func.func @transform_0(%arg0: i32) -> (i32, i32, i32) {
    %c0_i32 = arith.constant 0 : i32
    %c0_i32_0 = arith.constant 0 : i32
    %c0_i32_1 = arith.constant 0 : i32
    return %arg0, %c0_i32, %c0_i32_0 : i32, i32, i32
  }
  func.func @transform_1(%arg0: i32) -> (i32, i32) {
    %c0_i32 = arith.constant 0 : i32
    %c0_i32_0 = arith.constant 0 : i32
    %c0_i32_1 = arith.constant 0 : i32
    return %c0_i32, %c0_i32_0 : i32, i32
  }
  func.func @transform_2(%arg0: i32) -> (i32, i32) {
    %c0_i32 = arith.constant 0 : i32
    %c0_i32_0 = arith.constant 0 : i32
    %c0_i32_1 = arith.constant 0 : i32
    return %c0_i32, %c0_i32_0 : i32, i32
  }
  func.func @transform_3(%arg0: i32) -> (i32, i32) {
    %c0_i32 = arith.constant 0 : i32
    %c0_i32_0 = arith.constant 0 : i32
    %c0_i32_1 = arith.constant 0 : i32
    return %c0_i32, %c0_i32_0 : i32, i32
  }
  func.func @transform_4(%arg0: i32) -> (i32, i32) {
    %c0_i32 = arith.constant 0 : i32
    %c0_i32_0 = arith.constant 0 : i32
    %c0_i32_1 = arith.constant 0 : i32
    return %c0_i32, %c0_i32_0 : i32, i32
  }
  func.func @transform_5(%arg0: i32) -> (i32, i32) {
    %c0_i32 = arith.constant 0 : i32
    %c0_i32_0 = arith.constant 0 : i32
    %c0_i32_1 = arith.constant 0 : i32
    return %c0_i32, %c0_i32_0 : i32, i32
  }
  func.func @transform_6(%arg0: i32) -> (i32, i32) {
    %c0_i32 = arith.constant 0 : i32
    %c0_i32_0 = arith.constant 0 : i32
    %c0_i32_1 = arith.constant 0 : i32
    return %c0_i32, %c0_i32_0 : i32, i32
  }
  func.func @transform_7(%arg0: i32) -> (i32, i32) {
    %c0_i32 = arith.constant 0 : i32
    %c0_i32_0 = arith.constant 0 : i32
    %c0_i32_1 = arith.constant 0 : i32
    return %c0_i32, %c0_i32_0 : i32, i32
  }
  func.func @transform_8(%arg0: i32) -> (i32, i32) {
    %c0_i32 = arith.constant 0 : i32
    %c0_i32_0 = arith.constant 0 : i32
    %c0_i32_1 = arith.constant 0 : i32
    return %c0_i32, %c0_i32_0 : i32, i32
  }
  func.func @transform_9(%arg0: i32) -> (i32, i32, i32) {
    %c0_i32 = arith.constant 0 : i32
    %c0_i32_0 = arith.constant 0 : i32
    %c0_i32_1 = arith.constant 0 : i32
    return %arg0, %c0_i32, %c0_i32_0 : i32, i32, i32
  }
}

</mosaic_0001>

<bundles_post_ra>
// kernel: tpu_custom_call.1
= control target key start
LH: loop header
LB: loop body
LE: loop exit
PB: predicated region body
PF: predicated region fallthrough
CT: control target
= control target key end

     0   :  { %vm210_vm0 = vcmask 130048   ;;  %v7697_v3 = vmov 0   ;;  %vm405_vm1 = vcmask 261120   ;;  %s9501_s0 = inlined_call_operand.vmem [shape: bf16[1,16,64], index: 0, kind: input, shape index: {}]   ;;  %s9502_s1 = inlined_call_operand.vmem [shape: bf16[128,16], index: 1, kind: input, shape index: {}]   ;;  %s9503_s2 = inlined_call_operand.vmem [shape: bf16[128,32], index: 2, kind: input, shape index: {}]   ;;  %s9504_s3 = inlined_call_operand.vmem [shape: f32[128,1], index: 3, kind: input, shape index: {}]   ;;  %s9505_s4 = inlined_call_operand.vmem [shape: bf16[128,32], index: 4, kind: input, shape index: {}]   ;;  %s9506_s5 = inlined_call_operand.vmem [shape: bf16[128,32], index: 5, kind: input, shape index: {}]   ;;  %s9507_s6 = inlined_call_operand.vmem [shape: f32[128,1], index: 6, kind: input, shape index: {}]   ;;  %s9508_s7 = inlined_call_operand.vmem [shape: bf16[4,32], index: 7, kind: input, shape index: {}]   ;;  %s9509_s8 = inlined_call_operand.vmem [shape: f32[4,1], index: 8, kind: input, shape index: {}]   ;;  %s9510_s9 = inlined_call_operand.hbm [shape: f32[1,4,8], index: 9, kind: output, shape index: {}]  }
   0x1   :  { %v6551_v0 = vld [vmem:[%s9501_s0] sm:$0xff]   ;;  %v6553_v2 = vld [vmem:[%s9502_s1 + $0x8] sm:$0xff]   ;;  %6187 = vmatprep.subr.bf16.mxu1 %v7697_v3  ;;  %v6555_v5 = vld [vmem:[%s9502_s1 + $0x10] sm:$0xff]   ;;  %6550 = vset.pattern.permute.xlu1 %v7697_v3 }
   0x2   :  { %v6552_v1 = vld [vmem:[%s9502_s1] sm:$0xff]   ;;  %6169 = vmatprep.subr.bf16.mxu0 %v6551_v0  ;;  %6188 = vmatpush3.bf16.msra.mxu1 %v7697_v3  ;;  %v7791_v6 = vld [vmem:[%s9503_s2 + $0x8] sm:$0xff]   ;;  %v7801_v7 = vld [vmem:[%s9503_s2 + $0x10] sm:$0xff]  }
   0x3   :  { %6170 = vmatpush3.bf16.msra.mxu0 %v6551_v0  ;;  %6171 = vmatprep.mubr.msk.bf16.mxu0 %vm210_vm0, %v6552_v1  ;;  %v7779_v4 = vld [vmem:[%s9503_s2] sm:$0xff]   ;;  %v6557_v8 = vld [vmem:[%s9502_s1 + $0x18] sm:$0xff]   ;;  %v6561_v14 = vld [vmem:[%s9502_s1 + $0x28] sm:$0xff]  }
   0x4   :  { %6189 = vmatprep.mubr.msk.bf16.mxu1 %vm405_vm1, %v7779_v4  ;;  %6549 = vset.pattern.permute.xlu0 %v7697_v3  ;;  %v6559_v9 = vld [vmem:[%s9502_s1 + $0x20] sm:$0xff]   ;;  %v7814_v10 = vld [vmem:[%s9503_s2 + $0x18] sm:$0xff]   ;;  %v6563_v15 = vld [vmem:[%s9502_s1 + $0x30] sm:$0xff]  }
   0x5   :  { %6190 = vmatmul.mubr.msk.bf16.vlgmr.msra.gmra.mrb[0].mxu1 %vm405_vm1, %v7791_v6  ;;  %v7819_v11 = vld [vmem:[%s9503_s2 + $0x20] sm:$0xff]   ;;  %v7842_v16 = vld [vmem:[%s9503_s2 + $0x28] sm:$0xff]   ;;  %v7850_v18 = vld [vmem:[%s9503_s2 + $0x30] sm:$0xff]  }
   0x6   :  { %6172 = vmatmul.mubr.msk.bf16.vlgmr.msra.gmra.mrb[0].mxu0 %vm210_vm0, %v6553_v2  ;;  %6193 = vmatprep.mubr.msk.bf16.mxu1 %vm405_vm1, %v7801_v7  ;;  %v70_v12 = vld [vmem:[%s9504_s3 + $0x20] sm:$0xff]  ;;  %v71_v17 = vld [vmem:[%s9504_s3 + $0x28] sm:$0xff]  ;;  %v69_v20 = vld [vmem:[%s9504_s3 + $0x18] sm:$0xff] }
   0x7   :  { %6175 = vmatprep.mubr.msk.bf16.mxu0 %vm210_vm0, %v6555_v5  ;;  %v66_v13 = vld [vmem:[%s9504_s3] sm:$0xff]  ;;  %106 = vperm.xlu1 %6550, %v70_v12   ;;  %v67_v19 = vld [vmem:[%s9504_s3 + $0x8] sm:$0xff]  ;;  %v68_v21 = vld [vmem:[%s9504_s3 + $0x10] sm:$0xff] }
   0x8   :  { %86 = vperm.xlu0 %6549, %v66_v13   ;;  %v6565_v22 = vld [vmem:[%s9502_s1 + $0x38] sm:$0xff]   ;;  %v72_v25 = vld [vmem:[%s9504_s3 + $0x30] sm:$0xff]  ;;  %v75_v26 = vld [vmem:[%s9504_s3 + $0x48] sm:$0xff] }
   0x9   :  { %v7873_v23 = vld [vmem:[%s9503_s2 + $0x38] sm:$0xff]   ;;  %v74_v27 = vld [vmem:[%s9504_s3 + $0x40] sm:$0xff] }
   0xa   :  { %v73_v24 = vld [vmem:[%s9504_s3 + $0x38] sm:$0xff] }
   0xb   :  { %111 = vperm.xlu1 %6550, %v71_v17  }
   0xc   :  { %91 = vperm.xlu0 %6549, %v67_v19  }
   0xd   :  { %6194 = vmatmul.mubr.msk.bf16.gmra.mrb[4].mxu1 %vm405_vm1, %v7814_v10 }
   0xe   :  { %6176 = vmatmul.mubr.msk.bf16.gmra.mrb[4].mxu0 %vm210_vm0, %v6557_v8  ;;  %6197 = vmatprep.mubr.msk.bf16.mxu1 %vm405_vm1, %v7819_v11 }
   0xf   :  { %6179 = vmatprep.mubr.msk.bf16.mxu0 %vm210_vm0, %v6559_v9  ;;  %101 = vperm.xlu1 %6550, %v69_v20  }
  0x10   :  { %96 = vperm.xlu0 %6549, %v68_v21  }
  0x13   :  { %121 = vperm.xlu1 %6550, %v73_v24  }
  0x14   :  { %116 = vperm.xlu0 %6549, %v72_v25  }
  0x15   :  { %6198 = vmatmul.mubr.msk.bf16.gmra.mrb[8].mxu1 %vm405_vm1, %v7842_v16 }
  0x16   :  { %6180 = vmatmul.mubr.msk.bf16.gmra.mrb[8].mxu0 %vm210_vm0, %v6561_v14  ;;  %6201 = vmatprep.mubr.msk.bf16.mxu1 %vm405_vm1, %v7850_v18 }
  0x17   :  { %6183 = vmatprep.mubr.msk.bf16.mxu0 %vm210_vm0, %v6563_v15 }
  0x1d   :  { %6202 = vmatmul.mubr.msk.bf16.gmra.mrb[12].mxu1 %vm405_vm1, %v7873_v23 }
  0x1e   :  { %6184 = vmatmul.mubr.msk.bf16.gmra.mrb[12].mxu0 %vm210_vm0, %v6565_v22  ;;  %6229 = vmatprep.mubr.msk.bf16.mxu1 %vm405_vm1, %v7779_v4 }
  0x1f   :  { %6209 = vmatprep.mubr.msk.bf16.mxu0 %vm405_vm1, %v7779_v4 }
  0x20   :  { %14 = vsyncpa [#allocation5], 0  ;;  %131 = vperm.xlu1 %6550, %v75_v26   ;;  %v79_v28 = vld [vmem:[%s9504_s3 + $0x68] sm:$0xff]  ;;  %126 = vperm.xlu0 %6549, %v74_v27   ;;  %v78_v29 = vld [vmem:[%s9504_s3 + $0x60] sm:$0xff]  ;;  %vm332_vm2 = vcmask 523264   ;;  %vm641_vm3 = vcmask 64512  }
  0x21   :  { %v77_v30 = vld [vmem:[%s9504_s3 + $0x58] sm:$0xff]  ;;  %v76_v31 = vld [vmem:[%s9504_s3 + $0x50] sm:$0xff]  ;;  %vm951_vm4 = vcmask 130112   ;;  %s7699_s29 = smov 120   ;;  %s7700_s17 = smov 16   ;;  %vm1269_vm5 = vcmask 195712  }
  0x22   :  { %v81_v32 = vld [vmem:[%s9504_s3 + $0x78] sm:$0xff]  ;;  %v80_v33 = vld [vmem:[%s9504_s3 + $0x70] sm:$0xff]  ;;  %s7698_s3 = smov 8   ;;  %s7701_s18 = smov 112   ;;  %vm1587_vm6 = vcmask 261312   ;;  %vm1905_vm7 = vcmask 326912  }
  0x23   :  { %s7702_s25 = smov 24   ;;  %s7703_s26 = smov 104   ;;  %vm2223_vm8 = vcmask 392512   ;;  %vm2541_vm9 = vcmask 458112   ;;  %vm2859_vm10 = vcmask 523712   ;;  %vm7712_vm11 = vmmov 0  }
  0x24   :  { %151 = vperm.xlu1 %6550, %v79_v28   ;;  %146 = vperm.xlu0 %6549, %v78_v29   ;;  %s7704_s27 = smov 32   ;;  %s7705_s28 = smov 96   ;;  %vm5603_vm12 = vcmask 60416  }
  0x25   :  { %s7706_s19 = smov 40   ;;  %s7707_s20 = smov 88  }
  0x26   :  { %s7708_s11 = smov 48   ;;  %s7710_s12 = smov 56  }
  0x28   :  { %141 = vperm.xlu1 %6550, %v77_v30   ;;  %136 = vperm.xlu0 %6549, %v76_v31  }
  0x2c   :  { %161 = vperm.xlu1 %6550, %v81_v32   ;;  %156 = vperm.xlu0 %6549, %v80_v33  }
  0x86   :  { %v107_v34 = vpop.permute.xlu1 %106 }
  0x87   :  { %v87_v35 = vpop.permute.xlu0 %86 }
  0x8a   :  { %v112_v36 = vpop.permute.xlu1 %111 }
  0x8b   :  { %v92_v37 = vpop.permute.xlu0 %91 }
  0x8e   :  { %v102_v38 = vpop.permute.xlu1 %101 }
  0x8f   :  { %v97_v39 = vpop.permute.xlu0 %96 }
  0x92   :  { %v122_v40 = vpop.permute.xlu1 %121 }
  0x93   :  { %v117_v41 = vpop.permute.xlu0 %116 }
  0x9f   :  { %v7912_v42 = vpop.permute.xlu1 %131  ;;  %v127_v43 = vpop.permute.xlu0 %126 }
  0xa3   :  { %v7918_v56 = vpop.permute.xlu1 %151  ;;  %v7920_v57 = vpop.permute.xlu0 %146 }
  0xa7   :  { %v142_v25 = vpop.permute.xlu1 %141  ;;  %v137_v27 = vpop.permute.xlu0 %136 }
  0xd8   :  { %v6191_v47 = vpop.f32.mrb[0].mxu1 }
  0xd9   :  { %v6173_v44 = vpop.f32.mrb[0].mxu0  ;;  %v464_v50 = vpop.f32.mrb[1].mxu1 }
  0xda   :  { %v278_v45 = vadd.f32 %v6173_v44, %v97_v39  ;;  %v269_v46 = vpop.f32.mrb[1].mxu0  ;;  %v6192_v53 = vpop.f32.mrb[2].mxu1 }
  0xdb   :  { %v270_v48 = vadd.f32 %v269_v46, %v87_v35  ;;  %v6174_v49 = vpop.f32.mrb[2].mxu0  ;;  %v467_v55 = vpop.f32.mrb[3].mxu1 }
  0xdc   :  { %335 = vst.msk [vmem:[#allocation2 + $0x10] sm:$0xff] %vm332_vm2, %v278_v45  ;;  %v281_v51 = vadd.f32 %v6174_v49, %v102_v38  ;;  %v272_v52 = vpop.f32.mrb[3].mxu0 }
  0xdd   :  { %333 = vst.msk [vmem:[#allocation2] sm:$0xff] %vm332_vm2, %v270_v48  ;;  %v273_v54 = vadd.f32 %v272_v52, %v92_v37  ;;  %v162_v52 = vpop.permute.xlu1 %161 }
  0xde   :  { %336 = vst.msk [vmem:[#allocation2 + $0x18] sm:$0xff] %vm332_vm2, %v281_v51 }
  0xdf   :  { %334 = vst.msk [vmem:[#allocation2 + $0x8] sm:$0xff] %vm332_vm2, %v273_v54  ;;  %v157_v54 = vpop.permute.xlu0 %156 }
  0xe0   :  { %v6195_v61 = vpop.f32.mrb[4].mxu1 }
  0xe1   :  { %v6177_v58 = vpop.f32.mrb[4].mxu0  ;;  %v480_v1 = vpop.f32.mrb[5].mxu1 }
  0xe2   :  { %v294_v59 = vadd.f32 %v6177_v58, %v117_v41  ;;  %v285_v60 = vpop.f32.mrb[5].mxu0  ;;  %v6196_v12 = vpop.f32.mrb[6].mxu1 }
  0xe3   :  { %v7922_v62 = vld [vmem:[#allocation2 + $0x10] sm:$0xff]  ;;  %v286_v63 = vadd.f32 %v285_v60, %v107_v34  ;;  %v6178_v0 = vpop.f32.mrb[6].mxu0  ;;  %v483_v17 = vpop.f32.mrb[7].mxu1 }
  0xe4   :  { %v529_v2 = vadd.f32 %v6191_v47, %v7922_v62  ;;  %339 = vst.msk [vmem:[#allocation2 + $0x30] sm:$0xff] %vm332_vm2, %v294_v59  ;;  %v7926_v5 = vld [vmem:[#allocation2] sm:$0xff]  ;;  %v297_v8 = vadd.f32 %v6178_v0, %v122_v40  ;;  %v288_v9 = vpop.f32.mrb[7].mxu0 }
  0xe5   :  { %v527_v13 = vadd.f32 %v464_v50, %v7926_v5  ;;  %337 = vst.msk [vmem:[#allocation2 + $0x20] sm:$0xff] %vm332_vm2, %v286_v63  ;;  %v7930_v14 = vld [vmem:[#allocation2 + $0x18] sm:$0xff]  ;;  %v289_v15 = vadd.f32 %v288_v9, %v112_v36 }
  0xe6   :  { %v5654_v19 = vmul.f32 -1.442695, %v529_v2  ;;  %v530_v20 = vadd.f32 %v6192_v53, %v7930_v14  ;;  %340 = vst.msk [vmem:[#allocation2 + $0x38] sm:$0xff] %vm332_vm2, %v297_v8  ;;  %v7934_v21 = vld [vmem:[#allocation2 + $0x8] sm:$0xff] }
  0xe7   :  { %v5652_v22 = vmul.f32 -1.442695, %v527_v13  ;;  %v528_v24 = vadd.f32 %v467_v55, %v7934_v21  ;;  %338 = vst.msk [vmem:[#allocation2 + $0x28] sm:$0xff] %vm332_vm2, %v289_v15 }
  0xe8   :  { %6584 = vpow2.f32 %v5654_v19  ;;  %v5655_v26 = vmul.f32 -1.442695, %v530_v20  ;;  %v6199_v32 = vpop.f32.mrb[8].mxu1 }
  0xe9   :  { %6586 = vpow2.f32 %v5652_v22  ;;  %v5653_v28 = vmul.f32 -1.442695, %v528_v24  ;;  %v6181_v29 = vpop.f32.mrb[8].mxu0  ;;  %v496_v36 = vpop.f32.mrb[9].mxu1 }
  0xea   :  { %6588 = vpow2.f32 %v5655_v26  ;;  %v310_v30 = vadd.f32 %v6181_v29, %v137_v27  ;;  %v301_v31 = vpop.f32.mrb[9].mxu0  ;;  %v6200_v41 = vpop.f32.mrb[10].mxu1 }
  0xeb   :  { %6590 = vpow2.f32 %v5653_v28  ;;  %v7938_v33 = vld [vmem:[#allocation2 + $0x30] sm:$0xff]  ;;  %v302_v34 = vadd.f32 %v301_v31, %v127_v43  ;;  %v6182_v35 = vpop.f32.mrb[10].mxu0  ;;  %v499_v43 = vpop.f32.mrb[11].mxu1 }
  0xec   :  { %v533_v37 = vadd.f32 %v6195_v61, %v7938_v33  ;;  %343 = vst.msk [vmem:[#allocation2 + $0x50] sm:$0xff] %vm332_vm2, %v310_v30  ;;  %v7942_v38 = vld [vmem:[#allocation2 + $0x20] sm:$0xff]  ;;  %v313_v39 = vadd.f32 %v6182_v35, %v142_v25  ;;  %v304_v40 = vpop.f32.mrb[11].mxu0 }
  0xed   :  { %v531_v44 = vadd.f32 %v480_v1, %v7942_v38  ;;  %341 = vst.msk [vmem:[#allocation2 + $0x40] sm:$0xff] %vm332_vm2, %v302_v34  ;;  %v7946_v45 = vld [vmem:[#allocation2 + $0x38] sm:$0xff]  ;;  %v305_v46 = vadd.f32 %v304_v40, %v7912_v42 }
  0xee   :  { %v5658_v47 = vmul.f32 -1.442695, %v533_v37  ;;  %v534_v48 = vadd.f32 %v6196_v12, %v7946_v45  ;;  %344 = vst.msk [vmem:[#allocation2 + $0x58] sm:$0xff] %vm332_vm2, %v313_v39  ;;  %v7951_v49 = vld [vmem:[#allocation2 + $0x28] sm:$0xff] }
  0xef   :  { %v5656_v50 = vmul.f32 -1.442695, %v531_v44  ;;  %v532_v51 = vadd.f32 %v483_v17, %v7951_v49  ;;  %342 = vst.msk [vmem:[#allocation2 + $0x48] sm:$0xff] %vm332_vm2, %v305_v46 }
  0xf0   :  { %6592 = vpow2.f32 %v5658_v47  ;;  %v5659_v53 = vmul.f32 -1.442695, %v534_v48  ;;  %v6203_v61 = vpop.f32.mrb[12].mxu1 }
  0xf1   :  { %6594 = vpow2.f32 %v5656_v50  ;;  %v5657_v55 = vmul.f32 -1.442695, %v532_v51  ;;  %v6185_v42 = vpop.f32.mrb[12].mxu0  ;;  %v512_v9 = vpop.f32.mrb[13].mxu1 }
  0xf2   :  { %v6585_v58 = vpop.eup %6584  ;;  %6596 = vpow2.f32 %v5659_v53  ;;  %v326_v59 = vadd.f32 %v6185_v42, %v157_v54  ;;  %v317_v60 = vpop.f32.mrb[13].mxu0 }
  0xf3   :  { %v6587_v63 = vpop.eup %6586  ;;  %v557_v0 = vadd.f32 1.0, %v6585_v58  ;;  %6598 = vpow2.f32 %v5657_v55  ;;  %v7955_v1 = vld [vmem:[#allocation2 + $0x50] sm:$0xff]  ;;  %v318_v2 = vadd.f32 %v317_v60, %v7920_v57  ;;  %v6186_v8 = vpop.f32.mrb[14].mxu0 }
  0xf4   :  { %v6589_v12 = vpop.eup %6588  ;;  %v555_v13 = vadd.f32 1.0, %v6587_v63  ;;  %347 = vst.msk [vmem:[#allocation2 + $0x70] sm:$0xff] %vm332_vm2, %v326_v59  ;;  %v7959_v15 = vld [vmem:[#allocation2 + $0x40] sm:$0xff]  ;;  %v329_v17 = vadd.f32 %v6186_v8, %v162_v52  ;;  %v320_v19 = vpop.f32.mrb[15].mxu0  ;;  %v537_v25 = vadd.f32 %v6199_v32, %v7955_v1 }
  0xf5   :  { %v6204_v20 = vpop.f32.mrb[14].mxu1  ;;  %v6591_v22 = vpop.eup %6590  ;;  %6600 = vrcp.f32 %v557_v0  ;;  %v558_v24 = vadd.f32 1.0, %v6589_v12  ;;  %345 = vst.msk [vmem:[#allocation2 + $0x60] sm:$0xff] %vm332_vm2, %v318_v2  ;;  %v7963_v26 = vld [vmem:[#allocation2 + $0x58] sm:$0xff]  ;;  %v321_v57 = vadd.f32 %v320_v19, %v7918_v56  ;;  %v535_v29 = vadd.f32 %v496_v36, %v7959_v15 }
  0xf6   :  { %v515_v27 = vpop.f32.mrb[15].mxu1  ;;  %6602 = vrcp.f32 %v555_v13  ;;  %v556_v28 = vadd.f32 1.0, %v6591_v22  ;;  %348 = vst.msk [vmem:[#allocation2 + $0x78] sm:$0xff] %vm332_vm2, %v329_v17  ;;  %v7968_v30 = vld [vmem:[#allocation2 + $0x48] sm:$0xff]  ;;  %v538_v31 = vadd.f32 %v6200_v41, %v7963_v26 }
  0xf7   :  { %6604 = vrcp.f32 %v558_v24  ;;  %346 = vst.msk [vmem:[#allocation2 + $0x68] sm:$0xff] %vm332_vm2, %v321_v57  ;;  %v536_v32 = vadd.f32 %v499_v43, %v7968_v30 }
  0xf8   :  { %6606 = vrcp.f32 %v556_v28 }
  0xf9   :  { %6608 = vtanh.f32 %v537_v25 }
  0xfa   :  { %v6593_v34 = vpop.eup %6592  ;;  %6610 = vtanh.f32 %v535_v29 }
  0xfb   :  { %v6595_v56 = vpop.eup %6594  ;;  %v581_v35 = vadd.f32 1.0, %v6593_v34  ;;  %6612 = vtanh.f32 %v538_v31  ;;  %v7973_v37 = vld [vmem:[#allocation2 + $0x70] sm:$0xff] }
  0xfc   :  { %v6597_v36 = vpop.eup %6596  ;;  %v579_v39 = vadd.f32 1.0, %v6595_v56  ;;  %6614 = vtanh.f32 %v536_v32  ;;  %v541_v40 = vadd.f32 %v6203_v61, %v7973_v37  ;;  %v7976_v44 = vld [vmem:[#allocation2 + $0x60] sm:$0xff] }
  0xfd   :  { %v6599_v41 = vpop.eup %6598  ;;  %6616 = vrcp.f32 %v581_v35  ;;  %v582_v46 = vadd.f32 1.0, %v6597_v36  ;;  %v539_v43 = vadd.f32 %v512_v9, %v7976_v44  ;;  %v7979_v47 = vld [vmem:[#allocation2 + $0x78] sm:$0xff] }
  0xfe   :  { %6618 = vrcp.f32 %v579_v39  ;;  %v580_v48 = vadd.f32 1.0, %v6599_v41  ;;  %v5662_v50 = vmul.f32 -1.442695, %v541_v40  ;;  %v542_v51 = vadd.f32 %v6204_v20, %v7979_v47  ;;  %v7982_v52 = vld [vmem:[#allocation2 + $0x68] sm:$0xff] }
  0xff   :  { %v6601_v53 = vpop.eup %6600  ;;  %6620 = vrcp.f32 %v582_v46  ;;  %v5660_v54 = vmul.f32 -1.442695, %v539_v43  ;;  %v540_v55 = vadd.f32 %v515_v27, %v7982_v52 }
 0x100   :  { %v6603_v42 = vpop.eup %6602  ;;  %6622 = vrcp.f32 %v580_v48  ;;  %v5663_v58 = vmul.f32 -1.442695, %v542_v51 }
 0x101   :  { %v6605_v59 = vpop.eup %6604  ;;  %6624 = vpow2.f32 %v5662_v50  ;;  %v5661_v60 = vmul.f32 -1.442695, %v540_v55 }
 0x102   :  { %v6607_v61 = vpop.eup %6606  ;;  %6626 = vpow2.f32 %v5660_v54 }
 0x103   :  { %v6609_v63 = vpop.eup %6608  ;;  %6628 = vpow2.f32 %v5663_v58 }
 0x104   :  { %v6611_v0 = vpop.eup %6610  ;;  %v625_v2 = vmul.f32 %v6609_v63, %v6601_v53  ;;  %6630 = vpow2.f32 %v5661_v60 }
 0x105   :  { %v6613_v8 = vpop.eup %6612  ;;  %v623_v9 = vmul.f32 %v6611_v0, %v6603_v42 }
 0x106   :  { %v6615_v12 = vpop.eup %6614  ;;  %v626_v13 = vmul.f32 %v6613_v8, %v6605_v59 }
 0x107   :  { %v6617_v17 = vpop.eup %6616  ;;  %v624_v19 = vmul.f32 %v6615_v12, %v6607_v61 }
 0x108   :  { %v6619_v20 = vpop.eup %6618  ;;  %v621_v22 = vmul.f32 0.0, %v6617_v17 }
 0x109   :  { %v6621_v24 = vpop.eup %6620  ;;  %v619_v25 = vmul.f32 0.0, %v6619_v20 }
 0x10a   :  { %v6623_v57 = vpop.eup %6622  ;;  %v622_v27 = vmul.f32 0.0, %v6621_v24  ;;  %v7985_v28 = vadd.f32 %v625_v2, %v621_v22 }
 0x10b   :  { %v6625_v29 = vpop.eup %6624  ;;  %v620_v31 = vmul.f32 0.0, %v6623_v57  ;;  %v7987_v32 = vadd.f32 %v623_v9, %v619_v25 }
 0x10c   :  { %v6627_v34 = vpop.eup %6626  ;;  %6632 = vtanh.f32 %v7985_v28  ;;  %v7990_v56 = vadd.f32 %v626_v13, %v622_v27  ;;  %v609_v35 = vadd.f32 1.0, %v6625_v29 }
 0x10d   :  { %v6629_v36 = vpop.eup %6628  ;;  %6634 = vtanh.f32 %v7987_v32  ;;  %v7993_v39 = vadd.f32 %v624_v19, %v620_v31  ;;  %v607_v40 = vadd.f32 1.0, %v6627_v34 }
 0x10e   :  { %v6631_v41 = vpop.eup %6630  ;;  %6636 = vtanh.f32 %v7990_v56  ;;  %v610_v46 = vadd.f32 1.0, %v6629_v36 }
 0x10f   :  { %6638 = vtanh.f32 %v7993_v39  ;;  %v608_v43 = vadd.f32 1.0, %v6631_v41 }
 0x110   :  { %6640 = vrcp.f32 %v609_v35 }
 0x111   :  { %6642 = vrcp.f32 %v607_v40 }
 0x112   :  { %6644 = vrcp.f32 %v610_v46 }
 0x113   :  { %6646 = vrcp.f32 %v608_v43 }
 0x116   :  { %v6633_v48 = vpop.eup %6632 }
 0x117   :  { %v6635_v50 = vpop.eup %6634 }
 0x118   :  { %v6637_v51 = vpop.eup %6636 }
 0x119   :  { %v6639_v53 = vpop.eup %6638 }
 0x11a   :  { %v6641_v54 = vpop.eup %6640 }
 0x11b   :  { %v6643_v55 = vpop.eup %6642  ;;  %v637_v59 = vmul.f32 %v6641_v54, %v6633_v48 }
 0x11c   :  { %v6645_v42 = vpop.eup %6644  ;;  %v635_v61 = vmul.f32 %v6643_v55, %v6635_v50 }
 0x11d   :  { %v6647_v58 = vpop.eup %6646  ;;  %v638_v60 = vmul.f32 %v6645_v42, %v6637_v51 }
 0x11e   :  { %v636_v63 = vmul.f32 %v6647_v58, %v6639_v53 }
 0x11f   :  { %v640_v0 = vpack.c.bf16 %v638_v60, %v637_v59 }
 0x120   :  { %v639_v2 = vpack.c.bf16 %v636_v63, %v635_v61 }
 0x121   :  { %643 = vst.msk [vmem:[#allocation3 + $0x8] sm:$0xff] %vm641_vm3, %v640_v0 }
 0x122   :  { %642 = vst.msk [vmem:[#allocation3] sm:$0xff] %vm641_vm3, %v639_v2  ;;  %6205 = vmatprep.subr.bf16.mxu0 %v639_v2 }
 0x123   :  { %6206 = vmatpush3.bf16.msra.mxu0 %v639_v2 }
 0x124   :  { %6207 = vmatprep.subr.bf16.mxu0 %v640_v0 }
 0x127   :  { %6208 = vmatpush3.bf16.msra.mxu0 %v640_v0 }
 0x12a   :  { %6210 = vmatmul.mubr.msk.bf16.vlgmr.msra.gmra.mrb[16].mxu0 %vm405_vm1, %v7791_v6 }
 0x12b   :  { %6213 = vmatprep.mubr.msk.bf16.mxu0 %vm405_vm1, %v7801_v7 }
 0x132   :  { %6214 = vmatmul.mubr.msk.bf16.gmra.mrb[20].mxu0 %vm405_vm1, %v7814_v10 }
 0x133   :  { %6217 = vmatprep.mubr.msk.bf16.mxu0 %vm405_vm1, %v7819_v11 }
 0x13a   :  { %6218 = vmatmul.mubr.msk.bf16.gmra.mrb[24].mxu0 %vm405_vm1, %v7842_v16 }
 0x13b   :  { %6221 = vmatprep.mubr.msk.bf16.mxu0 %vm405_vm1, %v7850_v18 }
 0x142   :  { %6222 = vmatmul.mubr.msk.bf16.gmra.mrb[28].mxu0 %vm405_vm1, %v7873_v23 }
 0x143   :  { %6249 = vmatprep.mubr.msk.bf16.mxu0 %vm405_vm1, %v7779_v4 }
 0x1fd   :  { %v6211_v6 = vpop.f32.mrb[16].mxu0 }
 0x1fe   :  { %777 = vrot.lane.b32.xlu0 %v6211_v6, %s7698_s3  ;;  %v694_v7 = vpop.f32.mrb[17].mxu0 }
 0x1ff   :  { %v6212_v10 = vpop.f32.mrb[18].mxu0 }
 0x200   :  { %779 = vrot.lane.b32.xlu1 %v6212_v10, %s7698_s3  ;;  %v697_v11 = vpop.f32.mrb[19].mxu0 }
 0x202   :  { %773 = vrot.lane.b32.xlu0 %v694_v7, %s7698_s3 }
 0x204   :  { %775 = vrot.lane.b32.xlu1 %v697_v11, %s7698_s3 }
 0x205   :  { %v6215_v8 = vpop.f32.mrb[20].mxu0 }
 0x206   :  { %v710_v9 = vpop.f32.mrb[21].mxu0 }
 0x207   :  { %781 = vrot.lane.b32.xlu0 %v710_v9, %s7698_s3  ;;  %v6216_v12 = vpop.f32.mrb[22].mxu0 }
 0x208   :  { %v713_v13 = vpop.f32.mrb[23].mxu0 }
 0x209   :  { %783 = vrot.lane.b32.xlu1 %v713_v13, %s7698_s3 }
 0x20b   :  { %785 = vrot.lane.b32.xlu0 %v6215_v8, %s7698_s3 }
 0x20d   :  { %787 = vrot.lane.b32.xlu1 %v6216_v12, %s7698_s3  ;;  %v6219_v4 = vpop.f32.mrb[24].mxu0 }
 0x20e   :  { %v726_v17 = vpop.f32.mrb[25].mxu0 }
 0x20f   :  { %793 = vrot.lane.b32.xlu0 %v6219_v4, %s7698_s3  ;;  %v6220_v19 = vpop.f32.mrb[26].mxu0 }
 0x210   :  { %v729_v20 = vpop.f32.mrb[27].mxu0 }
 0x211   :  { %795 = vrot.lane.b32.xlu1 %v6220_v19, %s7698_s3 }
 0x213   :  { %789 = vrot.lane.b32.xlu0 %v726_v17, %s7698_s3 }
 0x215   :  { %791 = vrot.lane.b32.xlu1 %v729_v20, %s7698_s3  ;;  %v6223_v22 = vpop.f32.mrb[28].mxu0 }
 0x216   :  { %v742_v24 = vpop.f32.mrb[29].mxu0 }
 0x217   :  { %797 = vrot.lane.b32.xlu0 %v742_v24, %s7698_s3  ;;  %v6224_v25 = vpop.f32.mrb[30].mxu0 }
 0x218   :  { %v745_v57 = vpop.f32.mrb[31].mxu0 }
 0x219   :  { %799 = vrot.lane.b32.xlu1 %v745_v57, %s7698_s3 }
 0x21b   :  { %801 = vrot.lane.b32.xlu0 %v6223_v22, %s7698_s3 }
 0x21d   :  { %803 = vrot.lane.b32.xlu1 %v6224_v25, %s7698_s3 }
 0x21f   :  { %917 = vrot.lane.b32.xlu0 %v7987_v32, %s7698_s3 }
 0x221   :  { %919 = vrot.lane.b32.xlu1 %v7993_v39, %s7698_s3 }
 0x223   :  { %921 = vrot.lane.b32.xlu0 %v7985_v28, %s7698_s3 }
 0x225   :  { %923 = vrot.lane.b32.xlu1 %v7990_v56, %s7698_s3 }
 0x270   :  { %v778_v27 = vpop.permute.xlu0 %777 }
 0x271   :  { %v823_v29 = vadd.f32 %v778_v27, %v7922_v62 }
 0x272   :  { %v780_v31 = vpop.permute.xlu1 %779 }
 0x273   :  { %v5674_v34 = vmul.f32 -1.442695, %v823_v29  ;;  %v824_v35 = vadd.f32 %v780_v31, %v7930_v14 }
 0x274   :  { %v774_v36 = vpop.permute.xlu0 %773 }
 0x275   :  { %6648 = vpow2.f32 %v5674_v34  ;;  %v5675_v40 = vmul.f32 -1.442695, %v824_v35  ;;  %v821_v32 = vadd.f32 %v774_v36, %v7926_v5 }
 0x276   :  { %v776_v41 = vpop.permute.xlu1 %775 }
 0x277   :  { %6650 = vpow2.f32 %v5675_v40  ;;  %v5672_v39 = vmul.f32 -1.442695, %v821_v32  ;;  %v822_v28 = vadd.f32 %v776_v41, %v7934_v21 }
 0x279   :  { %6652 = vpow2.f32 %v5672_v39  ;;  %v5673_v46 = vmul.f32 -1.442695, %v822_v28  ;;  %v782_v56 = vpop.permute.xlu0 %781 }
 0x27a   :  { %v825_v43 = vadd.f32 %v782_v56, %v7942_v38 }
 0x27b   :  { %6654 = vpow2.f32 %v5673_v46  ;;  %v784_v48 = vpop.permute.xlu1 %783 }
 0x27c   :  { %v5676_v50 = vmul.f32 -1.442695, %v825_v43  ;;  %v826_v51 = vadd.f32 %v784_v48, %v7951_v49 }
 0x27d   :  { %v786_v53 = vpop.permute.xlu0 %785 }
 0x27e   :  { %6656 = vpow2.f32 %v5676_v50  ;;  %v5677_v54 = vmul.f32 -1.442695, %v826_v51  ;;  %v827_v55 = vadd.f32 %v786_v53, %v7938_v33 }
 0x27f   :  { %v6649_v42 = vpop.eup %6648  ;;  %v788_v58 = vpop.permute.xlu1 %787 }
 0x280   :  { %v851_v59 = vadd.f32 1.0, %v6649_v42  ;;  %6658 = vpow2.f32 %v5677_v54  ;;  %v5678_v60 = vmul.f32 -1.442695, %v827_v55  ;;  %v828_v61 = vadd.f32 %v788_v58, %v7946_v45 }
 0x281   :  { %v6651_v63 = vpop.eup %6650  ;;  %v794_v0 = vpop.permute.xlu0 %793 }
 0x282   :  { %v852_v2 = vadd.f32 1.0, %v6651_v63  ;;  %v5679_v6 = vmul.f32 -1.442695, %v828_v61  ;;  %6660 = vpow2.f32 %v5678_v60  ;;  %v831_v8 = vadd.f32 %v794_v0, %v7955_v1 }
 0x283   :  { %v6653_v7 = vpop.eup %6652  ;;  %v796_v10 = vpop.permute.xlu1 %795  ;;  %6662 = vrcp.f32 %v851_v59 }
 0x284   :  { %v849_v11 = vadd.f32 1.0, %v6653_v7  ;;  %6664 = vpow2.f32 %v5679_v6  ;;  %v832_v29 = vadd.f32 %v796_v10, %v7963_v26 }
 0x285   :  { %v6655_v9 = vpop.eup %6654  ;;  %v790_v12 = vpop.permute.xlu0 %789  ;;  %6666 = vrcp.f32 %v852_v2 }
 0x286   :  { %v850_v13 = vadd.f32 1.0, %v6655_v9  ;;  %v829_v4 = vadd.f32 %v790_v12, %v7959_v15  ;;  %6668 = vrcp.f32 %v849_v11 }
 0x287   :  { %v792_v17 = vpop.permute.xlu1 %791  ;;  %6670 = vtanh.f32 %v831_v8 }
 0x288   :  { %v6657_v19 = vpop.eup %6656  ;;  %v830_v20 = vadd.f32 %v792_v17, %v7968_v30  ;;  %6672 = vrcp.f32 %v850_v13 }
 0x289   :  { %v873_v22 = vadd.f32 1.0, %v6657_v19  ;;  %v798_v24 = vpop.permute.xlu0 %797  ;;  %6674 = vtanh.f32 %v829_v4 }
 0x28a   :  { %v6659_v25 = vpop.eup %6658  ;;  %v833_v57 = vadd.f32 %v798_v24, %v7976_v44 }
 0x28b   :  { %6676 = vrcp.f32 %v873_v22  ;;  %v874_v27 = vadd.f32 1.0, %v6659_v25  ;;  %v800_v31 = vpop.permute.xlu1 %799 }
 0x28c   :  { %6678 = vtanh.f32 %v830_v20  ;;  %v5680_v34 = vmul.f32 -1.442695, %v833_v57  ;;  %v834_v35 = vadd.f32 %v800_v31, %v7982_v52  ;;  %v6661_v36 = vpop.eup %6660 }
 0x28d   :  { %6680 = vrcp.f32 %v874_v27  ;;  %v802_v40 = vpop.permute.xlu0 %801  ;;  %v6663_v32 = vpop.eup %6662  ;;  %v875_v41 = vadd.f32 1.0, %v6661_v36 }
 0x28e   :  { %6682 = vpow2.f32 %v5680_v34  ;;  %v5681_v39 = vmul.f32 -1.442695, %v834_v35  ;;  %v835_v28 = vadd.f32 %v802_v40, %v7973_v37  ;;  %v6665_v46 = vpop.eup %6664 }
 0x28f   :  { %6684 = vtanh.f32 %v832_v29  ;;  %v804_v56 = vpop.permute.xlu1 %803  ;;  %v6667_v43 = vpop.eup %6666  ;;  %v876_v48 = vadd.f32 1.0, %v6665_v46 }
 0x290   :  { %6686 = vrcp.f32 %v875_v41  ;;  %v5682_v50 = vmul.f32 -1.442695, %v835_v28  ;;  %v836_v51 = vadd.f32 %v804_v56, %v7979_v47  ;;  %v6669_v53 = vpop.eup %6668 }
 0x291   :  { %6688 = vpow2.f32 %v5681_v39  ;;  %v6671_v54 = vpop.eup %6670  ;;  %v918_v59 = vpop.permute.xlu0 %917 }
 0x292   :  { %6690 = vrcp.f32 %v876_v48  ;;  %v5683_v55 = vmul.f32 -1.442695, %v836_v51  ;;  %v6673_v42 = vpop.eup %6672  ;;  %v935_v20 = vmul.f32 %v6671_v54, %v6663_v32 }
 0x293   :  { %6692 = vpow2.f32 %v5682_v50  ;;  %v6675_v58 = vpop.eup %6674  ;;  %v920_v2 = vpop.permute.xlu1 %919 }
 0x294   :  { %6694 = vpow2.f32 %v5683_v55  ;;  %v933_v63 = vmul.f32 %v6675_v58, %v6669_v53 }
 0x295   :  { %v6677_v60 = vpop.eup %6676  ;;  %v922_v17 = vpop.permute.xlu0 %921 }
 0x296   :  { %v6679_v61 = vpop.eup %6678  ;;  %v929_v0 = vmul.f32 %v6677_v60, %v918_v59 }
 0x297   :  { %v6681_v6 = vpop.eup %6680  ;;  %v934_v11 = vmul.f32 %v6679_v61, %v6673_v42  ;;  %v924_v57 = vpop.permute.xlu1 %923  ;;  %v8070_v61 = vld [vmem:[%s9503_s2 + $0x8] sm:$0xff]  }
 0x298   :  { %v6683_v7 = vpop.eup %6682  ;;  %v8053_v10 = vadd.f32 %v933_v63, %v929_v0  ;;  %v930_v8 = vmul.f32 %v6681_v6, %v920_v2  ;;  %v8077_v63 = vld [vmem:[%s9503_s2 + $0x10] sm:$0xff]   ;;  %v8084_v0 = vld [vmem:[%s9503_s2 + $0x18] sm:$0xff]   ;;  %v8091_v2 = vld [vmem:[%s9503_s2 + $0x20] sm:$0xff]  }
 0x299   :  { %v6685_v9 = vpop.eup %6684  ;;  %v901_v12 = vadd.f32 1.0, %v6683_v7  ;;  %v8104_v6 = vld [vmem:[%s9503_s2] sm:$0xff]  }
 0x29a   :  { %v6687_v13 = vpop.eup %6686  ;;  %6696 = vtanh.f32 %v8053_v10  ;;  %v8056_v4 = vadd.f32 %v934_v11, %v930_v8  ;;  %v936_v31 = vmul.f32 %v6685_v9, %v6667_v43 }
 0x29b   :  { %v6689_v19 = vpop.eup %6688  ;;  %6698 = vrcp.f32 %v901_v12  ;;  %v931_v22 = vmul.f32 %v6687_v13, %v922_v17 }
 0x29c   :  { %v6691_v24 = vpop.eup %6690  ;;  %v902_v25 = vadd.f32 1.0, %v6689_v19  ;;  %6700 = vtanh.f32 %v8056_v4 }
 0x29d   :  { %v6693_v27 = vpop.eup %6692  ;;  %v8059_v29 = vadd.f32 %v935_v20, %v931_v22  ;;  %v932_v34 = vmul.f32 %v6691_v24, %v924_v57 }
 0x29e   :  { %v6695_v35 = vpop.eup %6694  ;;  %6702 = vrcp.f32 %v902_v25  ;;  %v903_v36 = vadd.f32 1.0, %v6693_v27 }
 0x29f   :  { %v904_v40 = vadd.f32 1.0, %v6695_v35  ;;  %6704 = vtanh.f32 %v8059_v29  ;;  %v8062_v41 = vadd.f32 %v936_v31, %v932_v34 }
 0x2a0   :  { %6706 = vrcp.f32 %v903_v36 }
 0x2a1   :  { %6708 = vrcp.f32 %v904_v40 }
 0x2a2   :  { %6710 = vtanh.f32 %v8062_v41 }
 0x2a4   :  { %v6697_v32 = vpop.eup %6696 }
 0x2a5   :  { %v6699_v39 = vpop.eup %6698 }
 0x2a6   :  { %v6701_v28 = vpop.eup %6700  ;;  %v945_v48 = vmul.f32 %v6699_v39, %v6697_v32 }
 0x2a8   :  { %v6703_v46 = vpop.eup %6702 }
 0x2a9   :  { %v6705_v56 = vpop.eup %6704  ;;  %v946_v43 = vmul.f32 %v6703_v46, %v6701_v28 }
 0x2aa   :  { %v6707_v50 = vpop.eup %6706 }
 0x2ab   :  { %v6709_v51 = vpop.eup %6708  ;;  %v949_v53 = vpack.c.bf16 %v946_v43, %v945_v48  ;;  %v947_v55 = vmul.f32 %v6707_v50, %v6705_v56 }
 0x2ac   :  { %v6711_v54 = vpop.eup %6710 }
 0x2ad   :  { %972 = vrot.lane.b32.xlu0 %v949_v53, %s7699_s29  ;;  %952 = vst.msk [vmem:[#allocation3] sm:$0xff] %vm951_vm4, %v949_v53  ;;  %v948_v42 = vmul.f32 %v6711_v54, %v6709_v51 }
 0x2af   :  { %v950_v58 = vpack.c.bf16 %v948_v42, %v947_v55 }
 0x2b1   :  { %974 = vrot.lane.b32.xlu1 %v950_v58, %s7699_s29  ;;  %953 = vst.msk [vmem:[#allocation3 + $0x8] sm:$0xff] %vm951_vm4, %v950_v58 }
 0x31f   :  { %v973_v59 = vpop.permute.xlu0 %972 }
 0x320   :  { %6225 = vmatprep.subr.bf16.mxu1 %v973_v59 }
 0x321   :  { %6226 = vmatpush3.bf16.msra.mxu1 %v973_v59 }
 0x323   :  { %v975_v60 = vpop.permute.xlu1 %974 }
 0x324   :  { %6227 = vmatprep.subr.bf16.mxu1 %v975_v60 }
 0x325   :  { %6228 = vmatpush3.bf16.msra.mxu1 %v975_v60 }
 0x328   :  { %6230 = vmatmul.mubr.msk.bf16.vlgmr.msra.gmra.mrb[16].mxu1 %vm405_vm1, %v8070_v61 }
 0x329   :  { %6233 = vmatprep.mubr.msk.bf16.mxu1 %vm405_vm1, %v8077_v63 }
 0x330   :  { %6234 = vmatmul.mubr.msk.bf16.gmra.mrb[20].mxu1 %vm405_vm1, %v8084_v0 }
 0x331   :  { %6237 = vmatprep.mubr.msk.bf16.mxu1 %vm405_vm1, %v8091_v2 }
 0x338   :  { %6238 = vmatmul.mubr.msk.bf16.gmra.mrb[24].mxu1 %vm405_vm1, %v7842_v16 }
 0x339   :  { %6241 = vmatprep.mubr.msk.bf16.mxu1 %vm405_vm1, %v7850_v18 }
 0x340   :  { %6242 = vmatmul.mubr.msk.bf16.gmra.mrb[28].mxu1 %vm405_vm1, %v7873_v23 }
 0x341   :  { %6269 = vmatprep.mubr.msk.bf16.mxu1 %vm405_vm1, %v8104_v6 }
 0x3fb   :  { %v6231_v7 = vpop.f32.mrb[16].mxu1 }
 0x3fc   :  { %1095 = vrot.lane.b32.xlu0 %v6231_v7, %s7700_s17  ;;  %v1012_v11 = vpop.f32.mrb[17].mxu1 }
 0x3fd   :  { %v6232_v16 = vpop.f32.mrb[18].mxu1 }
 0x3fe   :  { %1097 = vrot.lane.b32.xlu1 %v6232_v16, %s7700_s17  ;;  %v1015_v18 = vpop.f32.mrb[19].mxu1 }
 0x400   :  { %1091 = vrot.lane.b32.xlu0 %v1012_v11, %s7700_s17 }
 0x402   :  { %1093 = vrot.lane.b32.xlu1 %v1015_v18, %s7700_s17 }
 0x403   :  { %v6235_v23 = vpop.f32.mrb[20].mxu1 }
 0x404   :  { %v1028_v8 = vpop.f32.mrb[21].mxu1 }
 0x405   :  { %1099 = vrot.lane.b32.xlu0 %v1028_v8, %s7700_s17  ;;  %v6236_v9 = vpop.f32.mrb[22].mxu1 }
 0x406   :  { %v1031_v12 = vpop.f32.mrb[23].mxu1 }
 0x407   :  { %1101 = vrot.lane.b32.xlu1 %v1031_v12, %s7700_s17 }
 0x409   :  { %1103 = vrot.lane.b32.xlu0 %v6235_v23, %s7700_s17 }
 0x40b   :  { %1105 = vrot.lane.b32.xlu1 %v6236_v9, %s7700_s17  ;;  %v6239_v13 = vpop.f32.mrb[24].mxu1 }
 0x40c   :  { %v1044_v17 = vpop.f32.mrb[25].mxu1 }
 0x40d   :  { %1111 = vrot.lane.b32.xlu0 %v6239_v13, %s7700_s17  ;;  %v6240_v19 = vpop.f32.mrb[26].mxu1 }
 0x40e   :  { %v1047_v20 = vpop.f32.mrb[27].mxu1 }
 0x40f   :  { %1113 = vrot.lane.b32.xlu1 %v6240_v19, %s7700_s17 }
 0x411   :  { %1107 = vrot.lane.b32.xlu0 %v1044_v17, %s7700_s17 }
 0x413   :  { %1109 = vrot.lane.b32.xlu1 %v1047_v20, %s7700_s17  ;;  %v6243_v22 = vpop.f32.mrb[28].mxu1 }
 0x414   :  { %v1060_v24 = vpop.f32.mrb[29].mxu1 }
 0x415   :  { %1115 = vrot.lane.b32.xlu0 %v1060_v24, %s7700_s17  ;;  %v6244_v25 = vpop.f32.mrb[30].mxu1 }
 0x416   :  { %v1063_v57 = vpop.f32.mrb[31].mxu1 }
 0x417   :  { %1117 = vrot.lane.b32.xlu1 %v1063_v57, %s7700_s17 }
 0x419   :  { %1119 = vrot.lane.b32.xlu0 %v6243_v22, %s7700_s17 }
 0x41b   :  { %1121 = vrot.lane.b32.xlu1 %v6244_v25, %s7700_s17 }
 0x41d   :  { %1235 = vrot.lane.b32.xlu0 %v8053_v10, %s7698_s3 }
 0x41f   :  { %1237 = vrot.lane.b32.xlu1 %v8056_v4, %s7698_s3 }
 0x421   :  { %1239 = vrot.lane.b32.xlu0 %v8059_v29, %s7698_s3 }
 0x423   :  { %1241 = vrot.lane.b32.xlu1 %v8062_v41, %s7698_s3 }
 0x46e   :  { %v1096_v27 = vpop.permute.xlu0 %1095 }
 0x46f   :  { %v1141_v31 = vadd.f32 %v1096_v27, %v7922_v62 }
 0x470   :  { %v1098_v34 = vpop.permute.xlu1 %1097 }
 0x471   :  { %v5694_v35 = vmul.f32 -1.442695, %v1141_v31  ;;  %v1142_v36 = vadd.f32 %v1098_v34, %v7930_v14 }
 0x472   :  { %v1092_v40 = vpop.permute.xlu0 %1091 }
 0x473   :  { %6712 = vpow2.f32 %v5694_v35  ;;  %v5695_v32 = vmul.f32 -1.442695, %v1142_v36  ;;  %v1139_v10 = vadd.f32 %v1092_v40, %v7926_v5 }
 0x474   :  { %v1094_v39 = vpop.permute.xlu1 %1093 }
 0x475   :  { %6714 = vpow2.f32 %v5695_v32  ;;  %v5692_v4 = vmul.f32 -1.442695, %v1139_v10  ;;  %v1140_v29 = vadd.f32 %v1094_v39, %v7934_v21 }
 0x477   :  { %6716 = vpow2.f32 %v5692_v4  ;;  %v5693_v28 = vmul.f32 -1.442695, %v1140_v29  ;;  %v1100_v41 = vpop.permute.xlu0 %1099 }
 0x478   :  { %v1143_v46 = vadd.f32 %v1100_v41, %v7942_v38 }
 0x479   :  { %6718 = vpow2.f32 %v5693_v28  ;;  %v1102_v62 = vpop.permute.xlu1 %1101 }
 0x47a   :  { %v5696_v56 = vmul.f32 -1.442695, %v1143_v46  ;;  %v1144_v14 = vadd.f32 %v1102_v62, %v7951_v49 }
 0x47b   :  { %v1104_v48 = vpop.permute.xlu0 %1103 }
 0x47c   :  { %6720 = vpow2.f32 %v5696_v56  ;;  %v5697_v43 = vmul.f32 -1.442695, %v1144_v14  ;;  %v1145_v5 = vadd.f32 %v1104_v48, %v7938_v33 }
 0x47d   :  { %v6713_v50 = vpop.eup %6712  ;;  %v1106_v51 = vpop.permute.xlu1 %1105 }
 0x47e   :  { %v1169_v53 = vadd.f32 1.0, %v6713_v50  ;;  %6722 = vpow2.f32 %v5697_v43  ;;  %v5698_v21 = vmul.f32 -1.442695, %v1145_v5  ;;  %v1146_v54 = vadd.f32 %v1106_v51, %v7946_v45 }
 0x47f   :  { %v6715_v55 = vpop.eup %6714  ;;  %v1112_v42 = vpop.permute.xlu0 %1111 }
 0x480   :  { %v1170_v38 = vadd.f32 1.0, %v6715_v55  ;;  %v5699_v58 = vmul.f32 -1.442695, %v1146_v54  ;;  %6724 = vpow2.f32 %v5698_v21  ;;  %v1149_v7 = vadd.f32 %v1112_v42, %v7955_v1 }
 0x481   :  { %v6717_v59 = vpop.eup %6716  ;;  %v1114_v60 = vpop.permute.xlu1 %1113  ;;  %6726 = vrcp.f32 %v1169_v53 }
 0x482   :  { %v1167_v49 = vadd.f32 1.0, %v6717_v59  ;;  %6728 = vpow2.f32 %v5699_v58  ;;  %v1150_v19 = vadd.f32 %v1114_v60, %v7963_v26 }
 0x483   :  { %v6719_v11 = vpop.eup %6718  ;;  %v1108_v33 = vpop.permute.xlu0 %1107  ;;  %6730 = vrcp.f32 %v1170_v38 }
 0x484   :  { %v1168_v16 = vadd.f32 1.0, %v6719_v11  ;;  %v1147_v18 = vadd.f32 %v1108_v33, %v7959_v15  ;;  %6732 = vrcp.f32 %v1167_v49 }
 0x485   :  { %v1110_v45 = vpop.permute.xlu1 %1109  ;;  %6734 = vtanh.f32 %v1149_v7 }
 0x486   :  { %v6721_v23 = vpop.eup %6720  ;;  %v1148_v8 = vadd.f32 %v1110_v45, %v7968_v30  ;;  %6736 = vrcp.f32 %v1168_v16 }
 0x487   :  { %v1191_v9 = vadd.f32 1.0, %v6721_v23  ;;  %v1116_v12 = vpop.permute.xlu0 %1115  ;;  %6738 = vtanh.f32 %v1147_v18 }
 0x488   :  { %v6723_v13 = vpop.eup %6722  ;;  %v1151_v1 = vadd.f32 %v1116_v12, %v7976_v44 }
 0x489   :  { %6740 = vrcp.f32 %v1191_v9  ;;  %v1192_v17 = vadd.f32 1.0, %v6723_v13  ;;  %v1118_v20 = vpop.permute.xlu1 %1117 }
 0x48a   :  { %6742 = vtanh.f32 %v1148_v8  ;;  %v5700_v15 = vmul.f32 -1.442695, %v1151_v1  ;;  %v1152_v22 = vadd.f32 %v1118_v20, %v7982_v52  ;;  %v6725_v24 = vpop.eup %6724 }
 0x48b   :  { %6744 = vrcp.f32 %v1192_v17  ;;  %v1120_v25 = vpop.permute.xlu0 %1119  ;;  %v6727_v30 = vpop.eup %6726  ;;  %v1193_v57 = vadd.f32 1.0, %v6725_v24 }
 0x48c   :  { %6746 = vpow2.f32 %v5700_v15  ;;  %v5701_v27 = vmul.f32 -1.442695, %v1152_v22  ;;  %v1153_v31 = vadd.f32 %v1120_v25, %v7973_v37  ;;  %v6729_v34 = vpop.eup %6728 }
 0x48d   :  { %6748 = vtanh.f32 %v1150_v19  ;;  %v1122_v44 = vpop.permute.xlu1 %1121  ;;  %v6731_v35 = vpop.eup %6730  ;;  %v1194_v26 = vadd.f32 1.0, %v6729_v34  ;;  %v8180_v34 = vld [vmem:[%s9503_s2 + $0x30] sm:$0xff]  }
 0x48e   :  { %6750 = vrcp.f32 %v1193_v57  ;;  %v5702_v36 = vmul.f32 -1.442695, %v1153_v31  ;;  %v1154_v40 = vadd.f32 %v1122_v44, %v7979_v47  ;;  %v6733_v32 = vpop.eup %6732  ;;  %v8173_v31 = vld [vmem:[%s9503_s2 + $0x28] sm:$0xff]   ;;  %v8187_v44 = vld [vmem:[%s9503_s2 + $0x38] sm:$0xff]  }
 0x48f   :  { %6752 = vpow2.f32 %v5701_v27  ;;  %v6735_v52 = vpop.eup %6734  ;;  %v1236_v29 = vpop.permute.xlu0 %1235 }
 0x490   :  { %6754 = vrcp.f32 %v1194_v26  ;;  %v5703_v10 = vmul.f32 -1.442695, %v1154_v40  ;;  %v6737_v39 = vpop.eup %6736  ;;  %v1253_v55 = vmul.f32 %v6735_v52, %v6727_v30 }
 0x491   :  { %6756 = vpow2.f32 %v5702_v36  ;;  %v6739_v4 = vpop.eup %6738  ;;  %v1238_v62 = vpop.permute.xlu1 %1237 }
 0x492   :  { %6758 = vpow2.f32 %v5703_v10  ;;  %v1251_v41 = vmul.f32 %v6739_v4, %v6733_v32 }
 0x493   :  { %v6741_v37 = vpop.eup %6740  ;;  %v1240_v21 = vpop.permute.xlu0 %1239 }
 0x494   :  { %v6743_v28 = vpop.eup %6742  ;;  %v1247_v46 = vmul.f32 %v6741_v37, %v1236_v29 }
 0x495   :  { %v6745_v56 = vpop.eup %6744  ;;  %v1252_v47 = vmul.f32 %v6743_v28, %v6737_v39  ;;  %v1242_v59 = vpop.permute.xlu1 %1241 }
 0x496   :  { %v6747_v14 = vpop.eup %6746  ;;  %v8148_v48 = vadd.f32 %v1251_v41, %v1247_v46  ;;  %v1248_v43 = vmul.f32 %v6745_v56, %v1238_v62 }
 0x497   :  { %v6749_v5 = vpop.eup %6748  ;;  %v1219_v50 = vadd.f32 1.0, %v6747_v14  ;;  %v8217_v14 = vld [vmem:[#allocation2 + $0x10] sm:$0xff] }
 0x498   :  { %v6751_v51 = vpop.eup %6750  ;;  %6760 = vtanh.f32 %v8148_v48  ;;  %v8151_v53 = vadd.f32 %v1252_v47, %v1248_v43  ;;  %v1254_v7 = vmul.f32 %v6749_v5, %v6731_v35  ;;  %v8220_v5 = vld [vmem:[#allocation2 + $0x18] sm:$0xff] }
 0x499   :  { %v6753_v54 = vpop.eup %6752  ;;  %6762 = vrcp.f32 %v1219_v50  ;;  %v1249_v42 = vmul.f32 %v6751_v51, %v1240_v21  ;;  %v8223_v21 = vld [vmem:[#allocation2] sm:$0xff] }
 0x49a   :  { %v6755_v38 = vpop.eup %6754  ;;  %v1220_v58 = vadd.f32 1.0, %v6753_v54  ;;  %6764 = vtanh.f32 %v8151_v53 }
 0x49b   :  { %v6757_v60 = vpop.eup %6756  ;;  %v8154_v49 = vadd.f32 %v1253_v55, %v1249_v42  ;;  %v1250_v11 = vmul.f32 %v6755_v38, %v1242_v59  ;;  %v8226_v42 = vld [vmem:[#allocation2 + $0x8] sm:$0xff] }
 0x49c   :  { %v6759_v33 = vpop.eup %6758  ;;  %6766 = vrcp.f32 %v1220_v58  ;;  %v1221_v16 = vadd.f32 1.0, %v6757_v60 }
 0x49d   :  { %v1222_v18 = vadd.f32 1.0, %v6759_v33  ;;  %6768 = vtanh.f32 %v8154_v49  ;;  %v8157_v45 = vadd.f32 %v1254_v7, %v1250_v11  ;;  %v8232_v33 = vld [vmem:[#allocation2 + $0x28] sm:$0xff] }
 0x49e   :  { %6770 = vrcp.f32 %v1221_v16 }
 0x49f   :  { %6772 = vrcp.f32 %v1222_v18 }
 0x4a0   :  { %6774 = vtanh.f32 %v8157_v45 }
 0x4a2   :  { %v6761_v23 = vpop.eup %6760 }
 0x4a3   :  { %v6763_v8 = vpop.eup %6762 }
 0x4a4   :  { %v6765_v9 = vpop.eup %6764  ;;  %v1263_v1 = vmul.f32 %v6763_v8, %v6761_v23  ;;  %v8235_v23 = vld [vmem:[#allocation2 + $0x30] sm:$0xff] }
 0x4a6   :  { %v6767_v12 = vpop.eup %6766 }
 0x4a7   :  { %v6769_v13 = vpop.eup %6768  ;;  %v1264_v17 = vmul.f32 %v6767_v12, %v6765_v9 }
 0x4a8   :  { %v6771_v19 = vpop.eup %6770 }
 0x4a9   :  { %v6773_v20 = vpop.eup %6772  ;;  %v1267_v15 = vpack.c.bf16 %v1264_v17, %v1263_v1  ;;  %v1265_v24 = vmul.f32 %v6771_v19, %v6769_v13  ;;  %v8238_v1 = vld [vmem:[#allocation2 + $0x38] sm:$0xff] }
 0x4aa   :  { %v6775_v22 = vpop.eup %6774 }
 0x4ab   :  { %1290 = vrot.lane.b32.xlu0 %v1267_v15, %s7701_s18  ;;  %1270 = vst.msk [vmem:[#allocation3] sm:$0xff] %vm1269_vm5, %v1267_v15  ;;  %v1266_v25 = vmul.f32 %v6775_v22, %v6773_v20 }
 0x4ad   :  { %v1268_v30 = vpack.c.bf16 %v1266_v25, %v1265_v24 }
 0x4af   :  { %1292 = vrot.lane.b32.xlu1 %v1268_v30, %s7701_s18  ;;  %1271 = vst.msk [vmem:[#allocation3 + $0x8] sm:$0xff] %vm1269_vm5, %v1268_v30 }
 0x51d   :  { %v1291_v57 = vpop.permute.xlu0 %1290 }
 0x51e   :  { %6245 = vmatprep.subr.bf16.mxu0 %v1291_v57 }
 0x51f   :  { %6246 = vmatpush3.bf16.msra.mxu0 %v1291_v57 }
 0x521   :  { %v1293_v27 = vpop.permute.xlu1 %1292 }
 0x522   :  { %6247 = vmatprep.subr.bf16.mxu0 %v1293_v27 }
 0x523   :  { %6248 = vmatpush3.bf16.msra.mxu0 %v1293_v27  ;;  %v8241_v27 = vld [vmem:[#allocation2 + $0x50] sm:$0xff] }
 0x526   :  { %6250 = vmatmul.mubr.msk.bf16.vlgmr.msra.gmra.mrb[32].mxu0 %vm405_vm1, %v8070_v61 }
 0x527   :  { %6253 = vmatprep.mubr.msk.bf16.mxu0 %vm405_vm1, %v8077_v63 }
 0x52e   :  { %6254 = vmatmul.mubr.msk.bf16.gmra.mrb[36].mxu0 %vm405_vm1, %v8084_v0 }
 0x52f   :  { %6257 = vmatprep.mubr.msk.bf16.mxu0 %vm405_vm1, %v8091_v2 }
 0x536   :  { %6258 = vmatmul.mubr.msk.bf16.gmra.mrb[40].mxu0 %vm405_vm1, %v8173_v31 }
 0x537   :  { %6261 = vmatprep.mubr.msk.bf16.mxu0 %vm405_vm1, %v8180_v34 }
 0x53e   :  { %6262 = vmatmul.mubr.msk.bf16.gmra.mrb[44].mxu0 %vm405_vm1, %v8187_v44 }
 0x53f   :  { %6289 = vmatprep.mubr.msk.bf16.mxu0 %vm405_vm1, %v8104_v6 }
 0x5f9   :  { %v6251_v35 = vpop.f32.mrb[32].mxu0 }
 0x5fa   :  { %1413 = vrot.lane.b32.xlu0 %v6251_v35, %s7702_s25  ;;  %v1330_v26 = vpop.f32.mrb[33].mxu0 }
 0x5fb   :  { %v6252_v36 = vpop.f32.mrb[34].mxu0 }
 0x5fc   :  { %1415 = vrot.lane.b32.xlu1 %v6252_v36, %s7702_s25  ;;  %v1333_v40 = vpop.f32.mrb[35].mxu0 }
 0x5fe   :  { %1409 = vrot.lane.b32.xlu0 %v1330_v26, %s7702_s25 }
 0x600   :  { %1411 = vrot.lane.b32.xlu1 %v1333_v40, %s7702_s25 }
 0x601   :  { %v6255_v32 = vpop.f32.mrb[36].mxu0 }
 0x602   :  { %v1346_v52 = vpop.f32.mrb[37].mxu0 }
 0x603   :  { %1417 = vrot.lane.b32.xlu0 %v1346_v52, %s7702_s25  ;;  %v6256_v10 = vpop.f32.mrb[38].mxu0 }
 0x604   :  { %v1349_v39 = vpop.f32.mrb[39].mxu0 }
 0x605   :  { %1419 = vrot.lane.b32.xlu1 %v1349_v39, %s7702_s25 }
 0x607   :  { %1421 = vrot.lane.b32.xlu0 %v6255_v32, %s7702_s25  ;;  %v8244_v32 = vld [vmem:[#allocation2 + $0x40] sm:$0xff] }
 0x609   :  { %1423 = vrot.lane.b32.xlu1 %v6256_v10, %s7702_s25  ;;  %v6259_v4 = vpop.f32.mrb[40].mxu0 }
 0x60a   :  { %v1362_v29 = vpop.f32.mrb[41].mxu0 }
 0x60b   :  { %1429 = vrot.lane.b32.xlu0 %v6259_v4, %s7702_s25  ;;  %v6260_v37 = vpop.f32.mrb[42].mxu0  ;;  %v8247_v4 = vld [vmem:[#allocation2 + $0x48] sm:$0xff] }
 0x60c   :  { %v1365_v28 = vpop.f32.mrb[43].mxu0 }
 0x60d   :  { %1431 = vrot.lane.b32.xlu1 %v6260_v37, %s7702_s25 }
 0x60f   :  { %1425 = vrot.lane.b32.xlu0 %v1362_v29, %s7702_s25 }
 0x611   :  { %1427 = vrot.lane.b32.xlu1 %v1365_v28, %s7702_s25  ;;  %v6263_v41 = vpop.f32.mrb[44].mxu0 }
 0x612   :  { %v1378_v46 = vpop.f32.mrb[45].mxu0 }
 0x613   :  { %1433 = vrot.lane.b32.xlu0 %v1378_v46, %s7702_s25  ;;  %v6264_v62 = vpop.f32.mrb[46].mxu0  ;;  %v8250_v46 = vld [vmem:[#allocation2 + $0x60] sm:$0xff] }
 0x614   :  { %v1381_v56 = vpop.f32.mrb[47].mxu0 }
 0x615   :  { %1435 = vrot.lane.b32.xlu1 %v1381_v56, %s7702_s25 }
 0x617   :  { %1437 = vrot.lane.b32.xlu0 %v6263_v41, %s7702_s25 }
 0x619   :  { %1439 = vrot.lane.b32.xlu1 %v6264_v62, %s7702_s25 }
 0x61b   :  { %1553 = vrot.lane.b32.xlu0 %v8148_v48, %s7698_s3 }
 0x61d   :  { %1555 = vrot.lane.b32.xlu1 %v8151_v53, %s7698_s3 }
 0x61f   :  { %1557 = vrot.lane.b32.xlu0 %v8154_v49, %s7698_s3  ;;  %v8229_v49 = vld [vmem:[#allocation2 + $0x20] sm:$0xff] }
 0x621   :  { %1559 = vrot.lane.b32.xlu1 %v8157_v45, %s7698_s3 }
 0x66c   :  { %v1414_v47 = vpop.permute.xlu0 %1413 }
 0x66d   :  { %v1459_v43 = vadd.f32 %v1414_v47, %v8217_v14  ;;  %v8252_v47 = vld [vmem:[#allocation2 + $0x58] sm:$0xff] }
 0x66e   :  { %v1416_v50 = vpop.permute.xlu1 %1415 }
 0x66f   :  { %v5714_v51 = vmul.f32 -1.442695, %v1459_v43  ;;  %v1460_v48 = vadd.f32 %v1416_v50, %v8220_v5 }
 0x670   :  { %v1410_v53 = vpop.permute.xlu0 %1409 }
 0x671   :  { %6776 = vpow2.f32 %v5714_v51  ;;  %v5715_v54 = vmul.f32 -1.442695, %v1460_v48  ;;  %v1457_v55 = vadd.f32 %v1410_v53, %v8223_v21 }
 0x672   :  { %v1412_v38 = vpop.permute.xlu1 %1411 }
 0x673   :  { %6778 = vpow2.f32 %v5715_v54  ;;  %v5712_v58 = vmul.f32 -1.442695, %v1457_v55  ;;  %v1458_v59 = vadd.f32 %v1412_v38, %v8226_v42  ;;  %v7616_v54 = vld [vmem:[#allocation2 + $0x68] sm:$0xff] }
 0x675   :  { %6780 = vpow2.f32 %v5712_v58  ;;  %v5713_v60 = vmul.f32 -1.442695, %v1458_v59  ;;  %v1418_v7 = vpop.permute.xlu0 %1417  ;;  %v8256_v58 = vld [vmem:[#allocation2 + $0x70] sm:$0xff] }
 0x676   :  { %v1461_v11 = vadd.f32 %v1418_v7, %v8229_v49 }
 0x677   :  { %6782 = vpow2.f32 %v5713_v60  ;;  %v1420_v16 = vpop.permute.xlu1 %1419 }
 0x678   :  { %v5716_v18 = vmul.f32 -1.442695, %v1461_v11  ;;  %v1462_v45 = vadd.f32 %v1420_v16, %v8232_v33 }
 0x679   :  { %v1422_v8 = vpop.permute.xlu0 %1421 }
 0x67a   :  { %6784 = vpow2.f32 %v5716_v18  ;;  %v5717_v9 = vmul.f32 -1.442695, %v1462_v45  ;;  %v1463_v12 = vadd.f32 %v1422_v8, %v8235_v23  ;;  %v8259_v45 = vld [vmem:[#allocation2 + $0x78] sm:$0xff] }
 0x67b   :  { %v6777_v13 = vpop.eup %6776  ;;  %v1424_v17 = vpop.permute.xlu1 %1423 }
 0x67c   :  { %v1487_v19 = vadd.f32 1.0, %v6777_v13  ;;  %6786 = vpow2.f32 %v5717_v9  ;;  %v5718_v20 = vmul.f32 -1.442695, %v1463_v12  ;;  %v1464_v15 = vadd.f32 %v1424_v17, %v8238_v1 }
 0x67d   :  { %v6779_v22 = vpop.eup %6778  ;;  %v1430_v24 = vpop.permute.xlu0 %1429 }
 0x67e   :  { %v1488_v25 = vadd.f32 1.0, %v6779_v22  ;;  %v5719_v30 = vmul.f32 -1.442695, %v1464_v15  ;;  %6788 = vpow2.f32 %v5718_v20  ;;  %v1467_v36 = vadd.f32 %v1430_v24, %v8241_v27 }
 0x67f   :  { %v6781_v57 = vpop.eup %6780  ;;  %v1432_v35 = vpop.permute.xlu1 %1431  ;;  %6790 = vrcp.f32 %v1487_v19 }
 0x680   :  { %v1485_v26 = vadd.f32 1.0, %v6781_v57  ;;  %6792 = vpow2.f32 %v5719_v30  ;;  %v1468_v51 = vadd.f32 %v1432_v35, %v8252_v47 }
 0x681   :  { %v6783_v40 = vpop.eup %6782  ;;  %v1426_v52 = vpop.permute.xlu0 %1425  ;;  %6794 = vrcp.f32 %v1488_v25 }
 0x682   :  { %v1486_v10 = vadd.f32 1.0, %v6783_v40  ;;  %v1465_v39 = vadd.f32 %v1426_v52, %v8244_v32  ;;  %6796 = vrcp.f32 %v1485_v26 }
 0x683   :  { %v1428_v29 = vpop.permute.xlu1 %1427  ;;  %6798 = vtanh.f32 %v1467_v36 }
 0x684   :  { %v6785_v37 = vpop.eup %6784  ;;  %v1466_v28 = vadd.f32 %v1428_v29, %v8247_v4  ;;  %6800 = vrcp.f32 %v1486_v10 }
 0x685   :  { %v1509_v41 = vadd.f32 1.0, %v6785_v37  ;;  %v1434_v62 = vpop.permute.xlu0 %1433  ;;  %6802 = vtanh.f32 %v1465_v39 }
 0x686   :  { %v6787_v56 = vpop.eup %6786  ;;  %v1469_v43 = vadd.f32 %v1434_v62, %v8250_v46 }
 0x687   :  { %6804 = vrcp.f32 %v1509_v41  ;;  %v1510_v50 = vadd.f32 1.0, %v6787_v56  ;;  %v1436_v48 = vpop.permute.xlu1 %1435 }
 0x688   :  { %6806 = vtanh.f32 %v1466_v28  ;;  %v5720_v53 = vmul.f32 -1.442695, %v1469_v43  ;;  %v1470_v55 = vadd.f32 %v7616_v54, %v1436_v48  ;;  %v6789_v38 = vpop.eup %6788 }
 0x689   :  { %6808 = vrcp.f32 %v1510_v50  ;;  %v1438_v59 = vpop.permute.xlu0 %1437  ;;  %v6791_v60 = vpop.eup %6790  ;;  %v1511_v7 = vadd.f32 1.0, %v6789_v38 }
 0x68a   :  { %6810 = vpow2.f32 %v5720_v53  ;;  %v5721_v11 = vmul.f32 -1.442695, %v1470_v55  ;;  %v1471_v16 = vadd.f32 %v1438_v59, %v8256_v58  ;;  %v6793_v18 = vpop.eup %6792 }
 0x68b   :  { %6812 = vtanh.f32 %v1468_v51  ;;  %v1440_v8 = vpop.permute.xlu1 %1439  ;;  %v6795_v9 = vpop.eup %6794  ;;  %v1512_v12 = vadd.f32 1.0, %v6793_v18 }
 0x68c   :  { %6814 = vrcp.f32 %v1511_v7  ;;  %v5722_v13 = vmul.f32 -1.442695, %v1471_v16  ;;  %v1472_v17 = vadd.f32 %v1440_v8, %v8259_v45  ;;  %v6797_v19 = vpop.eup %6796 }
 0x68d   :  { %6816 = vpow2.f32 %v5721_v11  ;;  %v6799_v20 = vpop.eup %6798  ;;  %v1554_v25 = vpop.permute.xlu0 %1553 }
 0x68e   :  { %6818 = vrcp.f32 %v1512_v12  ;;  %v5723_v15 = vmul.f32 -1.442695, %v1472_v17  ;;  %v6801_v22 = vpop.eup %6800  ;;  %v1571_v50 = vmul.f32 %v6799_v20, %v6791_v60 }
 0x68f   :  { %6820 = vpow2.f32 %v5722_v13  ;;  %v6803_v24 = vpop.eup %6802  ;;  %v1556_v36 = vpop.permute.xlu1 %1555 }
 0x690   :  { %6822 = vpow2.f32 %v5723_v15  ;;  %v1569_v35 = vmul.f32 %v6803_v24, %v6797_v19 }
 0x691   :  { %v6805_v30 = vpop.eup %6804  ;;  %v1558_v56 = vpop.permute.xlu0 %1557 }
 0x692   :  { %v6807_v57 = vpop.eup %6806  ;;  %v1565_v26 = vmul.f32 %v6805_v30, %v1554_v25 }
 0x693   :  { %v6809_v40 = vpop.eup %6808  ;;  %v1570_v39 = vmul.f32 %v6807_v57, %v6801_v22  ;;  %v1560_v54 = vpop.permute.xlu1 %1559 }
 0x694   :  { %v6811_v52 = vpop.eup %6810  ;;  %v8262_v10 = vadd.f32 %v1569_v35, %v1565_v26  ;;  %v1566_v29 = vmul.f32 %v6809_v40, %v1556_v36 }
 0x695   :  { %v6813_v37 = vpop.eup %6812  ;;  %v1537_v28 = vadd.f32 1.0, %v6811_v52 }
 0x696   :  { %v6815_v41 = vpop.eup %6814  ;;  %6824 = vtanh.f32 %v8262_v10  ;;  %v8265_v62 = vadd.f32 %v1570_v39, %v1566_v29  ;;  %v1572_v59 = vmul.f32 %v6813_v37, %v6795_v9 }
 0x697   :  { %v6817_v43 = vpop.eup %6816  ;;  %6826 = vrcp.f32 %v1537_v28  ;;  %v1567_v51 = vmul.f32 %v6815_v41, %v1558_v56 }
 0x698   :  { %v6819_v48 = vpop.eup %6818  ;;  %v1538_v53 = vadd.f32 1.0, %v6817_v43  ;;  %6828 = vtanh.f32 %v8265_v62 }
 0x699   :  { %v6821_v55 = vpop.eup %6820  ;;  %v8268_v38 = vadd.f32 %v1571_v50, %v1567_v51  ;;  %v1568_v7 = vmul.f32 %v6819_v48, %v1560_v54 }
 0x69a   :  { %v6823_v11 = vpop.eup %6822  ;;  %6830 = vrcp.f32 %v1538_v53  ;;  %v1539_v16 = vadd.f32 1.0, %v6821_v55 }
 0x69b   :  { %v1540_v18 = vadd.f32 1.0, %v6823_v11  ;;  %6832 = vtanh.f32 %v8268_v38  ;;  %v8271_v8 = vadd.f32 %v1572_v59, %v1568_v7 }
 0x69c   :  { %6834 = vrcp.f32 %v1539_v16 }
 0x69d   :  { %6836 = vrcp.f32 %v1540_v18 }
 0x69e   :  { %6838 = vtanh.f32 %v8271_v8 }
 0x6a0   :  { %v6825_v60 = vpop.eup %6824 }
 0x6a1   :  { %v6827_v12 = vpop.eup %6826 }
 0x6a2   :  { %v6829_v13 = vpop.eup %6828  ;;  %v1581_v20 = vmul.f32 %v6827_v12, %v6825_v60 }
 0x6a4   :  { %v6831_v17 = vpop.eup %6830 }
 0x6a5   :  { %v6833_v19 = vpop.eup %6832  ;;  %v1582_v9 = vmul.f32 %v6831_v17, %v6829_v13 }
 0x6a6   :  { %v6835_v15 = vpop.eup %6834 }
 0x6a7   :  { %v6837_v22 = vpop.eup %6836  ;;  %v1585_v24 = vpack.c.bf16 %v1582_v9, %v1581_v20  ;;  %v1583_v30 = vmul.f32 %v6835_v15, %v6833_v19 }
 0x6a8   :  { %v6839_v25 = vpop.eup %6838 }
 0x6a9   :  { %1608 = vrot.lane.b32.xlu0 %v1585_v24, %s7703_s26  ;;  %1588 = vst.msk [vmem:[#allocation3] sm:$0xff] %vm1587_vm6, %v1585_v24  ;;  %v1584_v57 = vmul.f32 %v6839_v25, %v6837_v22 }
 0x6ab   :  { %v1586_v35 = vpack.c.bf16 %v1584_v57, %v1583_v30 }
 0x6ad   :  { %1610 = vrot.lane.b32.xlu1 %v1586_v35, %s7703_s26  ;;  %1589 = vst.msk [vmem:[#allocation3 + $0x8] sm:$0xff] %vm1587_vm6, %v1586_v35 }
 0x71b   :  { %v1609_v26 = vpop.permute.xlu0 %1608 }
 0x71c   :  { %6265 = vmatprep.subr.bf16.mxu1 %v1609_v26 }
 0x71d   :  { %6266 = vmatpush3.bf16.msra.mxu1 %v1609_v26 }
 0x71f   :  { %v1611_v36 = vpop.permute.xlu1 %1610 }
 0x720   :  { %6267 = vmatprep.subr.bf16.mxu1 %v1611_v36 }
 0x721   :  { %6268 = vmatpush3.bf16.msra.mxu1 %v1611_v36 }
 0x724   :  { %6270 = vmatmul.mubr.msk.bf16.vlgmr.msra.gmra.mrb[32].mxu1 %vm405_vm1, %v8070_v61 }
 0x725   :  { %6273 = vmatprep.mubr.msk.bf16.mxu1 %vm405_vm1, %v8077_v63 }
 0x72c   :  { %6274 = vmatmul.mubr.msk.bf16.gmra.mrb[36].mxu1 %vm405_vm1, %v8084_v0 }
 0x72d   :  { %6277 = vmatprep.mubr.msk.bf16.mxu1 %vm405_vm1, %v8091_v2 }
 0x734   :  { %6278 = vmatmul.mubr.msk.bf16.gmra.mrb[40].mxu1 %vm405_vm1, %v8173_v31 }
 0x735   :  { %6281 = vmatprep.mubr.msk.bf16.mxu1 %vm405_vm1, %v8180_v34 }
 0x73c   :  { %6282 = vmatmul.mubr.msk.bf16.gmra.mrb[44].mxu1 %vm405_vm1, %v8187_v44 }
 0x73d   :  { %6309 = vmatprep.mubr.msk.bf16.mxu1 %vm405_vm1, %v8104_v6 }
 0x7f7   :  { %v6271_v61 = vpop.f32.mrb[32].mxu1 }
 0x7f8   :  { %1731 = vrot.lane.b32.xlu0 %v6271_v61, %s7704_s27  ;;  %v1648_v63 = vpop.f32.mrb[33].mxu1 }
 0x7f9   :  { %v6272_v0 = vpop.f32.mrb[34].mxu1 }
 0x7fa   :  { %1733 = vrot.lane.b32.xlu1 %v6272_v0, %s7704_s27  ;;  %v1651_v2 = vpop.f32.mrb[35].mxu1 }
 0x7fc   :  { %1727 = vrot.lane.b32.xlu0 %v1648_v63, %s7704_s27 }
 0x7fe   :  { %1729 = vrot.lane.b32.xlu1 %v1651_v2, %s7704_s27 }
 0x7ff   :  { %v6275_v40 = vpop.f32.mrb[36].mxu1 }
 0x800   :  { %v1664_v52 = vpop.f32.mrb[37].mxu1 }
 0x801   :  { %1735 = vrot.lane.b32.xlu0 %v1664_v52, %s7704_s27  ;;  %v6276_v39 = vpop.f32.mrb[38].mxu1 }
 0x802   :  { %v1667_v29 = vpop.f32.mrb[39].mxu1 }
 0x803   :  { %1737 = vrot.lane.b32.xlu1 %v1667_v29, %s7704_s27 }
 0x805   :  { %1739 = vrot.lane.b32.xlu0 %v6275_v40, %s7704_s27 }
 0x807   :  { %1741 = vrot.lane.b32.xlu1 %v6276_v39, %s7704_s27  ;;  %v6279_v6 = vpop.f32.mrb[40].mxu1 }
 0x808   :  { %v1680_v37 = vpop.f32.mrb[41].mxu1 }
 0x809   :  { %1747 = vrot.lane.b32.xlu0 %v6279_v6, %s7704_s27  ;;  %v6280_v28 = vpop.f32.mrb[42].mxu1 }
 0x80a   :  { %v1683_v41 = vpop.f32.mrb[43].mxu1 }
 0x80b   :  { %1749 = vrot.lane.b32.xlu1 %v6280_v28, %s7704_s27 }
 0x80d   :  { %1743 = vrot.lane.b32.xlu0 %v1680_v37, %s7704_s27 }
 0x80f   :  { %1745 = vrot.lane.b32.xlu1 %v1683_v41, %s7704_s27  ;;  %v6283_v56 = vpop.f32.mrb[44].mxu1 }
 0x810   :  { %v1696_v43 = vpop.f32.mrb[45].mxu1 }
 0x811   :  { %1751 = vrot.lane.b32.xlu0 %v1696_v43, %s7704_s27  ;;  %v6284_v50 = vpop.f32.mrb[46].mxu1 }
 0x812   :  { %v1699_v51 = vpop.f32.mrb[47].mxu1 }
 0x813   :  { %1753 = vrot.lane.b32.xlu1 %v1699_v51, %s7704_s27 }
 0x815   :  { %1755 = vrot.lane.b32.xlu0 %v6283_v56, %s7704_s27 }
 0x817   :  { %1757 = vrot.lane.b32.xlu1 %v6284_v50, %s7704_s27 }
 0x819   :  { %1871 = vrot.lane.b32.xlu0 %v8262_v10, %s7698_s3 }
 0x81b   :  { %1873 = vrot.lane.b32.xlu1 %v8265_v62, %s7698_s3 }
 0x81d   :  { %1875 = vrot.lane.b32.xlu0 %v8268_v38, %s7698_s3 }
 0x81f   :  { %1877 = vrot.lane.b32.xlu1 %v8271_v8, %s7698_s3 }
 0x86a   :  { %v1732_v48 = vpop.permute.xlu0 %1731 }
 0x86b   :  { %v1777_v53 = vadd.f32 %v1732_v48, %v8217_v14 }
 0x86c   :  { %v1734_v54 = vpop.permute.xlu1 %1733 }
 0x86d   :  { %v5734_v55 = vmul.f32 -1.442695, %v1777_v53  ;;  %v1778_v59 = vadd.f32 %v1734_v54, %v8220_v5  ;;  %v8329_v53 = vld [vmem:[#allocation2 + $0x68] sm:$0xff] }
 0x86e   :  { %v1728_v7 = vpop.permute.xlu0 %1727 }
 0x86f   :  { %6840 = vpow2.f32 %v5734_v55  ;;  %v5735_v11 = vmul.f32 -1.442695, %v1778_v59  ;;  %v1775_v10 = vadd.f32 %v1728_v7, %v8223_v21 }
 0x870   :  { %v1730_v16 = vpop.permute.xlu1 %1729 }
 0x871   :  { %6842 = vpow2.f32 %v5735_v11  ;;  %v5732_v62 = vmul.f32 -1.442695, %v1775_v10  ;;  %v1776_v38 = vadd.f32 %v1730_v16, %v8226_v42 }
 0x873   :  { %6844 = vpow2.f32 %v5732_v62  ;;  %v5733_v18 = vmul.f32 -1.442695, %v1776_v38  ;;  %v1736_v8 = vpop.permute.xlu0 %1735 }
 0x874   :  { %v1779_v60 = vadd.f32 %v1736_v8, %v8229_v49 }
 0x875   :  { %6846 = vpow2.f32 %v5733_v18  ;;  %v1738_v12 = vpop.permute.xlu1 %1737 }
 0x876   :  { %v5736_v13 = vmul.f32 -1.442695, %v1779_v60  ;;  %v1780_v17 = vadd.f32 %v1738_v12, %v8232_v33 }
 0x877   :  { %v1740_v19 = vpop.permute.xlu0 %1739 }
 0x878   :  { %6848 = vpow2.f32 %v5736_v13  ;;  %v5737_v20 = vmul.f32 -1.442695, %v1780_v17  ;;  %v1781_v9 = vadd.f32 %v1740_v19, %v8235_v23 }
 0x879   :  { %v6841_v15 = vpop.eup %6840  ;;  %v1742_v22 = vpop.permute.xlu1 %1741 }
 0x87a   :  { %v1805_v24 = vadd.f32 1.0, %v6841_v15  ;;  %6850 = vpow2.f32 %v5737_v20  ;;  %v5738_v25 = vmul.f32 -1.442695, %v1781_v9  ;;  %v1782_v30 = vadd.f32 %v1742_v22, %v8238_v1 }
 0x87b   :  { %v6843_v57 = vpop.eup %6842  ;;  %v1748_v35 = vpop.permute.xlu0 %1747 }
 0x87c   :  { %v1806_v26 = vadd.f32 1.0, %v6843_v57  ;;  %v5739_v36 = vmul.f32 -1.442695, %v1782_v30  ;;  %6852 = vpow2.f32 %v5738_v25  ;;  %v1785_v2 = vadd.f32 %v1748_v35, %v8241_v27 }
 0x87d   :  { %v6845_v61 = vpop.eup %6844  ;;  %v1750_v63 = vpop.permute.xlu1 %1749  ;;  %6854 = vrcp.f32 %v1805_v24 }
 0x87e   :  { %v1803_v0 = vadd.f32 1.0, %v6845_v61  ;;  %6856 = vpow2.f32 %v5739_v36  ;;  %v1786_v48 = vadd.f32 %v1750_v63, %v8252_v47 }
 0x87f   :  { %v6847_v40 = vpop.eup %6846  ;;  %v1744_v52 = vpop.permute.xlu0 %1743  ;;  %6858 = vrcp.f32 %v1806_v26 }
 0x880   :  { %v1804_v39 = vadd.f32 1.0, %v6847_v40  ;;  %v1783_v29 = vadd.f32 %v1744_v52, %v8244_v32  ;;  %6860 = vrcp.f32 %v1803_v0 }
 0x881   :  { %v1746_v6 = vpop.permute.xlu1 %1745  ;;  %6862 = vtanh.f32 %v1785_v2 }
 0x882   :  { %v6849_v37 = vpop.eup %6848  ;;  %v1784_v28 = vadd.f32 %v1746_v6, %v8247_v4  ;;  %6864 = vrcp.f32 %v1804_v39 }
 0x883   :  { %v1827_v41 = vadd.f32 1.0, %v6849_v37  ;;  %v1752_v56 = vpop.permute.xlu0 %1751  ;;  %6866 = vtanh.f32 %v1783_v29 }
 0x884   :  { %v6851_v43 = vpop.eup %6850  ;;  %v1787_v50 = vadd.f32 %v1752_v56, %v8250_v46 }
 0x885   :  { %6868 = vrcp.f32 %v1827_v41  ;;  %v1828_v51 = vadd.f32 1.0, %v6851_v43  ;;  %v1754_v54 = vpop.permute.xlu1 %1753 }
 0x886   :  { %6870 = vtanh.f32 %v1784_v28  ;;  %v5740_v55 = vmul.f32 -1.442695, %v1787_v50  ;;  %v1788_v59 = vadd.f32 %v1754_v54, %v8329_v53  ;;  %v6853_v7 = vpop.eup %6852 }
 0x887   :  { %6872 = vrcp.f32 %v1828_v51  ;;  %v1756_v11 = vpop.permute.xlu0 %1755  ;;  %v6855_v10 = vpop.eup %6854  ;;  %v1829_v16 = vadd.f32 1.0, %v6853_v7 }
 0x888   :  { %6874 = vpow2.f32 %v5740_v55  ;;  %v5741_v62 = vmul.f32 -1.442695, %v1788_v59  ;;  %v1789_v38 = vadd.f32 %v1756_v11, %v8256_v58  ;;  %v6857_v18 = vpop.eup %6856 }
 0x889   :  { %6876 = vtanh.f32 %v1786_v48  ;;  %v1758_v8 = vpop.permute.xlu1 %1757  ;;  %v6859_v60 = vpop.eup %6858  ;;  %v1830_v12 = vadd.f32 1.0, %v6857_v18 }
 0x88a   :  { %6878 = vrcp.f32 %v1829_v16  ;;  %v5742_v13 = vmul.f32 -1.442695, %v1789_v38  ;;  %v1790_v17 = vadd.f32 %v1758_v8, %v8259_v45  ;;  %v6861_v19 = vpop.eup %6860 }
 0x88b   :  { %6880 = vpow2.f32 %v5741_v62  ;;  %v6863_v20 = vpop.eup %6862  ;;  %v1872_v24 = vpop.permute.xlu0 %1871 }
 0x88c   :  { %6882 = vrcp.f32 %v1830_v12  ;;  %v5743_v9 = vmul.f32 -1.442695, %v1790_v17  ;;  %v6865_v15 = vpop.eup %6864  ;;  %v1889_v28 = vmul.f32 %v6863_v20, %v6855_v10 }
 0x88d   :  { %6884 = vpow2.f32 %v5742_v13  ;;  %v6867_v22 = vpop.eup %6866  ;;  %v1874_v26 = vpop.permute.xlu1 %1873 }
 0x88e   :  { %6886 = vpow2.f32 %v5743_v9  ;;  %v1887_v57 = vmul.f32 %v6867_v22, %v6861_v19 }
 0x88f   :  { %v6869_v25 = vpop.eup %6868  ;;  %v1876_v6 = vpop.permute.xlu0 %1875 }
 0x890   :  { %v6871_v30 = vpop.eup %6870  ;;  %v1883_v35 = vmul.f32 %v6869_v25, %v1872_v24 }
 0x891   :  { %v6873_v36 = vpop.eup %6872  ;;  %v1888_v0 = vmul.f32 %v6871_v30, %v6865_v15  ;;  %v1878_v50 = vpop.permute.xlu1 %1877  ;;  %v8351_v30 = vld [vmem:[%s9503_s2 + $0x8] sm:$0xff]  }
 0x892   :  { %v6875_v61 = vpop.eup %6874  ;;  %v8334_v63 = vadd.f32 %v1887_v57, %v1883_v35  ;;  %v1884_v2 = vmul.f32 %v6873_v36, %v1874_v26  ;;  %v8358_v57 = vld [vmem:[%s9503_s2 + $0x10] sm:$0xff]   ;;  %v8365_v35 = vld [vmem:[%s9503_s2 + $0x18] sm:$0xff]   ;;  %v8372_v26 = vld [vmem:[%s9503_s2 + $0x20] sm:$0xff]  }
 0x893   :  { %v6877_v40 = vpop.eup %6876  ;;  %v1855_v52 = vadd.f32 1.0, %v6875_v61  ;;  %v7621_v36 = vld [vmem:[%s9503_s2] sm:$0xff]  }
 0x894   :  { %v6879_v39 = vpop.eup %6878  ;;  %6888 = vtanh.f32 %v8334_v63  ;;  %v8337_v29 = vadd.f32 %v1888_v0, %v1884_v2  ;;  %v1890_v54 = vmul.f32 %v6877_v40, %v6859_v60 }
 0x895   :  { %v6881_v37 = vpop.eup %6880  ;;  %6890 = vrcp.f32 %v1855_v52  ;;  %v1885_v41 = vmul.f32 %v6879_v39, %v1876_v6 }
 0x896   :  { %v6883_v56 = vpop.eup %6882  ;;  %v1856_v43 = vadd.f32 1.0, %v6881_v37  ;;  %6892 = vtanh.f32 %v8337_v29 }
 0x897   :  { %v6885_v51 = vpop.eup %6884  ;;  %v8340_v48 = vadd.f32 %v1889_v28, %v1885_v41  ;;  %v1886_v55 = vmul.f32 %v6883_v56, %v1878_v50 }
 0x898   :  { %v6887_v59 = vpop.eup %6886  ;;  %6894 = vrcp.f32 %v1856_v43  ;;  %v1857_v7 = vadd.f32 1.0, %v6885_v51 }
 0x899   :  { %v1858_v11 = vadd.f32 1.0, %v6887_v59  ;;  %6896 = vtanh.f32 %v8340_v48  ;;  %v8343_v16 = vadd.f32 %v1890_v54, %v1886_v55 }
 0x89a   :  { %6898 = vrcp.f32 %v1857_v7 }
 0x89b   :  { %6900 = vrcp.f32 %v1858_v11 }
 0x89c   :  { %6902 = vtanh.f32 %v8343_v16 }
 0x89e   :  { %v6889_v10 = vpop.eup %6888 }
 0x89f   :  { %v6891_v62 = vpop.eup %6890 }
 0x8a0   :  { %v6893_v38 = vpop.eup %6892  ;;  %v1899_v12 = vmul.f32 %v6891_v62, %v6889_v10 }
 0x8a2   :  { %v6895_v18 = vpop.eup %6894 }
 0x8a3   :  { %v6897_v8 = vpop.eup %6896  ;;  %v1900_v60 = vmul.f32 %v6895_v18, %v6893_v38 }
 0x8a4   :  { %v6899_v13 = vpop.eup %6898 }
 0x8a5   :  { %v6901_v17 = vpop.eup %6900  ;;  %v1903_v19 = vpack.c.bf16 %v1900_v60, %v1899_v12  ;;  %v1901_v9 = vmul.f32 %v6899_v13, %v6897_v8 }
 0x8a6   :  { %v6903_v20 = vpop.eup %6902 }
 0x8a7   :  { %1926 = vrot.lane.b32.xlu0 %v1903_v19, %s7705_s28  ;;  %1906 = vst.msk [vmem:[#allocation3] sm:$0xff] %vm1905_vm7, %v1903_v19  ;;  %v1902_v15 = vmul.f32 %v6903_v20, %v6901_v17 }
 0x8a9   :  { %v1904_v22 = vpack.c.bf16 %v1902_v15, %v1901_v9 }
 0x8ab   :  { %1928 = vrot.lane.b32.xlu1 %v1904_v22, %s7705_s28  ;;  %1907 = vst.msk [vmem:[#allocation3 + $0x8] sm:$0xff] %vm1905_vm7, %v1904_v22 }
 0x919   :  { %v1927_v24 = vpop.permute.xlu0 %1926 }
 0x91a   :  { %6285 = vmatprep.subr.bf16.mxu0 %v1927_v24 }
 0x91b   :  { %6286 = vmatpush3.bf16.msra.mxu0 %v1927_v24 }
 0x91d   :  { %v1929_v25 = vpop.permute.xlu1 %1928 }
 0x91e   :  { %6287 = vmatprep.subr.bf16.mxu0 %v1929_v25 }
 0x91f   :  { %6288 = vmatpush3.bf16.msra.mxu0 %v1929_v25 }
 0x922   :  { %6290 = vmatmul.mubr.msk.bf16.vlgmr.msra.gmra.mrb[48].mxu0 %vm405_vm1, %v8351_v30 }
 0x923   :  { %6293 = vmatprep.mubr.msk.bf16.mxu0 %vm405_vm1, %v8358_v57 }
 0x92a   :  { %6294 = vmatmul.mubr.msk.bf16.gmra.mrb[52].mxu0 %vm405_vm1, %v8365_v35 }
 0x92b   :  { %6297 = vmatprep.mubr.msk.bf16.mxu0 %vm405_vm1, %v8372_v26 }
 0x932   :  { %6298 = vmatmul.mubr.msk.bf16.gmra.mrb[56].mxu0 %vm405_vm1, %v8173_v31 }
 0x933   :  { %6301 = vmatprep.mubr.msk.bf16.mxu0 %vm405_vm1, %v8180_v34 }
 0x93a   :  { %6302 = vmatmul.mubr.msk.bf16.gmra.mrb[60].mxu0 %vm405_vm1, %v8187_v44 }
 0x93b   :  { %6329 = vmatprep.mubr.msk.bf16.mxu0 %vm405_vm1, %v7621_v36 }
 0x9f5   :  { %v6291_v61 = vpop.f32.mrb[48].mxu0 }
 0x9f6   :  { %2049 = vrot.lane.b32.xlu0 %v6291_v61, %s7706_s19  ;;  %v1966_v0 = vpop.f32.mrb[49].mxu0 }
 0x9f7   :  { %v6292_v2 = vpop.f32.mrb[50].mxu0 }
 0x9f8   :  { %2051 = vrot.lane.b32.xlu1 %v6292_v2, %s7706_s19  ;;  %v1969_v31 = vpop.f32.mrb[51].mxu0 }
 0x9fa   :  { %2045 = vrot.lane.b32.xlu0 %v1966_v0, %s7706_s19 }
 0x9fc   :  { %2047 = vrot.lane.b32.xlu1 %v1969_v31, %s7706_s19 }
 0x9fd   :  { %v6295_v34 = vpop.f32.mrb[52].mxu0 }
 0x9fe   :  { %v1982_v44 = vpop.f32.mrb[53].mxu0 }
 0x9ff   :  { %2053 = vrot.lane.b32.xlu0 %v1982_v44, %s7706_s19  ;;  %v6296_v40 = vpop.f32.mrb[54].mxu0 }
 0xa00   :  { %v1985_v52 = vpop.f32.mrb[55].mxu0 }
 0xa01   :  { %2055 = vrot.lane.b32.xlu1 %v1985_v52, %s7706_s19 }
 0xa03   :  { %2057 = vrot.lane.b32.xlu0 %v6295_v34, %s7706_s19 }
 0xa05   :  { %2059 = vrot.lane.b32.xlu1 %v6296_v40, %s7706_s19  ;;  %v6299_v39 = vpop.f32.mrb[56].mxu0 }
 0xa06   :  { %v1998_v6 = vpop.f32.mrb[57].mxu0 }
 0xa07   :  { %2065 = vrot.lane.b32.xlu0 %v6299_v39, %s7706_s19  ;;  %v6300_v37 = vpop.f32.mrb[58].mxu0 }
 0xa08   :  { %v2001_v28 = vpop.f32.mrb[59].mxu0 }
 0xa09   :  { %2067 = vrot.lane.b32.xlu1 %v6300_v37, %s7706_s19 }
 0xa0b   :  { %2061 = vrot.lane.b32.xlu0 %v1998_v6, %s7706_s19 }
 0xa0d   :  { %2063 = vrot.lane.b32.xlu1 %v2001_v28, %s7706_s19  ;;  %v6303_v41 = vpop.f32.mrb[60].mxu0 }
 0xa0e   :  { %v2014_v56 = vpop.f32.mrb[61].mxu0 }
 0xa0f   :  { %2069 = vrot.lane.b32.xlu0 %v2014_v56, %s7706_s19  ;;  %v6304_v43 = vpop.f32.mrb[62].mxu0 }
 0xa10   :  { %v2017_v50 = vpop.f32.mrb[63].mxu0 }
 0xa11   :  { %2071 = vrot.lane.b32.xlu1 %v2017_v50, %s7706_s19 }
 0xa13   :  { %2073 = vrot.lane.b32.xlu0 %v6303_v41, %s7706_s19 }
 0xa15   :  { %2075 = vrot.lane.b32.xlu1 %v6304_v43, %s7706_s19 }
 0xa17   :  { %2189 = vrot.lane.b32.xlu0 %v8334_v63, %s7698_s3 }
 0xa19   :  { %2191 = vrot.lane.b32.xlu1 %v8337_v29, %s7698_s3 }
 0xa1b   :  { %2193 = vrot.lane.b32.xlu0 %v8340_v48, %s7698_s3 }
 0xa1d   :  { %2195 = vrot.lane.b32.xlu1 %v8343_v16, %s7698_s3 }
 0xa68   :  { %v2050_v51 = vpop.permute.xlu0 %2049 }
 0xa69   :  { %v2095_v54 = vadd.f32 %v2050_v51, %v8217_v14 }
 0xa6a   :  { %v2052_v55 = vpop.permute.xlu1 %2051 }
 0xa6b   :  { %v5754_v59 = vmul.f32 -1.442695, %v2095_v54  ;;  %v2096_v7 = vadd.f32 %v2052_v55, %v8220_v5 }
 0xa6c   :  { %v2046_v11 = vpop.permute.xlu0 %2045 }
 0xa6d   :  { %6904 = vpow2.f32 %v5754_v59  ;;  %v5755_v10 = vmul.f32 -1.442695, %v2096_v7  ;;  %v2093_v63 = vadd.f32 %v2046_v11, %v8223_v21 }
 0xa6e   :  { %v2048_v62 = vpop.permute.xlu1 %2047 }
 0xa6f   :  { %6906 = vpow2.f32 %v5755_v10  ;;  %v5752_v29 = vmul.f32 -1.442695, %v2093_v63  ;;  %v2094_v48 = vadd.f32 %v2048_v62, %v8226_v42 }
 0xa71   :  { %6908 = vpow2.f32 %v5752_v29  ;;  %v5753_v38 = vmul.f32 -1.442695, %v2094_v48  ;;  %v2054_v16 = vpop.permute.xlu0 %2053 }
 0xa72   :  { %v2097_v18 = vadd.f32 %v2054_v16, %v8229_v49 }
 0xa73   :  { %6910 = vpow2.f32 %v5753_v38  ;;  %v2056_v14 = vpop.permute.xlu1 %2055 }
 0xa74   :  { %v5756_v8 = vmul.f32 -1.442695, %v2097_v18  ;;  %v2098_v5 = vadd.f32 %v2056_v14, %v8232_v33 }
 0xa75   :  { %v2058_v12 = vpop.permute.xlu0 %2057 }
 0xa76   :  { %6912 = vpow2.f32 %v5756_v8  ;;  %v5757_v60 = vmul.f32 -1.442695, %v2098_v5  ;;  %v2099_v21 = vadd.f32 %v2058_v12, %v8235_v23 }
 0xa77   :  { %v6905_v13 = vpop.eup %6904  ;;  %v2060_v17 = vpop.permute.xlu1 %2059 }
 0xa78   :  { %v2123_v19 = vadd.f32 1.0, %v6905_v13  ;;  %6914 = vpow2.f32 %v5757_v60  ;;  %v5758_v42 = vmul.f32 -1.442695, %v2099_v21  ;;  %v2100_v20 = vadd.f32 %v2060_v17, %v8238_v1 }
 0xa79   :  { %v6907_v9 = vpop.eup %6906  ;;  %v2066_v15 = vpop.permute.xlu0 %2065 }
 0xa7a   :  { %v2124_v49 = vadd.f32 1.0, %v6907_v9  ;;  %v5759_v22 = vmul.f32 -1.442695, %v2100_v20  ;;  %6916 = vpow2.f32 %v5758_v42  ;;  %v2103_v36 = vadd.f32 %v2066_v15, %v8241_v27 }
 0xa7b   :  { %v6909_v24 = vpop.eup %6908  ;;  %v2068_v25 = vpop.permute.xlu1 %2067  ;;  %6918 = vrcp.f32 %v2123_v19 }
 0xa7c   :  { %v2121_v33 = vadd.f32 1.0, %v6909_v24  ;;  %6920 = vpow2.f32 %v5759_v22  ;;  %v2104_v6 = vadd.f32 %v2068_v25, %v8252_v47 }
 0xa7d   :  { %v6911_v61 = vpop.eup %6910  ;;  %v2062_v23 = vpop.permute.xlu0 %2061  ;;  %6922 = vrcp.f32 %v2124_v49 }
 0xa7e   :  { %v2122_v0 = vadd.f32 1.0, %v6911_v61  ;;  %v2101_v2 = vadd.f32 %v2062_v23, %v8244_v32  ;;  %6924 = vrcp.f32 %v2121_v33 }
 0xa7f   :  { %v2064_v1 = vpop.permute.xlu1 %2063  ;;  %6926 = vtanh.f32 %v2103_v36 }
 0xa80   :  { %v6913_v31 = vpop.eup %6912  ;;  %v2102_v34 = vadd.f32 %v2064_v1, %v8247_v4  ;;  %6928 = vrcp.f32 %v2122_v0 }
 0xa81   :  { %v2145_v44 = vadd.f32 1.0, %v6913_v31  ;;  %v2070_v40 = vpop.permute.xlu0 %2069  ;;  %6930 = vtanh.f32 %v2101_v2 }
 0xa82   :  { %v6915_v52 = vpop.eup %6914  ;;  %v2105_v27 = vadd.f32 %v2070_v40, %v8250_v46 }
 0xa83   :  { %6932 = vrcp.f32 %v2145_v44  ;;  %v2146_v39 = vadd.f32 1.0, %v6915_v52  ;;  %v2072_v37 = vpop.permute.xlu1 %2071 }
 0xa84   :  { %6934 = vtanh.f32 %v2102_v34  ;;  %v5760_v32 = vmul.f32 -1.442695, %v2105_v27  ;;  %v2106_v28 = vadd.f32 %v2072_v37, %v8329_v53  ;;  %v6917_v41 = vpop.eup %6916 }
 0xa85   :  { %6936 = vrcp.f32 %v2146_v39  ;;  %v2074_v56 = vpop.permute.xlu0 %2073  ;;  %v6919_v4 = vpop.eup %6918  ;;  %v2147_v43 = vadd.f32 1.0, %v6917_v41 }
 0xa86   :  { %6938 = vpow2.f32 %v5760_v32  ;;  %v5761_v50 = vmul.f32 -1.442695, %v2106_v28  ;;  %v2107_v51 = vadd.f32 %v2074_v56, %v8256_v58  ;;  %v6921_v54 = vpop.eup %6920 }
 0xa87   :  { %6940 = vtanh.f32 %v2104_v6  ;;  %v2076_v46 = vpop.permute.xlu1 %2075  ;;  %v6923_v55 = vpop.eup %6922  ;;  %v2148_v47 = vadd.f32 1.0, %v6921_v54  ;;  %v8458_v54 = vld [vmem:[%s9503_s2 + $0x30] sm:$0xff]  }
 0xa88   :  { %6942 = vrcp.f32 %v2147_v43  ;;  %v5762_v59 = vmul.f32 -1.442695, %v2107_v51  ;;  %v2108_v7 = vadd.f32 %v2076_v46, %v8259_v45  ;;  %v6925_v11 = vpop.eup %6924  ;;  %v8451_v51 = vld [vmem:[%s9503_s2 + $0x28] sm:$0xff]   ;;  %v8465_v46 = vld [vmem:[%s9503_s2 + $0x38] sm:$0xff]   ;;  %s7709_s2 = smov 80  }
 0xa89   :  { %6944 = vpow2.f32 %v5761_v50  ;;  %v6927_v10 = vpop.eup %6926  ;;  %v2190_v48 = vpop.permute.xlu0 %2189 }
 0xa8a   :  { %6946 = vrcp.f32 %v2148_v47  ;;  %v5763_v63 = vmul.f32 -1.442695, %v2108_v7  ;;  %v6929_v62 = vpop.eup %6928  ;;  %v2207_v9 = vmul.f32 %v6927_v10, %v6919_v4 }
 0xa8b   :  { %6948 = vpow2.f32 %v5762_v59  ;;  %v6931_v29 = vpop.eup %6930  ;;  %v2192_v14 = vpop.permute.xlu1 %2191 }
 0xa8c   :  { %6950 = vpow2.f32 %v5763_v63  ;;  %v2205_v16 = vmul.f32 %v6931_v29, %v6925_v11 }
 0xa8d   :  { %v6933_v58 = vpop.eup %6932  ;;  %v2194_v42 = vpop.permute.xlu0 %2193 }
 0xa8e   :  { %v6935_v38 = vpop.eup %6934  ;;  %v2201_v18 = vmul.f32 %v6933_v58, %v2190_v48 }
 0xa8f   :  { %v6937_v8 = vpop.eup %6936  ;;  %v2206_v45 = vmul.f32 %v6935_v38, %v6929_v62  ;;  %v2196_v24 = vpop.permute.xlu1 %2195 }
 0xa90   :  { %v6939_v5 = vpop.eup %6938  ;;  %v8426_v12 = vadd.f32 %v2205_v16, %v2201_v18  ;;  %v2202_v60 = vmul.f32 %v6937_v8, %v2192_v14 }
 0xa91   :  { %v6941_v21 = vpop.eup %6940  ;;  %v2173_v13 = vadd.f32 1.0, %v6939_v5  ;;  %v8493_v5 = vld [vmem:[#allocation2 + $0x10] sm:$0xff] }
 0xa92   :  { %v6943_v17 = vpop.eup %6942  ;;  %6952 = vtanh.f32 %v8426_v12  ;;  %v8429_v19 = vadd.f32 %v2206_v45, %v2202_v60  ;;  %v2208_v36 = vmul.f32 %v6941_v21, %v6923_v55  ;;  %v8496_v21 = vld [vmem:[#allocation2 + $0x18] sm:$0xff] }
 0xa93   :  { %v6945_v20 = vpop.eup %6944  ;;  %6954 = vrcp.f32 %v2173_v13  ;;  %v2203_v15 = vmul.f32 %v6943_v17, %v2194_v42  ;;  %v8499_v42 = vld [vmem:[#allocation2] sm:$0xff] }
 0xa94   :  { %v6947_v49 = vpop.eup %6946  ;;  %v2174_v22 = vadd.f32 1.0, %v6945_v20  ;;  %6956 = vtanh.f32 %v8429_v19 }
 0xa95   :  { %v6949_v25 = vpop.eup %6948  ;;  %v8432_v33 = vadd.f32 %v2207_v9, %v2203_v15  ;;  %v2204_v61 = vmul.f32 %v6947_v49, %v2196_v24  ;;  %v8502_v15 = vld [vmem:[#allocation2 + $0x8] sm:$0xff] }
 0xa96   :  { %v6951_v23 = vpop.eup %6950  ;;  %6958 = vrcp.f32 %v2174_v22  ;;  %v2175_v0 = vadd.f32 1.0, %v6949_v25 }
 0xa97   :  { %v2176_v2 = vadd.f32 1.0, %v6951_v23  ;;  %6960 = vtanh.f32 %v8432_v33  ;;  %v8435_v1 = vadd.f32 %v2208_v36, %v2204_v61  ;;  %v8508_v23 = vld [vmem:[#allocation2 + $0x28] sm:$0xff] }
 0xa98   :  { %6962 = vrcp.f32 %v2175_v0 }
 0xa99   :  { %6964 = vrcp.f32 %v2176_v2 }
 0xa9a   :  { %6966 = vtanh.f32 %v8435_v1 }
 0xa9c   :  { %v6953_v31 = vpop.eup %6952 }
 0xa9d   :  { %v6955_v34 = vpop.eup %6954 }
 0xa9e   :  { %v6957_v44 = vpop.eup %6956  ;;  %v2217_v27 = vmul.f32 %v6955_v34, %v6953_v31  ;;  %v8511_v31 = vld [vmem:[#allocation2 + $0x30] sm:$0xff] }
 0xaa0   :  { %v6959_v40 = vpop.eup %6958 }
 0xaa1   :  { %v6961_v52 = vpop.eup %6960  ;;  %v2218_v39 = vmul.f32 %v6959_v40, %v6957_v44 }
 0xaa2   :  { %v6963_v6 = vpop.eup %6962 }
 0xaa3   :  { %v6965_v37 = vpop.eup %6964  ;;  %v2221_v32 = vpack.c.bf16 %v2218_v39, %v2217_v27  ;;  %v2219_v41 = vmul.f32 %v6963_v6, %v6961_v52  ;;  %v8514_v27 = vld [vmem:[#allocation2 + $0x38] sm:$0xff] }
 0xaa4   :  { %v6967_v28 = vpop.eup %6966 }
 0xaa5   :  { %2244 = vrot.lane.b32.xlu0 %v2221_v32, %s7707_s20  ;;  %2224 = vst.msk [vmem:[#allocation3] sm:$0xff] %vm2223_vm8, %v2221_v32  ;;  %v2220_v56 = vmul.f32 %v6967_v28, %v6965_v37 }
 0xaa7   :  { %v2222_v4 = vpack.c.bf16 %v2220_v56, %v2219_v41 }
 0xaa9   :  { %2246 = vrot.lane.b32.xlu1 %v2222_v4, %s7707_s20  ;;  %2225 = vst.msk [vmem:[#allocation3 + $0x8] sm:$0xff] %vm2223_vm8, %v2222_v4 }
 0xb17   :  { %v2245_v43 = vpop.permute.xlu0 %2244 }
 0xb18   :  { %6305 = vmatprep.subr.bf16.mxu1 %v2245_v43 }
 0xb19   :  { %6306 = vmatpush3.bf16.msra.mxu1 %v2245_v43 }
 0xb1b   :  { %v2247_v50 = vpop.permute.xlu1 %2246 }
 0xb1c   :  { %6307 = vmatprep.subr.bf16.mxu1 %v2247_v50 }
 0xb1d   :  { %6308 = vmatpush3.bf16.msra.mxu1 %v2247_v50  ;;  %v8517_v50 = vld [vmem:[#allocation2 + $0x50] sm:$0xff] }
 0xb20   :  { %6310 = vmatmul.mubr.msk.bf16.vlgmr.msra.gmra.mrb[48].mxu1 %vm405_vm1, %v8351_v30 }
 0xb21   :  { %6313 = vmatprep.mubr.msk.bf16.mxu1 %vm405_vm1, %v8358_v57 }
 0xb28   :  { %6314 = vmatmul.mubr.msk.bf16.gmra.mrb[52].mxu1 %vm405_vm1, %v8365_v35 }
 0xb29   :  { %6317 = vmatprep.mubr.msk.bf16.mxu1 %vm405_vm1, %v8372_v26 }
 0xb30   :  { %6318 = vmatmul.mubr.msk.bf16.gmra.mrb[56].mxu1 %vm405_vm1, %v8451_v51 }
 0xb31   :  { %6321 = vmatprep.mubr.msk.bf16.mxu1 %vm405_vm1, %v8458_v54 }
 0xb38   :  { %6322 = vmatmul.mubr.msk.bf16.gmra.mrb[60].mxu1 %vm405_vm1, %v8465_v46 }
 0xbf3   :  { %v6311_v55 = vpop.f32.mrb[48].mxu1 }
 0xbf4   :  { %2367 = vrot.lane.b32.xlu0 %v6311_v55, %s7708_s11  ;;  %v2284_v47 = vpop.f32.mrb[49].mxu1 }
 0xbf5   :  { %v6312_v59 = vpop.f32.mrb[50].mxu1 }
 0xbf6   :  { %2369 = vrot.lane.b32.xlu1 %v6312_v59, %s7708_s11  ;;  %v2287_v7 = vpop.f32.mrb[51].mxu1 }
 0xbf8   :  { %2363 = vrot.lane.b32.xlu0 %v2284_v47, %s7708_s11 }
 0xbfa   :  { %2365 = vrot.lane.b32.xlu1 %v2287_v7, %s7708_s11 }
 0xbfb   :  { %v6315_v11 = vpop.f32.mrb[52].mxu1 }
 0xbfc   :  { %v2300_v10 = vpop.f32.mrb[53].mxu1 }
 0xbfd   :  { %2371 = vrot.lane.b32.xlu0 %v2300_v10, %s7708_s11  ;;  %v6316_v63 = vpop.f32.mrb[54].mxu1 }
 0xbfe   :  { %v2303_v62 = vpop.f32.mrb[55].mxu1 }
 0xbff   :  { %2373 = vrot.lane.b32.xlu1 %v2303_v62, %s7708_s11 }
 0xc01   :  { %2375 = vrot.lane.b32.xlu0 %v6315_v11, %s7708_s11  ;;  %v8520_v11 = vld [vmem:[#allocation2 + $0x40] sm:$0xff] }
 0xc03   :  { %2377 = vrot.lane.b32.xlu1 %v6316_v63, %s7708_s11  ;;  %v6319_v29 = vpop.f32.mrb[56].mxu1 }
 0xc04   :  { %v2316_v48 = vpop.f32.mrb[57].mxu1 }
 0xc05   :  { %2383 = vrot.lane.b32.xlu0 %v6319_v29, %s7708_s11  ;;  %v6320_v58 = vpop.f32.mrb[58].mxu1  ;;  %v8523_v29 = vld [vmem:[#allocation2 + $0x48] sm:$0xff] }
 0xc06   :  { %v2319_v38 = vpop.f32.mrb[59].mxu1 }
 0xc07   :  { %2385 = vrot.lane.b32.xlu1 %v6320_v58, %s7708_s11 }
 0xc09   :  { %2379 = vrot.lane.b32.xlu0 %v2316_v48, %s7708_s11 }
 0xc0b   :  { %2381 = vrot.lane.b32.xlu1 %v2319_v38, %s7708_s11  ;;  %v6323_v16 = vpop.f32.mrb[60].mxu1 }
 0xc0c   :  { %v2332_v18 = vpop.f32.mrb[61].mxu1 }
 0xc0d   :  { %2387 = vrot.lane.b32.xlu0 %v2332_v18, %s7708_s11  ;;  %v6324_v14 = vpop.f32.mrb[62].mxu1  ;;  %v8526_v18 = vld [vmem:[#allocation2 + $0x60] sm:$0xff] }
 0xc0e   :  { %v2335_v8 = vpop.f32.mrb[63].mxu1 }
 0xc0f   :  { %2389 = vrot.lane.b32.xlu1 %v2335_v8, %s7708_s11 }
 0xc11   :  { %2391 = vrot.lane.b32.xlu0 %v6323_v16, %s7708_s11 }
 0xc13   :  { %2393 = vrot.lane.b32.xlu1 %v6324_v14, %s7708_s11 }
 0xc15   :  { %2507 = vrot.lane.b32.xlu0 %v8426_v12, %s7698_s3 }
 0xc17   :  { %2509 = vrot.lane.b32.xlu1 %v8429_v19, %s7698_s3 }
 0xc19   :  { %2511 = vrot.lane.b32.xlu0 %v8432_v33, %s7698_s3  ;;  %v8505_v33 = vld [vmem:[#allocation2 + $0x20] sm:$0xff] }
 0xc1b   :  { %2513 = vrot.lane.b32.xlu1 %v8435_v1, %s7698_s3 }
 0xc66   :  { %v2368_v45 = vpop.permute.xlu0 %2367 }
 0xc67   :  { %v2413_v60 = vadd.f32 %v2368_v45, %v8493_v5  ;;  %v8528_v45 = vld [vmem:[#allocation2 + $0x58] sm:$0xff] }
 0xc68   :  { %v2370_v13 = vpop.permute.xlu1 %2369 }
 0xc69   :  { %v5774_v17 = vmul.f32 -1.442695, %v2413_v60  ;;  %v2414_v12 = vadd.f32 %v2370_v13, %v8496_v21 }
 0xc6a   :  { %v2364_v19 = vpop.permute.xlu0 %2363 }
 0xc6b   :  { %6968 = vpow2.f32 %v5774_v17  ;;  %v5775_v20 = vmul.f32 -1.442695, %v2414_v12  ;;  %v2411_v9 = vadd.f32 %v2364_v19, %v8499_v42 }
 0xc6c   :  { %v2366_v49 = vpop.permute.xlu1 %2365 }
 0xc6d   :  { %6970 = vpow2.f32 %v5775_v20  ;;  %v5772_v22 = vmul.f32 -1.442695, %v2411_v9  ;;  %v2412_v24 = vadd.f32 %v2366_v49, %v8502_v15  ;;  %v8533_v49 = vld [vmem:[#allocation2 + $0x70] sm:$0xff] }
 0xc6f   :  { %6972 = vpow2.f32 %v5772_v22  ;;  %v5773_v25 = vmul.f32 -1.442695, %v2412_v24  ;;  %v2372_v36 = vpop.permute.xlu0 %2371 }
 0xc70   :  { %v2415_v61 = vadd.f32 %v2372_v36, %v8505_v33 }
 0xc71   :  { %6974 = vpow2.f32 %v5773_v25  ;;  %v2374_v0 = vpop.permute.xlu1 %2373 }
 0xc72   :  { %v5776_v2 = vmul.f32 -1.442695, %v2415_v61  ;;  %v2416_v1 = vadd.f32 %v2374_v0, %v8508_v23 }
 0xc73   :  { %v2376_v34 = vpop.permute.xlu0 %2375 }
 0xc74   :  { %6976 = vpow2.f32 %v5776_v2  ;;  %v5777_v44 = vmul.f32 -1.442695, %v2416_v1  ;;  %v2417_v40 = vadd.f32 %v2376_v34, %v8511_v31  ;;  %v8536_v2 = vld [vmem:[#allocation2 + $0x78] sm:$0xff] }
 0xc75   :  { %v6969_v52 = vpop.eup %6968  ;;  %v2378_v39 = vpop.permute.xlu1 %2377 }
 0xc76   :  { %v2441_v6 = vadd.f32 1.0, %v6969_v52  ;;  %6978 = vpow2.f32 %v5777_v44  ;;  %v5778_v37 = vmul.f32 -1.442695, %v2417_v40  ;;  %v2418_v32 = vadd.f32 %v2378_v39, %v8514_v27 }
 0xc77   :  { %v6971_v28 = vpop.eup %6970  ;;  %v2384_v41 = vpop.permute.xlu0 %2383 }
 0xc78   :  { %v2442_v56 = vadd.f32 1.0, %v6971_v28  ;;  %v5779_v4 = vmul.f32 -1.442695, %v2418_v32  ;;  %6980 = vpow2.f32 %v5778_v37  ;;  %v2421_v59 = vadd.f32 %v2384_v41, %v8517_v50 }
 0xc79   :  { %v6973_v43 = vpop.eup %6972  ;;  %v2386_v55 = vpop.permute.xlu1 %2385  ;;  %6982 = vrcp.f32 %v2441_v6 }
 0xc7a   :  { %v2439_v47 = vadd.f32 1.0, %v6973_v43  ;;  %6984 = vpow2.f32 %v5779_v4  ;;  %v2422_v17 = vadd.f32 %v2386_v55, %v8528_v45 }
 0xc7b   :  { %v6975_v7 = vpop.eup %6974  ;;  %v2380_v10 = vpop.permute.xlu0 %2379  ;;  %6986 = vrcp.f32 %v2442_v56 }
 0xc7c   :  { %v2440_v63 = vadd.f32 1.0, %v6975_v7  ;;  %v2419_v62 = vadd.f32 %v2380_v10, %v8520_v11  ;;  %6988 = vrcp.f32 %v2439_v47 }
 0xc7d   :  { %v2382_v48 = vpop.permute.xlu1 %2381  ;;  %6990 = vtanh.f32 %v2421_v59 }
 0xc7e   :  { %v6977_v58 = vpop.eup %6976  ;;  %v2420_v38 = vadd.f32 %v2382_v48, %v8523_v29  ;;  %6992 = vrcp.f32 %v2440_v63 }
 0xc7f   :  { %v2463_v16 = vadd.f32 1.0, %v6977_v58  ;;  %v2388_v14 = vpop.permute.xlu0 %2387  ;;  %6994 = vtanh.f32 %v2419_v62 }
 0xc80   :  { %v6979_v8 = vpop.eup %6978  ;;  %v2423_v60 = vadd.f32 %v2388_v14, %v8526_v18 }
 0xc81   :  { %6996 = vrcp.f32 %v2463_v16  ;;  %v2464_v13 = vadd.f32 1.0, %v6979_v8  ;;  %v2390_v12 = vpop.permute.xlu1 %2389 }
 0xc82   :  { %6998 = vtanh.f32 %v2420_v38  ;;  %v5780_v19 = vmul.f32 -1.442695, %v2423_v60  ;;  %v2424_v20 = vadd.f32 %v2390_v12, %v8329_v53  ;;  %v6981_v9 = vpop.eup %6980 }
 0xc83   :  { %7000 = vrcp.f32 %v2464_v13  ;;  %v2392_v22 = vpop.permute.xlu0 %2391  ;;  %v6983_v24 = vpop.eup %6982  ;;  %v2465_v25 = vadd.f32 1.0, %v6981_v9 }
 0xc84   :  { %7002 = vpow2.f32 %v5780_v19  ;;  %v5781_v36 = vmul.f32 -1.442695, %v2424_v20  ;;  %v2425_v61 = vadd.f32 %v2392_v22, %v8533_v49  ;;  %v6985_v0 = vpop.eup %6984 }
 0xc85   :  { %7004 = vtanh.f32 %v2422_v17  ;;  %v2394_v1 = vpop.permute.xlu1 %2393  ;;  %v6987_v34 = vpop.eup %6986  ;;  %v2466_v44 = vadd.f32 1.0, %v6985_v0 }
 0xc86   :  { %7006 = vrcp.f32 %v2465_v25  ;;  %v5782_v53 = vmul.f32 -1.442695, %v2425_v61  ;;  %v2426_v40 = vadd.f32 %v2394_v1, %v8536_v2  ;;  %v6989_v52 = vpop.eup %6988 }
 0xc87   :  { %7008 = vpow2.f32 %v5781_v36  ;;  %v6991_v39 = vpop.eup %6990  ;;  %v2508_v28 = vpop.permute.xlu0 %2507 }
 0xc88   :  { %7010 = vrcp.f32 %v2466_v44  ;;  %v5783_v6 = vmul.f32 -1.442695, %v2426_v40  ;;  %v6993_v37 = vpop.eup %6992  ;;  %v2525_v8 = vmul.f32 %v6991_v39, %v6983_v24 }
 0xc89   :  { %7012 = vpow2.f32 %v5782_v53  ;;  %v6995_v32 = vpop.eup %6994  ;;  %v2510_v55 = vpop.permute.xlu1 %2509 }
 0xc8a   :  { %7014 = vpow2.f32 %v5783_v6  ;;  %v2523_v4 = vmul.f32 %v6995_v32, %v6989_v52 }
 0xc8b   :  { %v6997_v41 = vpop.eup %6996  ;;  %v2512_v16 = vpop.permute.xlu0 %2511 }
 0xc8c   :  { %v6999_v56 = vpop.eup %6998  ;;  %v2519_v43 = vmul.f32 %v6997_v41, %v2508_v28 }
 0xc8d   :  { %v7001_v47 = vpop.eup %7000  ;;  %v2524_v10 = vmul.f32 %v6999_v56, %v6993_v37  ;;  %v2514_v12 = vpop.permute.xlu1 %2513 }
 0xc8e   :  { %v7003_v59 = vpop.eup %7002  ;;  %v8539_v7 = vadd.f32 %v2523_v4, %v2519_v43  ;;  %v2520_v63 = vmul.f32 %v7001_v47, %v2510_v55 }
 0xc8f   :  { %v7005_v62 = vpop.eup %7004  ;;  %v2491_v48 = vadd.f32 1.0, %v7003_v59 }
 0xc90   :  { %v7007_v58 = vpop.eup %7006  ;;  %7016 = vtanh.f32 %v8539_v7  ;;  %v8542_v38 = vadd.f32 %v2524_v10, %v2520_v63  ;;  %v2526_v9 = vmul.f32 %v7005_v62, %v6987_v34 }
 0xc91   :  { %v7009_v14 = vpop.eup %7008  ;;  %7018 = vrcp.f32 %v2491_v48  ;;  %v2521_v60 = vmul.f32 %v7007_v58, %v2512_v16  ;;  %v2894_v16 = vld [vmem:[%s9507_s6] sm:$0xff] }
 0xc92   :  { %v7011_v13 = vpop.eup %7010  ;;  %v2492_v17 = vadd.f32 1.0, %v7009_v14  ;;  %7020 = vtanh.f32 %v8542_v38  ;;  %v2895_v14 = vld [vmem:[%s9507_s6 + $0x8] sm:$0xff] }
 0xc93   :  { %v7013_v19 = vpop.eup %7012  ;;  %v8545_v20 = vadd.f32 %v2525_v8, %v2521_v60  ;;  %v2522_v22 = vmul.f32 %v7011_v13, %v2514_v12  ;;  %v2896_v8 = vld [vmem:[%s9507_s6 + $0x10] sm:$0xff]  ;;  %v2897_v60 = vld [vmem:[%s9507_s6 + $0x18] sm:$0xff]  ;;  %v2902_v12 = vld [vmem:[%s9507_s6 + $0x40] sm:$0xff] }
 0xc94   :  { %v7015_v25 = vpop.eup %7014  ;;  %7022 = vrcp.f32 %v2492_v17  ;;  %v2493_v36 = vadd.f32 1.0, %v7013_v19  ;;  %v2900_v13 = vld [vmem:[%s9507_s6 + $0x30] sm:$0xff]  ;;  %v2901_v17 = vld [vmem:[%s9507_s6 + $0x38] sm:$0xff]  ;;  %v2903_v19 = vld [vmem:[%s9507_s6 + $0x48] sm:$0xff] }
 0xc95   :  { %v2494_v61 = vadd.f32 1.0, %v7015_v25  ;;  %7024 = vtanh.f32 %v8545_v20  ;;  %v8548_v0 = vadd.f32 %v2526_v9, %v2522_v22  ;;  %v2907_v9 = vld [vmem:[%s9507_s6 + $0x68] sm:$0xff]  ;;  %v6568_v22 = vld [vmem:[%s9505_s4] sm:$0xff]   ;;  %v2904_v25 = vld [vmem:[%s9507_s6 + $0x50] sm:$0xff] }
 0xc96   :  { %7026 = vrcp.f32 %v2493_v36  ;;  %6349 = vmatprep.mubr.msk.bf16.mxu1 %vm405_vm1, %v6568_v22  ;;  %v2905_v36 = vld [vmem:[%s9507_s6 + $0x58] sm:$0xff] }
 0xc97   :  { %7028 = vrcp.f32 %v2494_v61  ;;  %v2908_v61 = vld [vmem:[%s9507_s6 + $0x70] sm:$0xff] }
 0xc98   :  { %7030 = vtanh.f32 %v8548_v0 }
 0xc9a   :  { %v7017_v24 = vpop.eup %7016 }
 0xc9b   :  { %v7019_v1 = vpop.eup %7018 }
 0xc9c   :  { %v7021_v44 = vpop.eup %7020  ;;  %v2535_v52 = vmul.f32 %v7019_v1, %v7017_v24  ;;  %v2909_v24 = vld [vmem:[%s9507_s6 + $0x78] sm:$0xff]  ;;  %v8655_v1 = vld [vmem:[%s9506_s5 + $0x8] sm:$0xff]  }
 0xc9e   :  { %v7023_v53 = vpop.eup %7022 }
 0xc9f   :  { %v7025_v40 = vpop.eup %7024  ;;  %v2536_v34 = vmul.f32 %v7023_v53, %v7021_v44  ;;  %v8662_v44 = vld [vmem:[%s9506_s5 + $0x10] sm:$0xff]   ;;  %v8669_v53 = vld [vmem:[%s9506_s5 + $0x18] sm:$0xff]  }
 0xca0   :  { %v7027_v39 = vpop.eup %7026 }
 0xca1   :  { %v7029_v6 = vpop.eup %7028  ;;  %v2539_v37 = vpack.c.bf16 %v2536_v34, %v2535_v52  ;;  %v2537_v28 = vmul.f32 %v7027_v39, %v7025_v40  ;;  %v8676_v40 = vld [vmem:[%s9506_s5 + $0x20] sm:$0xff]   ;;  %v8683_v52 = vld [vmem:[%s9506_s5 + $0x28] sm:$0xff]   ;;  %v8690_v34 = vld [vmem:[%s9506_s5 + $0x30] sm:$0xff]  }
 0xca2   :  { %v7031_v32 = vpop.eup %7030  ;;  %v8697_v39 = vld [vmem:[%s9506_s5 + $0x38] sm:$0xff]  }
 0xca3   :  { %2562 = vrot.lane.b32.xlu0 %v2539_v37, %s7709_s2  ;;  %2542 = vst.msk [vmem:[#allocation3] sm:$0xff] %vm2541_vm9, %v2539_v37  ;;  %v2538_v41 = vmul.f32 %v7031_v32, %v7029_v6 }
 0xca5   :  { %v2540_v56 = vpack.c.bf16 %v2538_v41, %v2537_v28 }
 0xca7   :  { %2564 = vrot.lane.b32.xlu1 %v2540_v56, %s7709_s2  ;;  %2543 = vst.msk [vmem:[#allocation3 + $0x8] sm:$0xff] %vm2541_vm9, %v2540_v56 }
 0xd15   :  { %v2563_v4 = vpop.permute.xlu0 %2562 }
 0xd16   :  { %6325 = vmatprep.subr.bf16.mxu0 %v2563_v4 }
 0xd17   :  { %6326 = vmatpush3.bf16.msra.mxu0 %v2563_v4 }
 0xd19   :  { %v2565_v43 = vpop.permute.xlu1 %2564 }
 0xd1a   :  { %6327 = vmatprep.subr.bf16.mxu0 %v2565_v43 }
 0xd1b   :  { %6328 = vmatpush3.bf16.msra.mxu0 %v2565_v43 }
 0xd1c   :  { %6365 = vmatprep.subr.bf16.mxu0 %v7697_v3 }
 0xd1e   :  { %6330 = vmatmul.mubr.msk.bf16.vlgmr.msra.gmra.mrb[64].mxu0 %vm405_vm1, %v8351_v30 }
 0xd1f   :  { %6333 = vmatprep.mubr.msk.bf16.mxu0 %vm405_vm1, %v8358_v57  ;;  %6366 = vmatpush3.bf16.msra.mxu0 %v7697_v3 }
 0xd26   :  { %6334 = vmatmul.mubr.msk.bf16.gmra.mrb[68].mxu0 %vm405_vm1, %v8365_v35 }
 0xd27   :  { %6337 = vmatprep.mubr.msk.bf16.mxu0 %vm405_vm1, %v8372_v26 }
 0xd2e   :  { %6338 = vmatmul.mubr.msk.bf16.gmra.mrb[72].mxu0 %vm405_vm1, %v8451_v51 }
 0xd2f   :  { %6341 = vmatprep.mubr.msk.bf16.mxu0 %vm405_vm1, %v8458_v54 }
 0xd36   :  { %6342 = vmatmul.mubr.msk.bf16.gmra.mrb[76].mxu0 %vm405_vm1, %v8465_v46 }
 0xdf1   :  { %v6331_v30 = vpop.f32.mrb[64].mxu0 }
 0xdf2   :  { %2685 = vrot.lane.b32.xlu0 %v6331_v30, %s7710_s12  ;;  %v2602_v3 = vpop.f32.mrb[65].mxu0 }
 0xdf3   :  { %v6332_v57 = vpop.f32.mrb[66].mxu0 }
 0xdf4   :  { %2687 = vrot.lane.b32.xlu1 %v6332_v57, %s7710_s12  ;;  %v2605_v35 = vpop.f32.mrb[67].mxu0 }
 0xdf6   :  { %2681 = vrot.lane.b32.xlu0 %v2602_v3, %s7710_s12 }
 0xdf8   :  { %2683 = vrot.lane.b32.xlu1 %v2605_v35, %s7710_s12 }
 0xdf9   :  { %v6335_v26 = vpop.f32.mrb[68].mxu0 }
 0xdfa   :  { %v2618_v51 = vpop.f32.mrb[69].mxu0 }
 0xdfb   :  { %2689 = vrot.lane.b32.xlu0 %v2618_v51, %s7710_s12  ;;  %v6336_v54 = vpop.f32.mrb[70].mxu0 }
 0xdfc   :  { %v2621_v55 = vpop.f32.mrb[71].mxu0 }
 0xdfd   :  { %2691 = vrot.lane.b32.xlu1 %v2621_v55, %s7710_s12 }
 0xdff   :  { %2693 = vrot.lane.b32.xlu0 %v6335_v26, %s7710_s12 }
 0xe01   :  { %2695 = vrot.lane.b32.xlu1 %v6336_v54, %s7710_s12  ;;  %v6339_v46 = vpop.f32.mrb[72].mxu0 }
 0xe02   :  { %v2634_v47 = vpop.f32.mrb[73].mxu0 }
 0xe03   :  { %2701 = vrot.lane.b32.xlu0 %v6339_v46, %s7710_s12  ;;  %v6340_v59 = vpop.f32.mrb[74].mxu0 }
 0xe04   :  { %v2637_v10 = vpop.f32.mrb[75].mxu0 }
 0xe05   :  { %2703 = vrot.lane.b32.xlu1 %v6340_v59, %s7710_s12 }
 0xe07   :  { %2697 = vrot.lane.b32.xlu0 %v2634_v47, %s7710_s12 }
 0xe09   :  { %2699 = vrot.lane.b32.xlu1 %v2637_v10, %s7710_s12  ;;  %v6343_v63 = vpop.f32.mrb[76].mxu0 }
 0xe0a   :  { %v2650_v62 = vpop.f32.mrb[77].mxu0 }
 0xe0b   :  { %2705 = vrot.lane.b32.xlu0 %v2650_v62, %s7710_s12  ;;  %v6344_v48 = vpop.f32.mrb[78].mxu0 }
 0xe0c   :  { %v2653_v58 = vpop.f32.mrb[79].mxu0 }
 0xe0d   :  { %2707 = vrot.lane.b32.xlu1 %v2653_v58, %s7710_s12 }
 0xe0f   :  { %2709 = vrot.lane.b32.xlu0 %v6343_v63, %s7710_s12 }
 0xe11   :  { %2711 = vrot.lane.b32.xlu1 %v6344_v48, %s7710_s12 }
 0xe13   :  { %2825 = vrot.lane.b32.xlu0 %v8539_v7, %s7698_s3  ;;  %v2898_v7 = vld [vmem:[%s9507_s6 + $0x20] sm:$0xff] }
 0xe15   :  { %2827 = vrot.lane.b32.xlu1 %v8542_v38, %s7698_s3  ;;  %v2899_v38 = vld [vmem:[%s9507_s6 + $0x28] sm:$0xff] }
 0xe17   :  { %2829 = vrot.lane.b32.xlu0 %v8545_v20, %s7698_s3  ;;  %v2906_v20 = vld [vmem:[%s9507_s6 + $0x60] sm:$0xff] }
 0xe19   :  { %2831 = vrot.lane.b32.xlu1 %v8548_v0, %s7698_s3  ;;  %v8645_v0 = vld [vmem:[%s9506_s5] sm:$0xff]  }
 0xe1a   :  { %6367 = vmatprep.mubr.msk.bf16.mxu0 %vm405_vm1, %v8645_v0 }
 0xe1b   :  { %2914 = vperm.xlu0 %6549, %v2894_v16   ;;  %6368 = vmatmul.mubr.msk.bf16.vlgmr.msra.gmra.mrb[80].mxu0 %vm405_vm1, %v8655_v1 }
 0xe1c   :  { %6371 = vmatprep.mubr.msk.bf16.mxu0 %vm405_vm1, %v8662_v44 }
 0xe1d   :  { %2919 = vperm.xlu1 %6550, %v2895_v14  }
 0xe1f   :  { %2934 = vperm.xlu0 %6549, %v2898_v7  }
 0xe21   :  { %2939 = vperm.xlu1 %6550, %v2899_v38  }
 0xe23   :  { %2924 = vperm.xlu0 %6549, %v2896_v8   ;;  %6372 = vmatmul.mubr.msk.bf16.gmra.mrb[84].mxu0 %vm405_vm1, %v8669_v53 }
 0xe24   :  { %6375 = vmatprep.mubr.msk.bf16.mxu0 %vm405_vm1, %v8676_v40 }
 0xe25   :  { %2929 = vperm.xlu1 %6550, %v2897_v60  }
 0xe27   :  { %2944 = vperm.xlu0 %6549, %v2900_v13  }
 0xe29   :  { %2949 = vperm.xlu1 %6550, %v2901_v17  }
 0xe2b   :  { %2954 = vperm.xlu0 %6549, %v2902_v12   ;;  %6376 = vmatmul.mubr.msk.bf16.gmra.mrb[88].mxu0 %vm405_vm1, %v8683_v52 }
 0xe2c   :  { %6379 = vmatprep.mubr.msk.bf16.mxu0 %vm405_vm1, %v8690_v34 }
 0xe2d   :  { %2959 = vperm.xlu1 %6550, %v2903_v19  }
 0xe2f   :  { %2974 = vperm.xlu0 %6549, %v2906_v20  }
 0xe31   :  { %2979 = vperm.xlu1 %6550, %v2907_v9  }
 0xe33   :  { %2964 = vperm.xlu0 %6549, %v2904_v25   ;;  %6380 = vmatmul.mubr.msk.bf16.gmra.mrb[92].mxu0 %vm405_vm1, %v8697_v39  ;;  %v2557_v25 = vld [vmem:[#allocation2 + $0x68] sm:$0xff] }
 0xe34   :  { %6407 = vmatprep.mubr.msk.bf16.mxu0 %vm405_vm1, %v8645_v0 }
 0xe35   :  { %2969 = vperm.xlu1 %6550, %v2905_v36  }
 0xe37   :  { %2984 = vperm.xlu0 %6549, %v2908_v61  }
 0xe39   :  { %2989 = vperm.xlu1 %6550, %v2909_v24  }
 0xe64   :  { %v2686_v6 = vpop.permute.xlu0 %2685 }
 0xe65   :  { %v2731_v37 = vadd.f32 %v2686_v6, %v8493_v5 }
 0xe66   :  { %v2688_v32 = vpop.permute.xlu1 %2687 }
 0xe67   :  { %v5794_v28 = vmul.f32 -1.442695, %v2731_v37  ;;  %v2732_v41 = vadd.f32 %v2688_v32, %v8496_v21 }
 0xe68   :  { %v2682_v56 = vpop.permute.xlu0 %2681 }
 0xe69   :  { %7032 = vpow2.f32 %v5794_v28  ;;  %v5795_v4 = vmul.f32 -1.442695, %v2732_v41  ;;  %v2729_v43 = vadd.f32 %v2682_v56, %v8499_v42 }
 0xe6a   :  { %v2684_v30 = vpop.permute.xlu1 %2683 }
 0xe6b   :  { %7034 = vpow2.f32 %v5795_v4  ;;  %v5792_v3 = vmul.f32 -1.442695, %v2729_v43  ;;  %v2730_v57 = vadd.f32 %v2684_v30, %v8502_v15 }
 0xe6d   :  { %7036 = vpow2.f32 %v5792_v3  ;;  %v5793_v35 = vmul.f32 -1.442695, %v2730_v57  ;;  %v2690_v26 = vpop.permute.xlu0 %2689 }
 0xe6e   :  { %v2733_v51 = vadd.f32 %v2690_v26, %v8505_v33 }
 0xe6f   :  { %7038 = vpow2.f32 %v5793_v35  ;;  %v2692_v5 = vpop.permute.xlu1 %2691 }
 0xe70   :  { %v5796_v54 = vmul.f32 -1.442695, %v2733_v51  ;;  %v2734_v21 = vadd.f32 %v2692_v5, %v8508_v23 }
 0xe71   :  { %v2694_v55 = vpop.permute.xlu0 %2693 }
 0xe72   :  { %7040 = vpow2.f32 %v5796_v54  ;;  %v5797_v46 = vmul.f32 -1.442695, %v2734_v21  ;;  %v2735_v42 = vadd.f32 %v2694_v55, %v8511_v31 }
 0xe73   :  { %v7033_v47 = vpop.eup %7032  ;;  %v2696_v59 = vpop.permute.xlu1 %2695 }
 0xe74   :  { %v2759_v10 = vadd.f32 1.0, %v7033_v47  ;;  %7042 = vpow2.f32 %v5797_v46  ;;  %v5798_v15 = vmul.f32 -1.442695, %v2735_v42  ;;  %v2736_v63 = vadd.f32 %v2696_v59, %v8514_v27 }
 0xe75   :  { %v7035_v62 = vpop.eup %7034  ;;  %v2702_v48 = vpop.permute.xlu0 %2701 }
 0xe76   :  { %v2760_v33 = vadd.f32 1.0, %v7035_v62  ;;  %v5799_v58 = vmul.f32 -1.442695, %v2736_v63  ;;  %7044 = vpow2.f32 %v5798_v15  ;;  %v2739_v7 = vadd.f32 %v2702_v48, %v8517_v50 }
 0xe77   :  { %v7037_v16 = vpop.eup %7036  ;;  %v2704_v14 = vpop.permute.xlu1 %2703  ;;  %7046 = vrcp.f32 %v2759_v10 }
 0xe78   :  { %v2757_v23 = vadd.f32 1.0, %v7037_v16  ;;  %7048 = vpow2.f32 %v5799_v58  ;;  %v2740_v22 = vadd.f32 %v2704_v14, %v8528_v45 }
 0xe79   :  { %v7039_v38 = vpop.eup %7038  ;;  %v2698_v31 = vpop.permute.xlu0 %2697  ;;  %7050 = vrcp.f32 %v2760_v33 }
 0xe7a   :  { %v2758_v8 = vadd.f32 1.0, %v7039_v38  ;;  %v2737_v60 = vadd.f32 %v2698_v31, %v8520_v11  ;;  %7052 = vrcp.f32 %v2757_v23 }
 0xe7b   :  { %v2700_v27 = vpop.permute.xlu1 %2699  ;;  %7054 = vtanh.f32 %v2739_v7 }
 0xe7c   :  { %v7041_v13 = vpop.eup %7040  ;;  %v2738_v17 = vadd.f32 %v2700_v27, %v8523_v29  ;;  %7056 = vrcp.f32 %v2758_v8 }
 0xe7d   :  { %v2781_v12 = vadd.f32 1.0, %v7041_v13  ;;  %v2706_v19 = vpop.permute.xlu0 %2705  ;;  %7058 = vtanh.f32 %v2737_v60 }
 0xe7e   :  { %v7043_v20 = vpop.eup %7042  ;;  %v2741_v50 = vadd.f32 %v2706_v19, %v8526_v18 }
 0xe7f   :  { %7060 = vrcp.f32 %v2781_v12  ;;  %v2782_v9 = vadd.f32 1.0, %v7043_v20  ;;  %v2708_v36 = vpop.permute.xlu1 %2707 }
 0xe80   :  { %7062 = vtanh.f32 %v2738_v17  ;;  %v5800_v11 = vmul.f32 -1.442695, %v2741_v50  ;;  %v2742_v61 = vadd.f32 %v2708_v36, %v2557_v25  ;;  %v7045_v24 = vpop.eup %7044 }
 0xe81   :  { %7064 = vrcp.f32 %v2782_v9  ;;  %v2710_v6 = vpop.permute.xlu0 %2709  ;;  %v7047_v29 = vpop.eup %7046  ;;  %v2783_v37 = vadd.f32 1.0, %v7045_v24 }
 0xe82   :  { %7066 = vpow2.f32 %v5800_v11  ;;  %v5801_v32 = vmul.f32 -1.442695, %v2742_v61  ;;  %v2743_v28 = vadd.f32 %v2710_v6, %v8533_v49  ;;  %v7049_v41 = vpop.eup %7048 }
 0xe83   :  { %7068 = vtanh.f32 %v2740_v22  ;;  %v2712_v18 = vpop.permute.xlu1 %2711  ;;  %v7051_v56 = vpop.eup %7050  ;;  %v2784_v45 = vadd.f32 1.0, %v7049_v41 }
 0xe84   :  { %7070 = vrcp.f32 %v2783_v37  ;;  %v5802_v4 = vmul.f32 -1.442695, %v2743_v28  ;;  %v2744_v43 = vadd.f32 %v2712_v18, %v8536_v2  ;;  %v7053_v30 = vpop.eup %7052  ;;  %v6569_v18 = vld [vmem:[%s9505_s4 + $0x8] sm:$0xff]  }
 0xe85   :  { %7072 = vpow2.f32 %v5801_v32  ;;  %v7055_v3 = vpop.eup %7054  ;;  %v2826_v51 = vpop.permute.xlu0 %2825 }
 0xe86   :  { %7074 = vrcp.f32 %v2784_v45  ;;  %v5803_v57 = vmul.f32 -1.442695, %v2744_v43  ;;  %v7057_v35 = vpop.eup %7056  ;;  %v2843_v58 = vmul.f32 %v7055_v3, %v7047_v29  ;;  %v6573_v45 = vld [vmem:[%s9505_s4 + $0x18] sm:$0xff]   ;;  %v6577_v43 = vld [vmem:[%s9505_s4 + $0x28] sm:$0xff]  }
 0xe87   :  { %7076 = vpow2.f32 %v5802_v4  ;;  %v7059_v26 = vpop.eup %7058  ;;  %v2828_v55 = vpop.permute.xlu1 %2827  ;;  %v6575_v4 = vld [vmem:[%s9505_s4 + $0x20] sm:$0xff]   ;;  %v6581_v3 = vld [vmem:[%s9505_s4 + $0x38] sm:$0xff]  }
 0xe88   :  { %7078 = vpow2.f32 %v5803_v57  ;;  %v2841_v54 = vmul.f32 %v7059_v26, %v7053_v30  ;;  %v6579_v30 = vld [vmem:[%s9505_s4 + $0x30] sm:$0xff]  }
 0xe89   :  { %v7061_v49 = vpop.eup %7060  ;;  %v2830_v48 = vpop.permute.xlu0 %2829 }
 0xe8a   :  { %v7063_v5 = vpop.eup %7062  ;;  %v2837_v21 = vmul.f32 %v7061_v49, %v2826_v51 }
 0xe8b   :  { %v7065_v46 = vpop.eup %7064  ;;  %v2842_v59 = vmul.f32 %v7063_v5, %v7057_v35  ;;  %v2832_v7 = vpop.permute.xlu1 %2831 }
 0xe8c   :  { %v7067_v42 = vpop.eup %7066  ;;  %v2845_v47 = vadd.f32 %v2841_v54, %v2837_v21  ;;  %v2838_v2 = vmul.f32 %v7065_v46, %v2828_v55 }
 0xe8d   :  { %v7069_v10 = vpop.eup %7068  ;;  %v2809_v15 = vadd.f32 1.0, %v7067_v42 }
 0xe8e   :  { %v7071_v63 = vpop.eup %7070  ;;  %7080 = vtanh.f32 %v2845_v47  ;;  %v2846_v62 = vadd.f32 %v2842_v59, %v2838_v2  ;;  %v2844_v8 = vmul.f32 %v7069_v10, %v7051_v56  ;;  %v6571_v56 = vld [vmem:[%s9505_s4 + $0x10] sm:$0xff]  }
 0xe8f   :  { %v7073_v33 = vpop.eup %7072  ;;  %7082 = vrcp.f32 %v2809_v15  ;;  %v2839_v16 = vmul.f32 %v7071_v63, %v2830_v48 }
 0xe90   :  { %v7075_v14 = vpop.eup %7074  ;;  %v2810_v23 = vadd.f32 1.0, %v7073_v33  ;;  %7084 = vtanh.f32 %v2846_v62 }
 0xe91   :  { %v7077_v38 = vpop.eup %7076  ;;  %v2847_v31 = vadd.f32 %v2843_v58, %v2839_v16  ;;  %v2840_v60 = vmul.f32 %v7075_v14, %v2832_v7 }
 0xe92   :  { %v7079_v27 = vpop.eup %7078  ;;  %7086 = vrcp.f32 %v2810_v23  ;;  %v2811_v13 = vadd.f32 1.0, %v7077_v38 }
 0xe93   :  { %v2812_v17 = vadd.f32 1.0, %v7079_v27  ;;  %7088 = vtanh.f32 %v2847_v31  ;;  %v2848_v12 = vadd.f32 %v2844_v8, %v2840_v60 }
 0xe94   :  { %7090 = vrcp.f32 %v2811_v13 }
 0xe95   :  { %7092 = vrcp.f32 %v2812_v17 }
 0xe96   :  { %7094 = vtanh.f32 %v2848_v12 }
 0xe98   :  { %v7081_v19 = vpop.eup %7080 }
 0xe99   :  { %v7083_v20 = vpop.eup %7082 }
 0xe9a   :  { %v7085_v50 = vpop.eup %7084  ;;  %v2853_v25 = vmul.f32 %v7083_v20, %v7081_v19  ;;  %v2915_v63 = vpop.permute.xlu0 %2914 }
 0xe9c   :  { %v7087_v9 = vpop.eup %7086  ;;  %v2920_v62 = vpop.permute.xlu1 %2919 }
 0xe9d   :  { %v7089_v22 = vpop.eup %7088  ;;  %v2854_v36 = vmul.f32 %v7087_v9, %v7085_v50 }
 0xe9e   :  { %v7091_v11 = vpop.eup %7090  ;;  %v2935_v48 = vpop.permute.xlu0 %2934 }
 0xe9f   :  { %v7093_v61 = vpop.eup %7092  ;;  %v2857_v24 = vpack.c.bf16 %v2854_v36, %v2853_v25  ;;  %v2855_v29 = vmul.f32 %v7091_v11, %v7089_v22 }
 0xea0   :  { %v7095_v6 = vpop.eup %7094  ;;  %v2940_v33 = vpop.permute.xlu1 %2939 }
 0xea1   :  { %2860 = vst.msk [vmem:[#allocation3] sm:$0xff] %vm2859_vm10, %v2857_v24  ;;  %v2856_v37 = vmul.f32 %v7095_v6, %v7093_v61 }
 0xea2   :  { %v2925_v58 = vpop.permute.xlu0 %2924 }
 0xea3   :  { %v2858_v32 = vpack.c.bf16 %v2856_v37, %v2855_v29 }
 0xea4   :  { %v2930_v16 = vpop.permute.xlu1 %2929 }
 0xea5   :  { %2861 = vst.msk [vmem:[#allocation3 + $0x8] sm:$0xff] %vm2859_vm10, %v2858_v32 }
 0xea6   :  { %v2945_v14 = vpop.permute.xlu0 %2944 }
 0xea8   :  { %v2910_v28 = vld [vmem:[#allocation3] sm:$0xff]  ;;  %v2950_v23 = vpop.permute.xlu1 %2949 }
 0xea9   :  { %6345 = vmatprep.subr.bf16.mxu1 %v2910_v28 }
 0xeaa   :  { %6346 = vmatpush3.bf16.msra.mxu1 %v2910_v28  ;;  %v2955_v17 = vpop.permute.xlu0 %2954 }
 0xeac   :  { %v2911_v41 = vld [vmem:[#allocation3 + $0x8] sm:$0xff]  ;;  %v2960_v19 = vpop.permute.xlu1 %2959 }
 0xead   :  { %6347 = vmatprep.subr.bf16.mxu1 %v2911_v41 }
 0xeae   :  { %6348 = vmatpush3.bf16.msra.mxu1 %v2911_v41  ;;  %v8776_v22 = vpop.permute.xlu0 %2974 }
 0xeb0   :  { %v8784_v37 = vpop.permute.xlu1 %2979 }
 0xeb1   :  { %6350 = vmatmul.mubr.msk.bf16.vlgmr.msra.gmra.mrb[64].mxu1 %vm405_vm1, %v6569_v18 }
 0xeb2   :  { %6353 = vmatprep.mubr.msk.bf16.mxu1 %vm405_vm1, %v6571_v56 }
 0xeb9   :  { %6354 = vmatmul.mubr.msk.bf16.gmra.mrb[68].mxu1 %vm405_vm1, %v6573_v45 }
 0xeba   :  { %6357 = vmatprep.mubr.msk.bf16.mxu1 %vm405_vm1, %v6575_v4 }
 0xec1   :  { %6358 = vmatmul.mubr.msk.bf16.gmra.mrb[72].mxu1 %vm405_vm1, %v6577_v43 }
 0xec2   :  { %6361 = vmatprep.mubr.msk.bf16.mxu1 %vm405_vm1, %v6579_v30 }
 0xec9   :  { %6362 = vmatmul.mubr.msk.bf16.gmra.mrb[76].mxu1 %vm405_vm1, %v6581_v3  ;;  %v2965_v3 = vpop.permute.xlu0 %2964 }
 0xeca   :  { %6387 = vmatprep.mubr.msk.bf16.mxu1 %vm405_vm1, %v8645_v0 }
 0xeee   :  { %v6369_v57 = vpop.f32.mrb[80].mxu0 }
 0xeef   :  { %v3283_v35 = vpop.f32.mrb[81].mxu0 }
 0xef0   :  { %v6370_v26 = vpop.f32.mrb[82].mxu0 }
 0xef1   :  { %v3286_v51 = vpop.f32.mrb[83].mxu0 }
 0xef6   :  { %v8748_v49 = vpop.f32.mrb[84].mxu0 }
 0xef7   :  { %v8750_v5 = vpop.f32.mrb[85].mxu0 }
 0xef8   :  { %v8752_v54 = vpop.f32.mrb[86].mxu0 }
 0xef9   :  { %v8754_v21 = vpop.f32.mrb[87].mxu0 }
 0xefe   :  { %v8756_v55 = vpop.f32.mrb[88].mxu0 }
 0xeff   :  { %v8758_v46 = vpop.f32.mrb[89].mxu0 }
 0xf00   :  { %v8760_v42 = vpop.f32.mrb[90].mxu0 }
 0xf01   :  { %v8762_v47 = vpop.f32.mrb[91].mxu0 }
 0xf06   :  { %v8764_v59 = vpop.f32.mrb[92].mxu0 }
 0xf07   :  { %v8766_v2 = vpop.f32.mrb[93].mxu0 }
 0xf08   :  { %v8768_v10 = vpop.f32.mrb[94].mxu0 }
 0xf09   :  { %v8770_v15 = vpop.f32.mrb[95].mxu0 }
 0xf84   :  { %v6351_v7 = vpop.f32.mrb[64].mxu1 }
 0xf85   :  { %v3099_v38 = vadd.f32 %v6351_v7, %v2925_v58  ;;  %v3090_v31 = vpop.f32.mrb[65].mxu1 }
 0xf86   :  { %v3091_v8 = vadd.f32 %v3090_v31, %v2915_v63  ;;  %v6352_v60 = vpop.f32.mrb[66].mxu1 }
 0xf87   :  { %3155 = vst.msk [vmem:[#allocation2 + $0x10] sm:$0xff] %vm332_vm2, %v3099_v38  ;;  %v3102_v27 = vadd.f32 %v6352_v60, %v2930_v16  ;;  %v3093_v13 = vpop.f32.mrb[67].mxu1 }
 0xf88   :  { %3153 = vst.msk [vmem:[#allocation2] sm:$0xff] %vm332_vm2, %v3091_v8  ;;  %v3094_v12 = vadd.f32 %v3093_v13, %v2920_v62 }
 0xf89   :  { %3156 = vst.msk [vmem:[#allocation2 + $0x18] sm:$0xff] %vm332_vm2, %v3102_v27 }
 0xf8a   :  { %3154 = vst.msk [vmem:[#allocation2 + $0x8] sm:$0xff] %vm332_vm2, %v3094_v12 }
 0xf8c   :  { %v6355_v20 = vpop.f32.mrb[68].mxu1 }
 0xf8d   :  { %v3115_v50 = vadd.f32 %v6355_v20, %v2945_v14  ;;  %v3106_v9 = vpop.f32.mrb[69].mxu1 }
 0xf8e   :  { %v8778_v25 = vld [vmem:[#allocation2 + $0x10] sm:$0xff]  ;;  %v3107_v36 = vadd.f32 %v3106_v9, %v2935_v48  ;;  %v6356_v11 = vpop.f32.mrb[70].mxu1  ;;  %v2970_v48 = vpop.permute.xlu1 %2969 }
 0xf8f   :  { %v3348_v61 = vadd.f32 %v6369_v57, %v8778_v25  ;;  %3159 = vst.msk [vmem:[#allocation2 + $0x30] sm:$0xff] %vm332_vm2, %v3115_v50  ;;  %v8782_v24 = vld [vmem:[#allocation2] sm:$0xff]  ;;  %v3118_v6 = vadd.f32 %v6356_v11, %v2950_v23  ;;  %v3109_v29 = vpop.f32.mrb[71].mxu1 }
 0xf90   :  { %v3346_v32 = vadd.f32 %v3283_v35, %v8782_v24  ;;  %3157 = vst.msk [vmem:[#allocation2 + $0x20] sm:$0xff] %vm332_vm2, %v3107_v36  ;;  %v8788_v28 = vld [vmem:[#allocation2 + $0x18] sm:$0xff]  ;;  %v3110_v41 = vadd.f32 %v3109_v29, %v2940_v33 }
 0xf91   :  { %v5838_v18 = vmul.f32 -1.442695, %v3348_v61  ;;  %v3349_v56 = vadd.f32 %v6370_v26, %v8788_v28  ;;  %3160 = vst.msk [vmem:[#allocation2 + $0x38] sm:$0xff] %vm332_vm2, %v3118_v6  ;;  %v8792_v45 = vld [vmem:[#allocation2 + $0x8] sm:$0xff] }
 0xf92   :  { %v5836_v4 = vmul.f32 -1.442695, %v3346_v32  ;;  %v3347_v43 = vadd.f32 %v3286_v51, %v8792_v45  ;;  %3158 = vst.msk [vmem:[#allocation2 + $0x28] sm:$0xff] %vm332_vm2, %v3110_v41  ;;  %v2990_v36 = vpop.permute.xlu1 %2989 }
 0xf93   :  { %7096 = vpow2.f32 %v5838_v18  ;;  %v5839_v30 = vmul.f32 -1.442695, %v3349_v56 }
 0xf94   :  { %7098 = vpow2.f32 %v5836_v4  ;;  %v5837_v57 = vmul.f32 -1.442695, %v3347_v43  ;;  %v6359_v35 = vpop.f32.mrb[72].mxu1 }
 0xf95   :  { %7100 = vpow2.f32 %v5839_v30  ;;  %v3131_v63 = vadd.f32 %v6359_v35, %v2965_v3  ;;  %v3122_v62 = vpop.f32.mrb[73].mxu1 }
 0xf96   :  { %7102 = vpow2.f32 %v5837_v57  ;;  %v8796_v26 = vld [vmem:[#allocation2 + $0x30] sm:$0xff]  ;;  %v3123_v33 = vadd.f32 %v3122_v62, %v2955_v17  ;;  %v6360_v58 = vpop.f32.mrb[74].mxu1  ;;  %v2985_v17 = vpop.permute.xlu0 %2984 }
 0xf97   :  { %v3352_v51 = vadd.f32 %v8748_v49, %v8796_v26  ;;  %3163 = vst.msk [vmem:[#allocation2 + $0x50] sm:$0xff] %vm332_vm2, %v3131_v63  ;;  %v8801_v16 = vld [vmem:[#allocation2 + $0x20] sm:$0xff]  ;;  %v3134_v14 = vadd.f32 %v6360_v58, %v2970_v48  ;;  %v3125_v23 = vpop.f32.mrb[75].mxu1 }
 0xf98   :  { %v3350_v7 = vadd.f32 %v8750_v5, %v8801_v16  ;;  %3161 = vst.msk [vmem:[#allocation2 + $0x40] sm:$0xff] %vm332_vm2, %v3123_v33  ;;  %v8806_v38 = vld [vmem:[#allocation2 + $0x38] sm:$0xff]  ;;  %v3126_v31 = vadd.f32 %v3125_v23, %v2960_v19 }
 0xf99   :  { %v5842_v8 = vmul.f32 -1.442695, %v3352_v51  ;;  %v3353_v60 = vadd.f32 %v8752_v54, %v8806_v38  ;;  %3164 = vst.msk [vmem:[#allocation2 + $0x58] sm:$0xff] %vm332_vm2, %v3134_v14  ;;  %v8811_v49 = vld [vmem:[#allocation2 + $0x28] sm:$0xff] }
 0xf9a   :  { %v5840_v27 = vmul.f32 -1.442695, %v3350_v7  ;;  %v3351_v13 = vadd.f32 %v8754_v21, %v8811_v49  ;;  %3162 = vst.msk [vmem:[#allocation2 + $0x48] sm:$0xff] %vm332_vm2, %v3126_v31 }
 0xf9b   :  { %7104 = vpow2.f32 %v5842_v8  ;;  %v5843_v5 = vmul.f32 -1.442695, %v3353_v60 }
 0xf9c   :  { %7106 = vpow2.f32 %v5840_v27  ;;  %v5841_v12 = vmul.f32 -1.442695, %v3351_v13  ;;  %v6363_v19 = vpop.f32.mrb[76].mxu1 }
 0xf9d   :  { %v7097_v20 = vpop.eup %7096  ;;  %7108 = vpow2.f32 %v5843_v5  ;;  %v3147_v50 = vadd.f32 %v6363_v19, %v2985_v17  ;;  %v3138_v54 = vpop.f32.mrb[77].mxu1 }
 0xf9e   :  { %v7099_v9 = vpop.eup %7098  ;;  %v3376_v11 = vadd.f32 1.0, %v7097_v20  ;;  %7110 = vpow2.f32 %v5841_v12  ;;  %v8816_v61 = vld [vmem:[#allocation2 + $0x50] sm:$0xff]  ;;  %v3139_v21 = vadd.f32 %v3138_v54, %v8776_v22  ;;  %v6364_v6 = vpop.f32.mrb[78].mxu1 }
 0xf9f   :  { %v7101_v29 = vpop.eup %7100  ;;  %v3374_v32 = vadd.f32 1.0, %v7099_v9  ;;  %3167 = vst.msk [vmem:[#allocation2 + $0x70] sm:$0xff] %vm332_vm2, %v3147_v50  ;;  %v8820_v41 = vld [vmem:[#allocation2 + $0x40] sm:$0xff]  ;;  %v3150_v18 = vadd.f32 %v6364_v6, %v2990_v36  ;;  %v3141_v56 = vpop.f32.mrb[79].mxu1  ;;  %v3356_v30 = vadd.f32 %v8756_v55, %v8816_v61 }
 0xfa0   :  { %v7103_v4 = vpop.eup %7102  ;;  %7112 = vrcp.f32 %v3376_v11  ;;  %v3377_v43 = vadd.f32 1.0, %v7101_v29  ;;  %3165 = vst.msk [vmem:[#allocation2 + $0x60] sm:$0xff] %vm332_vm2, %v3139_v21  ;;  %v8825_v3 = vld [vmem:[#allocation2 + $0x58] sm:$0xff]  ;;  %v3142_v22 = vadd.f32 %v3141_v56, %v8784_v37  ;;  %v3354_v35 = vadd.f32 %v8758_v46, %v8820_v41 }
 0xfa1   :  { %7114 = vrcp.f32 %v3374_v32  ;;  %v3375_v57 = vadd.f32 1.0, %v7103_v4  ;;  %3168 = vst.msk [vmem:[#allocation2 + $0x78] sm:$0xff] %vm332_vm2, %v3150_v18  ;;  %v8831_v63 = vld [vmem:[#allocation2 + $0x48] sm:$0xff]  ;;  %v3357_v62 = vadd.f32 %v8760_v42, %v8825_v3 }
 0xfa2   :  { %7116 = vrcp.f32 %v3377_v43  ;;  %3166 = vst.msk [vmem:[#allocation2 + $0x68] sm:$0xff] %vm332_vm2, %v3142_v22  ;;  %v3355_v55 = vadd.f32 %v8762_v47, %v8831_v63 }
 0xfa3   :  { %7118 = vrcp.f32 %v3375_v57 }
 0xfa4   :  { %7120 = vtanh.f32 %v3356_v30 }
 0xfa5   :  { %v7105_v37 = vpop.eup %7104  ;;  %7122 = vtanh.f32 %v3354_v35 }
 0xfa6   :  { %v7107_v48 = vpop.eup %7106  ;;  %v3400_v33 = vadd.f32 1.0, %v7105_v37  ;;  %7124 = vtanh.f32 %v3357_v62  ;;  %v8838_v46 = vld [vmem:[#allocation2 + $0x70] sm:$0xff] }
 0xfa7   :  { %v7109_v58 = vpop.eup %7108  ;;  %v3398_v51 = vadd.f32 1.0, %v7107_v48  ;;  %7126 = vtanh.f32 %v3355_v55  ;;  %v3360_v42 = vadd.f32 %v8764_v59, %v8838_v46  ;;  %v8842_v14 = vld [vmem:[#allocation2 + $0x60] sm:$0xff] }
 0xfa8   :  { %v7111_v23 = vpop.eup %7110  ;;  %7128 = vrcp.f32 %v3400_v33  ;;  %v3401_v7 = vadd.f32 1.0, %v7109_v58  ;;  %v3358_v47 = vadd.f32 %v8766_v2, %v8842_v14  ;;  %v8846_v31 = vld [vmem:[#allocation2 + $0x78] sm:$0xff] }
 0xfa9   :  { %7130 = vrcp.f32 %v3398_v51  ;;  %v3399_v8 = vadd.f32 1.0, %v7111_v23  ;;  %v5846_v60 = vmul.f32 -1.442695, %v3360_v42  ;;  %v3361_v27 = vadd.f32 %v8768_v10, %v8846_v31  ;;  %v8850_v13 = vld [vmem:[#allocation2 + $0x68] sm:$0xff] }
 0xfaa   :  { %v7113_v5 = vpop.eup %7112  ;;  %7132 = vrcp.f32 %v3401_v7  ;;  %v5844_v59 = vmul.f32 -1.442695, %v3358_v47  ;;  %v3359_v17 = vadd.f32 %v8770_v15, %v8850_v13 }
 0xfab   :  { %v7115_v12 = vpop.eup %7114  ;;  %7134 = vrcp.f32 %v3399_v8  ;;  %v5847_v19 = vmul.f32 -1.442695, %v3361_v27 }
 0xfac   :  { %v7117_v2 = vpop.eup %7116  ;;  %7136 = vpow2.f32 %v5846_v60  ;;  %v5845_v20 = vmul.f32 -1.442695, %v3359_v17 }
 0xfad   :  { %v7119_v50 = vpop.eup %7118  ;;  %7138 = vpow2.f32 %v5844_v59 }
 0xfae   :  { %v7121_v54 = vpop.eup %7120  ;;  %7140 = vpow2.f32 %v5847_v19 }
 0xfaf   :  { %v7123_v9 = vpop.eup %7122  ;;  %v3444_v10 = vmul.f32 %v7121_v54, %v7113_v5  ;;  %7142 = vpow2.f32 %v5845_v20 }
 0xfb0   :  { %v7125_v36 = vpop.eup %7124  ;;  %v3442_v11 = vmul.f32 %v7123_v9, %v7115_v12 }
 0xfb1   :  { %v7127_v21 = vpop.eup %7126  ;;  %v3445_v6 = vmul.f32 %v7125_v36, %v7117_v2 }
 0xfb2   :  { %v7129_v29 = vpop.eup %7128  ;;  %v3443_v32 = vmul.f32 %v7127_v21, %v7119_v50 }
 0xfb3   :  { %v7131_v15 = vpop.eup %7130  ;;  %v3440_v18 = vmul.f32 0.0, %v7129_v29 }
 0xfb4   :  { %v7133_v56 = vpop.eup %7132  ;;  %v3438_v4 = vmul.f32 0.0, %v7131_v15 }
 0xfb5   :  { %v7135_v43 = vpop.eup %7134  ;;  %v3441_v30 = vmul.f32 0.0, %v7133_v56  ;;  %v8854_v22 = vadd.f32 %v3444_v10, %v3440_v18 }
 0xfb6   :  { %v7137_v57 = vpop.eup %7136  ;;  %v3439_v35 = vmul.f32 0.0, %v7135_v43  ;;  %v8856_v62 = vadd.f32 %v3442_v11, %v3438_v4 }
 0xfb7   :  { %v7139_v55 = vpop.eup %7138  ;;  %7144 = vtanh.f32 %v8854_v22  ;;  %v8859_v37 = vadd.f32 %v3445_v6, %v3441_v30  ;;  %v3428_v48 = vadd.f32 1.0, %v7137_v57 }
 0xfb8   :  { %v7141_v33 = vpop.eup %7140  ;;  %7146 = vtanh.f32 %v8856_v62  ;;  %v8862_v58 = vadd.f32 %v3443_v32, %v3439_v35  ;;  %v3426_v51 = vadd.f32 1.0, %v7139_v55 }
 0xfb9   :  { %v7143_v42 = vpop.eup %7142  ;;  %7148 = vtanh.f32 %v8859_v37  ;;  %v3429_v23 = vadd.f32 1.0, %v7141_v33 }
 0xfba   :  { %7150 = vtanh.f32 %v8862_v58  ;;  %v3427_v7 = vadd.f32 1.0, %v7143_v42 }
 0xfbb   :  { %7152 = vrcp.f32 %v3428_v48 }
 0xfbc   :  { %7154 = vrcp.f32 %v3426_v51 }
 0xfbd   :  { %7156 = vrcp.f32 %v3429_v23 }
 0xfbe   :  { %7158 = vrcp.f32 %v3427_v7 }
 0xfc1   :  { %v7145_v47 = vpop.eup %7144 }
 0xfc2   :  { %v7147_v8 = vpop.eup %7146 }
 0xfc3   :  { %v7149_v60 = vpop.eup %7148 }
 0xfc4   :  { %v7151_v27 = vpop.eup %7150 }
 0xfc5   :  { %v7153_v5 = vpop.eup %7152 }
 0xfc6   :  { %v7155_v59 = vpop.eup %7154  ;;  %v3456_v19 = vmul.f32 %v7153_v5, %v7145_v47 }
 0xfc7   :  { %v7157_v17 = vpop.eup %7156  ;;  %v3454_v20 = vmul.f32 %v7155_v59, %v7147_v8 }
 0xfc8   :  { %v7159_v12 = vpop.eup %7158  ;;  %v3457_v2 = vmul.f32 %v7157_v17, %v7149_v60 }
 0xfc9   :  { %v3455_v50 = vmul.f32 %v7159_v12, %v7151_v27 }
 0xfca   :  { %v3459_v54 = vpack.c.bf16 %v3457_v2, %v3456_v19 }
 0xfcb   :  { %v3458_v9 = vpack.c.bf16 %v3455_v50, %v3454_v20 }
 0xfcd   :  { %6383 = vmatprep.subr.bf16.mxu1 %v3458_v9 }
 0xfce   :  { %6384 = vmatpush3.bf16.msra.mxu1 %v3458_v9 }
 0xfcf   :  { %6385 = vmatprep.subr.bf16.mxu1 %v3459_v54 }
 0xfd2   :  { %6386 = vmatpush3.bf16.msra.mxu1 %v3459_v54 }
 0xfd5   :  { %6388 = vmatmul.mubr.msk.bf16.vlgmr.msra.gmra.mrb[80].mxu1 %vm405_vm1, %v8655_v1 }
 0xfd6   :  { %6391 = vmatprep.mubr.msk.bf16.mxu1 %vm405_vm1, %v8662_v44 }
 0xfdd   :  { %6392 = vmatmul.mubr.msk.bf16.gmra.mrb[84].mxu1 %vm405_vm1, %v8669_v53 }
 0xfde   :  { %6395 = vmatprep.mubr.msk.bf16.mxu1 %vm405_vm1, %v8676_v40 }
 0xfe5   :  { %6396 = vmatmul.mubr.msk.bf16.gmra.mrb[88].mxu1 %vm405_vm1, %v8683_v52 }
 0xfe6   :  { %6399 = vmatprep.mubr.msk.bf16.mxu1 %vm405_vm1, %v8690_v34 }
 0xfed   :  { %6400 = vmatmul.mubr.msk.bf16.gmra.mrb[92].mxu1 %vm405_vm1, %v8697_v39 }
 0xfee   :  { %6427 = vmatprep.mubr.msk.bf16.mxu1 %vm405_vm1, %v8645_v0 }
0x10a8   :  { %v6389_v1 = vpop.f32.mrb[80].mxu1 }
0x10a9   :  { %3577 = vrot.lane.b32.xlu0 %v6389_v1, %s7698_s3  ;;  %v3494_v44 = vpop.f32.mrb[81].mxu1 }
0x10aa   :  { %v6390_v53 = vpop.f32.mrb[82].mxu1 }
0x10ab   :  { %3579 = vrot.lane.b32.xlu1 %v6390_v53, %s7698_s3  ;;  %v3497_v40 = vpop.f32.mrb[83].mxu1 }
0x10ad   :  { %3573 = vrot.lane.b32.xlu0 %v3494_v44, %s7698_s3 }
0x10af   :  { %3575 = vrot.lane.b32.xlu1 %v3497_v40, %s7698_s3 }
0x10b0   :  { %v6393_v52 = vpop.f32.mrb[84].mxu1 }
0x10b1   :  { %v3510_v34 = vpop.f32.mrb[85].mxu1 }
0x10b2   :  { %3581 = vrot.lane.b32.xlu0 %v3510_v34, %s7698_s3  ;;  %v6394_v39 = vpop.f32.mrb[86].mxu1 }
0x10b3   :  { %v3513_v10 = vpop.f32.mrb[87].mxu1 }
0x10b4   :  { %3583 = vrot.lane.b32.xlu1 %v3513_v10, %s7698_s3 }
0x10b6   :  { %3585 = vrot.lane.b32.xlu0 %v6393_v52, %s7698_s3 }
0x10b8   :  { %3587 = vrot.lane.b32.xlu1 %v6394_v39, %s7698_s3  ;;  %v6397_v0 = vpop.f32.mrb[88].mxu1 }
0x10b9   :  { %v3526_v36 = vpop.f32.mrb[89].mxu1 }
0x10ba   :  { %3593 = vrot.lane.b32.xlu0 %v6397_v0, %s7698_s3  ;;  %v6398_v11 = vpop.f32.mrb[90].mxu1 }
0x10bb   :  { %v3529_v21 = vpop.f32.mrb[91].mxu1 }
0x10bc   :  { %3595 = vrot.lane.b32.xlu1 %v6398_v11, %s7698_s3 }
0x10be   :  { %3589 = vrot.lane.b32.xlu0 %v3526_v36, %s7698_s3 }
0x10c0   :  { %3591 = vrot.lane.b32.xlu1 %v3529_v21, %s7698_s3  ;;  %v6401_v6 = vpop.f32.mrb[92].mxu1 }
0x10c1   :  { %v3542_v29 = vpop.f32.mrb[93].mxu1 }
0x10c2   :  { %3597 = vrot.lane.b32.xlu0 %v3542_v29, %s7698_s3  ;;  %v6402_v32 = vpop.f32.mrb[94].mxu1 }
0x10c3   :  { %v3545_v15 = vpop.f32.mrb[95].mxu1 }
0x10c4   :  { %3599 = vrot.lane.b32.xlu1 %v3545_v15, %s7698_s3 }
0x10c6   :  { %3601 = vrot.lane.b32.xlu0 %v6401_v6, %s7698_s3 }
0x10c8   :  { %3603 = vrot.lane.b32.xlu1 %v6402_v32, %s7698_s3 }
0x10ca   :  { %3717 = vrot.lane.b32.xlu0 %v8856_v62, %s7698_s3 }
0x10cc   :  { %3719 = vrot.lane.b32.xlu1 %v8862_v58, %s7698_s3 }
0x10ce   :  { %3721 = vrot.lane.b32.xlu0 %v8854_v22, %s7698_s3 }
0x10d0   :  { %3723 = vrot.lane.b32.xlu1 %v8859_v37, %s7698_s3 }
0x111b   :  { %v3578_v18 = vpop.permute.xlu0 %3577 }
0x111c   :  { %v3623_v56 = vadd.f32 %v3578_v18, %v8778_v25 }
0x111d   :  { %v3580_v4 = vpop.permute.xlu1 %3579 }
0x111e   :  { %v5858_v43 = vmul.f32 -1.442695, %v3623_v56  ;;  %v3624_v30 = vadd.f32 %v3580_v4, %v8788_v28 }
0x111f   :  { %v3574_v57 = vpop.permute.xlu0 %3573 }
0x1120   :  { %7160 = vpow2.f32 %v5858_v43  ;;  %v5859_v35 = vmul.f32 -1.442695, %v3624_v30  ;;  %v3621_v62 = vadd.f32 %v3574_v57, %v8782_v24 }
0x1121   :  { %v3576_v55 = vpop.permute.xlu1 %3575 }
0x1122   :  { %7162 = vpow2.f32 %v5859_v35  ;;  %v5856_v48 = vmul.f32 -1.442695, %v3621_v62  ;;  %v3622_v22 = vadd.f32 %v3576_v55, %v8792_v45 }
0x1124   :  { %7164 = vpow2.f32 %v5856_v48  ;;  %v5857_v33 = vmul.f32 -1.442695, %v3622_v22  ;;  %v3582_v37 = vpop.permute.xlu0 %3581 }
0x1125   :  { %v3625_v58 = vadd.f32 %v3582_v37, %v8801_v16 }
0x1126   :  { %7166 = vpow2.f32 %v5857_v33  ;;  %v3584_v51 = vpop.permute.xlu1 %3583 }
0x1127   :  { %v5860_v42 = vmul.f32 -1.442695, %v3625_v58  ;;  %v3626_v23 = vadd.f32 %v3584_v51, %v8811_v49 }
0x1128   :  { %v3586_v7 = vpop.permute.xlu0 %3585 }
0x1129   :  { %7168 = vpow2.f32 %v5860_v42  ;;  %v5861_v47 = vmul.f32 -1.442695, %v3626_v23  ;;  %v3627_v8 = vadd.f32 %v3586_v7, %v8796_v26 }
0x112a   :  { %v7161_v60 = vpop.eup %7160  ;;  %v3588_v27 = vpop.permute.xlu1 %3587 }
0x112b   :  { %v3651_v5 = vadd.f32 1.0, %v7161_v60  ;;  %7170 = vpow2.f32 %v5861_v47  ;;  %v5862_v59 = vmul.f32 -1.442695, %v3627_v8  ;;  %v3628_v17 = vadd.f32 %v3588_v27, %v8806_v38 }
0x112c   :  { %v7163_v12 = vpop.eup %7162  ;;  %v3594_v19 = vpop.permute.xlu0 %3593 }
0x112d   :  { %v3652_v2 = vadd.f32 1.0, %v7163_v12  ;;  %v5863_v20 = vmul.f32 -1.442695, %v3628_v17  ;;  %7172 = vpow2.f32 %v5862_v59  ;;  %v3631_v1 = vadd.f32 %v3594_v19, %v8816_v61 }
0x112e   :  { %v7165_v50 = vpop.eup %7164  ;;  %v3596_v54 = vpop.permute.xlu1 %3595  ;;  %7174 = vrcp.f32 %v3651_v5 }
0x112f   :  { %v3649_v9 = vadd.f32 1.0, %v7165_v50  ;;  %7176 = vpow2.f32 %v5863_v20  ;;  %v3632_v29 = vadd.f32 %v3596_v54, %v8825_v3 }
0x1130   :  { %v7167_v44 = vpop.eup %7166  ;;  %v3590_v53 = vpop.permute.xlu0 %3589  ;;  %7178 = vrcp.f32 %v3652_v2 }
0x1131   :  { %v3650_v40 = vadd.f32 1.0, %v7167_v44  ;;  %v3629_v52 = vadd.f32 %v3590_v53, %v8820_v41  ;;  %7180 = vrcp.f32 %v3649_v9 }
0x1132   :  { %v3592_v34 = vpop.permute.xlu1 %3591  ;;  %7182 = vtanh.f32 %v3631_v1 }
0x1133   :  { %v7169_v39 = vpop.eup %7168  ;;  %v3630_v10 = vadd.f32 %v3592_v34, %v8831_v63  ;;  %7184 = vrcp.f32 %v3650_v40 }
0x1134   :  { %v3673_v0 = vadd.f32 1.0, %v7169_v39  ;;  %v3598_v36 = vpop.permute.xlu0 %3597  ;;  %7186 = vtanh.f32 %v3629_v52 }
0x1135   :  { %v7171_v11 = vpop.eup %7170  ;;  %v3633_v21 = vadd.f32 %v3598_v36, %v8842_v14 }
0x1136   :  { %7188 = vrcp.f32 %v3673_v0  ;;  %v3674_v6 = vadd.f32 1.0, %v7171_v11  ;;  %v3600_v32 = vpop.permute.xlu1 %3599 }
0x1137   :  { %7190 = vtanh.f32 %v3630_v10  ;;  %v5864_v15 = vmul.f32 -1.442695, %v3633_v21  ;;  %v3634_v18 = vadd.f32 %v3600_v32, %v8850_v13  ;;  %v7173_v56 = vpop.eup %7172 }
0x1138   :  { %7192 = vrcp.f32 %v3674_v6  ;;  %v3602_v4 = vpop.permute.xlu0 %3601  ;;  %v7175_v43 = vpop.eup %7174  ;;  %v3675_v30 = vadd.f32 1.0, %v7173_v56 }
0x1139   :  { %7194 = vpow2.f32 %v5864_v15  ;;  %v5865_v57 = vmul.f32 -1.442695, %v3634_v18  ;;  %v3635_v35 = vadd.f32 %v3602_v4, %v8838_v46  ;;  %v7177_v62 = vpop.eup %7176 }
0x113a   :  { %7196 = vtanh.f32 %v3632_v29  ;;  %v3604_v55 = vpop.permute.xlu1 %3603  ;;  %v7179_v48 = vpop.eup %7178  ;;  %v3676_v22 = vadd.f32 1.0, %v7177_v62 }
0x113b   :  { %7198 = vrcp.f32 %v3675_v30  ;;  %v5866_v33 = vmul.f32 -1.442695, %v3635_v35  ;;  %v3636_v37 = vadd.f32 %v3604_v55, %v8846_v31  ;;  %v7181_v58 = vpop.eup %7180 }
0x113c   :  { %7200 = vpow2.f32 %v5865_v57  ;;  %v7183_v51 = vpop.eup %7182  ;;  %v3718_v47 = vpop.permute.xlu0 %3717 }
0x113d   :  { %7202 = vrcp.f32 %v3676_v22  ;;  %v5867_v42 = vmul.f32 -1.442695, %v3636_v37  ;;  %v7185_v23 = vpop.eup %7184  ;;  %v3735_v40 = vmul.f32 %v7183_v51, %v7175_v43 }
0x113e   :  { %7204 = vpow2.f32 %v5866_v33  ;;  %v7187_v7 = vpop.eup %7186  ;;  %v3720_v59 = vpop.permute.xlu1 %3719 }
0x113f   :  { %7206 = vpow2.f32 %v5867_v42  ;;  %v3733_v27 = vmul.f32 %v7187_v7, %v7181_v58  ;;  %v8946_v7 = vld [vmem:[%s9506_s5 + $0x10] sm:$0xff]  }
0x1140   :  { %v7189_v8 = vpop.eup %7188  ;;  %v3722_v44 = vpop.permute.xlu0 %3721 }
0x1141   :  { %v7191_v60 = vpop.eup %7190  ;;  %v3729_v5 = vmul.f32 %v7189_v8, %v3718_v47  ;;  %v8953_v47 = vld [vmem:[%s9506_s5 + $0x18] sm:$0xff]   ;;  %v8960_v8 = vld [vmem:[%s9506_s5 + $0x20] sm:$0xff]  }
0x1142   :  { %v7193_v17 = vpop.eup %7192  ;;  %v3734_v2 = vmul.f32 %v7191_v60, %v7185_v23  ;;  %v3724_v10 = vpop.permute.xlu1 %3723  ;;  %v8939_v23 = vld [vmem:[%s9506_s5 + $0x8] sm:$0xff]  }
0x1143   :  { %v7195_v12 = vpop.eup %7194  ;;  %v8922_v19 = vadd.f32 %v3733_v27, %v3729_v5  ;;  %v3730_v20 = vmul.f32 %v7193_v17, %v3720_v59  ;;  %v8967_v60 = vld [vmem:[%s9506_s5 + $0x28] sm:$0xff]   ;;  %v8974_v27 = vld [vmem:[%s9506_s5 + $0x30] sm:$0xff]   ;;  %v8981_v5 = vld [vmem:[%s9506_s5 + $0x38] sm:$0xff]  }
0x1144   :  { %v7197_v50 = vpop.eup %7196  ;;  %v3701_v54 = vadd.f32 1.0, %v7195_v12  ;;  %v8988_v59 = vld [vmem:[%s9506_s5] sm:$0xff]  }
0x1145   :  { %v7199_v9 = vpop.eup %7198  ;;  %7208 = vtanh.f32 %v8922_v19  ;;  %v8925_v1 = vadd.f32 %v3734_v2, %v3730_v20  ;;  %v3736_v11 = vmul.f32 %v7197_v50, %v7179_v48 }
0x1146   :  { %v7201_v53 = vpop.eup %7200  ;;  %7210 = vrcp.f32 %v3701_v54  ;;  %v3731_v52 = vmul.f32 %v7199_v9, %v3722_v44 }
0x1147   :  { %v7203_v34 = vpop.eup %7202  ;;  %v3702_v39 = vadd.f32 1.0, %v7201_v53  ;;  %7212 = vtanh.f32 %v8925_v1 }
0x1148   :  { %v7205_v0 = vpop.eup %7204  ;;  %v8928_v36 = vadd.f32 %v3735_v40, %v3731_v52  ;;  %v3732_v21 = vmul.f32 %v7203_v34, %v3724_v10 }
0x1149   :  { %v7207_v6 = vpop.eup %7206  ;;  %7214 = vrcp.f32 %v3702_v39  ;;  %v3703_v29 = vadd.f32 1.0, %v7205_v0 }
0x114a   :  { %v3704_v32 = vadd.f32 1.0, %v7207_v6  ;;  %7216 = vtanh.f32 %v8928_v36  ;;  %v8931_v15 = vadd.f32 %v3736_v11, %v3732_v21 }
0x114b   :  { %7218 = vrcp.f32 %v3703_v29 }
0x114c   :  { %7220 = vrcp.f32 %v3704_v32 }
0x114d   :  { %7222 = vtanh.f32 %v8931_v15 }
0x114f   :  { %v7209_v18 = vpop.eup %7208 }
0x1150   :  { %v7211_v56 = vpop.eup %7210 }
0x1151   :  { %v7213_v4 = vpop.eup %7212  ;;  %v3745_v57 = vmul.f32 %v7211_v56, %v7209_v18 }
0x1153   :  { %v7215_v43 = vpop.eup %7214 }
0x1154   :  { %v7217_v30 = vpop.eup %7216  ;;  %v3746_v35 = vmul.f32 %v7215_v43, %v7213_v4 }
0x1155   :  { %v7219_v62 = vpop.eup %7218 }
0x1156   :  { %v7221_v55 = vpop.eup %7220  ;;  %v3749_v48 = vpack.c.bf16 %v3746_v35, %v3745_v57  ;;  %v3747_v33 = vmul.f32 %v7219_v62, %v7217_v30 }
0x1157   :  { %v7223_v22 = vpop.eup %7222 }
0x1158   :  { %3753 = vrot.lane.b32.xlu0 %v3749_v48, %s7699_s29  ;;  %v3748_v37 = vmul.f32 %v7223_v22, %v7221_v55 }
0x115a   :  { %v3750_v58 = vpack.c.bf16 %v3748_v37, %v3747_v33 }
0x115c   :  { %3755 = vrot.lane.b32.xlu1 %v3750_v58, %s7699_s29 }
0x11ca   :  { %v3754_v51 = vpop.permute.xlu0 %3753 }
0x11cb   :  { %6403 = vmatprep.subr.bf16.mxu0 %v3754_v51 }
0x11cc   :  { %6404 = vmatpush3.bf16.msra.mxu0 %v3754_v51 }
0x11ce   :  { %v3756_v42 = vpop.permute.xlu1 %3755 }
0x11cf   :  { %6405 = vmatprep.subr.bf16.mxu0 %v3756_v42 }
0x11d0   :  { %6406 = vmatpush3.bf16.msra.mxu0 %v3756_v42 }
0x11d3   :  { %6408 = vmatmul.mubr.msk.bf16.vlgmr.msra.gmra.mrb[96].mxu0 %vm405_vm1, %v8939_v23 }
0x11d4   :  { %6411 = vmatprep.mubr.msk.bf16.mxu0 %vm405_vm1, %v8946_v7 }
0x11db   :  { %6412 = vmatmul.mubr.msk.bf16.gmra.mrb[100].mxu0 %vm405_vm1, %v8953_v47 }
0x11dc   :  { %6415 = vmatprep.mubr.msk.bf16.mxu0 %vm405_vm1, %v8960_v8 }
0x11e3   :  { %6416 = vmatmul.mubr.msk.bf16.gmra.mrb[104].mxu0 %vm405_vm1, %v8967_v60 }
0x11e4   :  { %6419 = vmatprep.mubr.msk.bf16.mxu0 %vm405_vm1, %v8974_v27 }
0x11eb   :  { %6420 = vmatmul.mubr.msk.bf16.gmra.mrb[108].mxu0 %vm405_vm1, %v8981_v5 }
0x11ec   :  { %6447 = vmatprep.mubr.msk.bf16.mxu0 %vm405_vm1, %v8988_v59 }
0x12a6   :  { %v6409_v17 = vpop.f32.mrb[96].mxu0 }
0x12a7   :  { %3876 = vrot.lane.b32.xlu0 %v6409_v17, %s7700_s17  ;;  %v3793_v12 = vpop.f32.mrb[97].mxu0 }
0x12a8   :  { %v6410_v2 = vpop.f32.mrb[98].mxu0 }
0x12a9   :  { %3878 = vrot.lane.b32.xlu1 %v6410_v2, %s7700_s17  ;;  %v3796_v20 = vpop.f32.mrb[99].mxu0 }
0x12ab   :  { %3872 = vrot.lane.b32.xlu0 %v3793_v12, %s7700_s17 }
0x12ad   :  { %3874 = vrot.lane.b32.xlu1 %v3796_v20, %s7700_s17 }
0x12ae   :  { %v6413_v50 = vpop.f32.mrb[100].mxu0 }
0x12af   :  { %v3809_v54 = vpop.f32.mrb[101].mxu0 }
0x12b0   :  { %3880 = vrot.lane.b32.xlu0 %v3809_v54, %s7700_s17  ;;  %v6414_v9 = vpop.f32.mrb[102].mxu0 }
0x12b1   :  { %v3812_v44 = vpop.f32.mrb[103].mxu0 }
0x12b2   :  { %3882 = vrot.lane.b32.xlu1 %v3812_v44, %s7700_s17 }
0x12b4   :  { %3884 = vrot.lane.b32.xlu0 %v6413_v50, %s7700_s17 }
0x12b6   :  { %3886 = vrot.lane.b32.xlu1 %v6414_v9, %s7700_s17  ;;  %v6417_v53 = vpop.f32.mrb[104].mxu0 }
0x12b7   :  { %v3825_v40 = vpop.f32.mrb[105].mxu0 }
0x12b8   :  { %3892 = vrot.lane.b32.xlu0 %v6417_v53, %s7700_s17  ;;  %v6418_v52 = vpop.f32.mrb[106].mxu0 }
0x12b9   :  { %v3828_v34 = vpop.f32.mrb[107].mxu0 }
0x12ba   :  { %3894 = vrot.lane.b32.xlu1 %v6418_v52, %s7700_s17 }
0x12bc   :  { %3888 = vrot.lane.b32.xlu0 %v3825_v40, %s7700_s17 }
0x12be   :  { %3890 = vrot.lane.b32.xlu1 %v3828_v34, %s7700_s17  ;;  %v6421_v39 = vpop.f32.mrb[108].mxu0 }
0x12bf   :  { %v3841_v10 = vpop.f32.mrb[109].mxu0 }
0x12c0   :  { %3896 = vrot.lane.b32.xlu0 %v3841_v10, %s7700_s17  ;;  %v6422_v0 = vpop.f32.mrb[110].mxu0 }
0x12c1   :  { %v3844_v11 = vpop.f32.mrb[111].mxu0 }
0x12c2   :  { %3898 = vrot.lane.b32.xlu1 %v3844_v11, %s7700_s17 }
0x12c4   :  { %3900 = vrot.lane.b32.xlu0 %v6421_v39, %s7700_s17 }
0x12c6   :  { %3902 = vrot.lane.b32.xlu1 %v6422_v0, %s7700_s17 }
0x12c8   :  { %4016 = vrot.lane.b32.xlu0 %v8922_v19, %s7698_s3 }
0x12ca   :  { %4018 = vrot.lane.b32.xlu1 %v8925_v1, %s7698_s3 }
0x12cc   :  { %4020 = vrot.lane.b32.xlu0 %v8928_v36, %s7698_s3 }
0x12ce   :  { %4022 = vrot.lane.b32.xlu1 %v8931_v15, %s7698_s3 }
0x1319   :  { %v3877_v21 = vpop.permute.xlu0 %3876 }
0x131a   :  { %v3922_v6 = vadd.f32 %v3877_v21, %v8778_v25 }
0x131b   :  { %v3879_v29 = vpop.permute.xlu1 %3878 }
0x131c   :  { %v5878_v32 = vmul.f32 -1.442695, %v3922_v6  ;;  %v3923_v18 = vadd.f32 %v3879_v29, %v8788_v28 }
0x131d   :  { %v3873_v56 = vpop.permute.xlu0 %3872 }
0x131e   :  { %7224 = vpow2.f32 %v5878_v32  ;;  %v5879_v4 = vmul.f32 -1.442695, %v3923_v18  ;;  %v3920_v19 = vadd.f32 %v3873_v56, %v8782_v24 }
0x131f   :  { %v3875_v43 = vpop.permute.xlu1 %3874 }
0x1320   :  { %7226 = vpow2.f32 %v5879_v4  ;;  %v5876_v1 = vmul.f32 -1.442695, %v3920_v19  ;;  %v3921_v36 = vadd.f32 %v3875_v43, %v8792_v45 }
0x1322   :  { %7228 = vpow2.f32 %v5876_v1  ;;  %v5877_v30 = vmul.f32 -1.442695, %v3921_v36  ;;  %v3881_v15 = vpop.permute.xlu0 %3880 }
0x1323   :  { %v3924_v57 = vadd.f32 %v3881_v15, %v8801_v16 }
0x1324   :  { %7230 = vpow2.f32 %v5877_v30  ;;  %v3883_v25 = vpop.permute.xlu1 %3882 }
0x1325   :  { %v5880_v35 = vmul.f32 -1.442695, %v3924_v57  ;;  %v3925_v28 = vadd.f32 %v3883_v25, %v8811_v49 }
0x1326   :  { %v3885_v62 = vpop.permute.xlu0 %3884 }
0x1327   :  { %7232 = vpow2.f32 %v5880_v35  ;;  %v5881_v55 = vmul.f32 -1.442695, %v3925_v28  ;;  %v3926_v24 = vadd.f32 %v3885_v62, %v8796_v26 }
0x1328   :  { %v7225_v48 = vpop.eup %7224  ;;  %v3887_v22 = vpop.permute.xlu1 %3886 }
0x1329   :  { %v3950_v33 = vadd.f32 1.0, %v7225_v48  ;;  %7234 = vpow2.f32 %v5881_v55  ;;  %v5882_v45 = vmul.f32 -1.442695, %v3926_v24  ;;  %v3927_v37 = vadd.f32 %v3887_v22, %v8806_v38 }
0x132a   :  { %v7227_v58 = vpop.eup %7226  ;;  %v3893_v51 = vpop.permute.xlu0 %3892 }
0x132b   :  { %v3951_v16 = vadd.f32 1.0, %v7227_v58  ;;  %v5883_v42 = vmul.f32 -1.442695, %v3927_v37  ;;  %7236 = vpow2.f32 %v5882_v45  ;;  %v3930_v2 = vadd.f32 %v3893_v51, %v8816_v61 }
0x132c   :  { %v7229_v17 = vpop.eup %7228  ;;  %v3895_v12 = vpop.permute.xlu1 %3894  ;;  %7238 = vrcp.f32 %v3950_v33 }
0x132d   :  { %v3948_v49 = vadd.f32 1.0, %v7229_v17  ;;  %7240 = vpow2.f32 %v5883_v42  ;;  %v3931_v39 = vadd.f32 %v3895_v12, %v8825_v3 }
0x132e   :  { %v7231_v20 = vpop.eup %7230  ;;  %v3889_v26 = vpop.permute.xlu0 %3888  ;;  %7242 = vrcp.f32 %v3951_v16 }
0x132f   :  { %v3949_v50 = vadd.f32 1.0, %v7231_v20  ;;  %v3928_v54 = vadd.f32 %v3889_v26, %v8820_v41  ;;  %7244 = vrcp.f32 %v3948_v49 }
0x1330   :  { %v3891_v38 = vpop.permute.xlu1 %3890  ;;  %7246 = vtanh.f32 %v3930_v2 }
0x1331   :  { %v7233_v9 = vpop.eup %7232  ;;  %v3929_v44 = vadd.f32 %v3891_v38, %v8831_v63  ;;  %7248 = vrcp.f32 %v3949_v50 }
0x1332   :  { %v3972_v53 = vadd.f32 1.0, %v7233_v9  ;;  %v3897_v40 = vpop.permute.xlu0 %3896  ;;  %7250 = vtanh.f32 %v3928_v54 }
0x1333   :  { %v7235_v52 = vpop.eup %7234  ;;  %v3932_v61 = vadd.f32 %v3897_v40, %v8842_v14 }
0x1334   :  { %7252 = vrcp.f32 %v3972_v53  ;;  %v3973_v34 = vadd.f32 1.0, %v7235_v52  ;;  %v3899_v10 = vpop.permute.xlu1 %3898 }
0x1335   :  { %7254 = vtanh.f32 %v3929_v44  ;;  %v5884_v41 = vmul.f32 -1.442695, %v3932_v61  ;;  %v3933_v0 = vadd.f32 %v3899_v10, %v8850_v13  ;;  %v7237_v11 = vpop.eup %7236 }
0x1336   :  { %7256 = vrcp.f32 %v3973_v34  ;;  %v3901_v21 = vpop.permute.xlu0 %3900  ;;  %v7239_v63 = vpop.eup %7238  ;;  %v3974_v6 = vadd.f32 1.0, %v7237_v11 }
0x1337   :  { %7258 = vpow2.f32 %v5884_v41  ;;  %v5885_v29 = vmul.f32 -1.442695, %v3933_v0  ;;  %v3934_v32 = vadd.f32 %v3901_v21, %v8838_v46  ;;  %v7241_v18 = vpop.eup %7240 }
0x1338   :  { %7260 = vtanh.f32 %v3931_v39  ;;  %v3903_v14 = vpop.permute.xlu1 %3902  ;;  %v7243_v56 = vpop.eup %7242  ;;  %v3975_v3 = vadd.f32 1.0, %v7241_v18 }
0x1339   :  { %7262 = vrcp.f32 %v3974_v6  ;;  %v5886_v4 = vmul.f32 -1.442695, %v3934_v32  ;;  %v3935_v19 = vadd.f32 %v3903_v14, %v8846_v31  ;;  %v7245_v43 = vpop.eup %7244 }
0x133a   :  { %7264 = vpow2.f32 %v5885_v29  ;;  %v7247_v13 = vpop.eup %7246  ;;  %v4017_v15 = vpop.permute.xlu0 %4016 }
0x133b   :  { %7266 = vrcp.f32 %v3975_v3  ;;  %v5887_v1 = vmul.f32 -1.442695, %v3935_v19  ;;  %v7249_v36 = vpop.eup %7248  ;;  %v4034_v16 = vmul.f32 %v7247_v13, %v7239_v63 }
0x133c   :  { %7268 = vpow2.f32 %v5886_v4  ;;  %v7251_v30 = vpop.eup %7250  ;;  %v4019_v28 = vpop.permute.xlu1 %4018 }
0x133d   :  { %7270 = vpow2.f32 %v5887_v1  ;;  %v4032_v25 = vmul.f32 %v7251_v30, %v7245_v43 }
0x133e   :  { %v7253_v46 = vpop.eup %7252  ;;  %v4021_v58 = vpop.permute.xlu0 %4020 }
0x133f   :  { %v7255_v57 = vpop.eup %7254  ;;  %v4028_v35 = vmul.f32 %v7253_v46, %v4017_v15 }
0x1340   :  { %v7257_v62 = vpop.eup %7256  ;;  %v4033_v31 = vmul.f32 %v7255_v57, %v7249_v36  ;;  %v4023_v49 = vpop.permute.xlu1 %4022 }
0x1341   :  { %v7259_v55 = vpop.eup %7258  ;;  %v9032_v24 = vadd.f32 %v4032_v25, %v4028_v35  ;;  %v4029_v48 = vmul.f32 %v7257_v62, %v4019_v28 }
0x1342   :  { %v7261_v22 = vpop.eup %7260  ;;  %v4000_v33 = vadd.f32 1.0, %v7259_v55  ;;  %v9086_v55 = vld [vmem:[#allocation2 + $0x10] sm:$0xff] }
0x1343   :  { %v7263_v45 = vpop.eup %7262  ;;  %7272 = vtanh.f32 %v9032_v24  ;;  %v9035_v37 = vadd.f32 %v4033_v31, %v4029_v48  ;;  %v4035_v26 = vmul.f32 %v7261_v22, %v7243_v56 }
0x1344   :  { %v7265_v51 = vpop.eup %7264  ;;  %7274 = vrcp.f32 %v4000_v33  ;;  %v4030_v42 = vmul.f32 %v7263_v45, %v4021_v58  ;;  %v9089_v33 = vld [vmem:[#allocation2 + $0x18] sm:$0xff]  ;;  %v9092_v58 = vld [vmem:[#allocation2] sm:$0xff] }
0x1345   :  { %v7267_v17 = vpop.eup %7266  ;;  %v4001_v12 = vadd.f32 1.0, %v7265_v51  ;;  %7276 = vtanh.f32 %v9035_v37 }
0x1346   :  { %v7269_v2 = vpop.eup %7268  ;;  %v9038_v20 = vadd.f32 %v4034_v16, %v4030_v42  ;;  %v4031_v50 = vmul.f32 %v7267_v17, %v4023_v49  ;;  %v9095_v17 = vld [vmem:[#allocation2 + $0x8] sm:$0xff] }
0x1347   :  { %v7271_v54 = vpop.eup %7270  ;;  %7278 = vrcp.f32 %v4001_v12  ;;  %v4002_v38 = vadd.f32 1.0, %v7269_v2 }
0x1348   :  { %v4003_v9 = vadd.f32 1.0, %v7271_v54  ;;  %7280 = vtanh.f32 %v9038_v20  ;;  %v9041_v44 = vadd.f32 %v4035_v26, %v4031_v50 }
0x1349   :  { %7282 = vrcp.f32 %v4002_v38  ;;  %v9101_v38 = vld [vmem:[#allocation2 + $0x28] sm:$0xff] }
0x134a   :  { %7284 = vrcp.f32 %v4003_v9 }
0x134b   :  { %7286 = vtanh.f32 %v9041_v44 }
0x134d   :  { %v7273_v53 = vpop.eup %7272 }
0x134e   :  { %v7275_v40 = vpop.eup %7274 }
0x134f   :  { %v7277_v52 = vpop.eup %7276  ;;  %v4044_v39 = vmul.f32 %v7275_v40, %v7273_v53  ;;  %v9104_v40 = vld [vmem:[#allocation2 + $0x30] sm:$0xff] }
0x1351   :  { %v7279_v61 = vpop.eup %7278 }
0x1352   :  { %v7281_v34 = vpop.eup %7280  ;;  %v4045_v10 = vmul.f32 %v7279_v61, %v7277_v52 }
0x1353   :  { %v7283_v41 = vpop.eup %7282 }
0x1354   :  { %v7285_v0 = vpop.eup %7284  ;;  %v4048_v11 = vpack.c.bf16 %v4045_v10, %v4044_v39  ;;  %v4046_v63 = vmul.f32 %v7283_v41, %v7281_v34  ;;  %v9107_v41 = vld [vmem:[#allocation2 + $0x38] sm:$0xff] }
0x1355   :  { %v7287_v21 = vpop.eup %7286 }
0x1356   :  { %4052 = vrot.lane.b32.xlu0 %v4048_v11, %s7701_s18  ;;  %v4047_v6 = vmul.f32 %v7287_v21, %v7285_v0 }
0x1358   :  { %v4049_v29 = vpack.c.bf16 %v4047_v6, %v4046_v63 }
0x135a   :  { %4054 = vrot.lane.b32.xlu1 %v4049_v29, %s7701_s18 }
0x13c8   :  { %v4053_v32 = vpop.permute.xlu0 %4052 }
0x13c9   :  { %6423 = vmatprep.subr.bf16.mxu1 %v4053_v32 }
0x13ca   :  { %6424 = vmatpush3.bf16.msra.mxu1 %v4053_v32 }
0x13cc   :  { %v4055_v18 = vpop.permute.xlu1 %4054 }
0x13cd   :  { %6425 = vmatprep.subr.bf16.mxu1 %v4055_v18 }
0x13ce   :  { %6426 = vmatpush3.bf16.msra.mxu1 %v4055_v18 }
0x13d1   :  { %6428 = vmatmul.mubr.msk.bf16.vlgmr.msra.gmra.mrb[96].mxu1 %vm405_vm1, %v8939_v23 }
0x13d2   :  { %6431 = vmatprep.mubr.msk.bf16.mxu1 %vm405_vm1, %v8946_v7 }
0x13d9   :  { %6432 = vmatmul.mubr.msk.bf16.gmra.mrb[100].mxu1 %vm405_vm1, %v8953_v47 }
0x13da   :  { %6435 = vmatprep.mubr.msk.bf16.mxu1 %vm405_vm1, %v8960_v8 }
0x13e1   :  { %6436 = vmatmul.mubr.msk.bf16.gmra.mrb[104].mxu1 %vm405_vm1, %v8967_v60 }
0x13e2   :  { %6439 = vmatprep.mubr.msk.bf16.mxu1 %vm405_vm1, %v8974_v27 }
0x13e9   :  { %6440 = vmatmul.mubr.msk.bf16.gmra.mrb[108].mxu1 %vm405_vm1, %v8981_v5 }
0x13ea   :  { %6467 = vmatprep.mubr.msk.bf16.mxu1 %vm405_vm1, %v8988_v59 }
0x14a4   :  { %v6429_v14 = vpop.f32.mrb[96].mxu1 }
0x14a5   :  { %4175 = vrot.lane.b32.xlu0 %v6429_v14, %s7702_s25  ;;  %v4092_v56 = vpop.f32.mrb[97].mxu1  ;;  %v9110_v14 = vld [vmem:[#allocation2 + $0x50] sm:$0xff] }
0x14a6   :  { %v6430_v3 = vpop.f32.mrb[98].mxu1 }
0x14a7   :  { %4177 = vrot.lane.b32.xlu1 %v6430_v3, %s7702_s25  ;;  %v4095_v4 = vpop.f32.mrb[99].mxu1 }
0x14a9   :  { %4171 = vrot.lane.b32.xlu0 %v4092_v56, %s7702_s25 }
0x14ab   :  { %4173 = vrot.lane.b32.xlu1 %v4095_v4, %s7702_s25 }
0x14ac   :  { %v6433_v19 = vpop.f32.mrb[100].mxu1 }
0x14ad   :  { %v4108_v43 = vpop.f32.mrb[101].mxu1 }
0x14ae   :  { %4179 = vrot.lane.b32.xlu0 %v4108_v43, %s7702_s25  ;;  %v6434_v13 = vpop.f32.mrb[102].mxu1  ;;  %v9113_v43 = vld [vmem:[#allocation2 + $0x40] sm:$0xff] }
0x14af   :  { %v4111_v1 = vpop.f32.mrb[103].mxu1 }
0x14b0   :  { %4181 = vrot.lane.b32.xlu1 %v4111_v1, %s7702_s25 }
0x14b2   :  { %4183 = vrot.lane.b32.xlu0 %v6433_v19, %s7702_s25 }
0x14b4   :  { %4185 = vrot.lane.b32.xlu1 %v6434_v13, %s7702_s25  ;;  %v6437_v36 = vpop.f32.mrb[104].mxu1 }
0x14b5   :  { %v4124_v30 = vpop.f32.mrb[105].mxu1 }
0x14b6   :  { %4191 = vrot.lane.b32.xlu0 %v6437_v36, %s7702_s25  ;;  %v6438_v15 = vpop.f32.mrb[106].mxu1 }
0x14b7   :  { %v4127_v46 = vpop.f32.mrb[107].mxu1 }
0x14b8   :  { %4193 = vrot.lane.b32.xlu1 %v6438_v15, %s7702_s25 }
0x14ba   :  { %4187 = vrot.lane.b32.xlu0 %v4124_v30, %s7702_s25  ;;  %v9116_v30 = vld [vmem:[#allocation2 + $0x48] sm:$0xff] }
0x14bc   :  { %4189 = vrot.lane.b32.xlu1 %v4127_v46, %s7702_s25  ;;  %v6441_v57 = vpop.f32.mrb[108].mxu1 }
0x14bd   :  { %v4140_v25 = vpop.f32.mrb[109].mxu1 }
0x14be   :  { %4195 = vrot.lane.b32.xlu0 %v4140_v25, %s7702_s25  ;;  %v6442_v35 = vpop.f32.mrb[110].mxu1 }
0x14bf   :  { %v4143_v28 = vpop.f32.mrb[111].mxu1 }
0x14c0   :  { %4197 = vrot.lane.b32.xlu1 %v4143_v28, %s7702_s25 }
0x14c2   :  { %4199 = vrot.lane.b32.xlu0 %v6441_v57, %s7702_s25 }
0x14c4   :  { %4201 = vrot.lane.b32.xlu1 %v6442_v35, %s7702_s25  ;;  %v9119_v35 = vld [vmem:[#allocation2 + $0x60] sm:$0xff] }
0x14c6   :  { %4315 = vrot.lane.b32.xlu0 %v9032_v24, %s7698_s3 }
0x14c8   :  { %4317 = vrot.lane.b32.xlu1 %v9035_v37, %s7698_s3 }
0x14ca   :  { %4319 = vrot.lane.b32.xlu0 %v9038_v20, %s7698_s3  ;;  %v9098_v20 = vld [vmem:[#allocation2 + $0x20] sm:$0xff] }
0x14cc   :  { %4321 = vrot.lane.b32.xlu1 %v9041_v44, %s7698_s3 }
0x1517   :  { %v4176_v62 = vpop.permute.xlu0 %4175 }
0x1518   :  { %v4221_v31 = vadd.f32 %v9086_v55, %v4176_v62 }
0x1519   :  { %v4178_v48 = vpop.permute.xlu1 %4177 }
0x151a   :  { %v5898_v22 = vmul.f32 -1.442695, %v4221_v31  ;;  %v4222_v24 = vadd.f32 %v9089_v33, %v4178_v48  ;;  %v9122_v31 = vld [vmem:[#allocation2 + $0x58] sm:$0xff] }
0x151b   :  { %v4172_v45 = vpop.permute.xlu0 %4171 }
0x151c   :  { %7288 = vpow2.f32 %v5898_v22  ;;  %v5899_v37 = vmul.f32 -1.442695, %v4222_v24  ;;  %v4219_v51 = vadd.f32 %v9092_v58, %v4172_v45  ;;  %v9125_v45 = vld [vmem:[#allocation2 + $0x68] sm:$0xff] }
0x151d   :  { %v4174_v16 = vpop.permute.xlu1 %4173 }
0x151e   :  { %7290 = vpow2.f32 %v5899_v37  ;;  %v5896_v42 = vmul.f32 -1.442695, %v4219_v51  ;;  %v4220_v12 = vadd.f32 %v9095_v17, %v4174_v16 }
0x1520   :  { %7292 = vpow2.f32 %v5896_v42  ;;  %v5897_v49 = vmul.f32 -1.442695, %v4220_v12  ;;  %v4180_v2 = vpop.permute.xlu0 %4179 }
0x1521   :  { %v4223_v26 = vadd.f32 %v9098_v20, %v4180_v2  ;;  %v9128_v2 = vld [vmem:[#allocation2 + $0x70] sm:$0xff] }
0x1522   :  { %7294 = vpow2.f32 %v5897_v49  ;;  %v4182_v50 = vpop.permute.xlu1 %4181 }
0x1523   :  { %v5900_v54 = vmul.f32 -1.442695, %v4223_v26  ;;  %v4224_v9 = vadd.f32 %v9101_v38, %v4182_v50 }
0x1524   :  { %v4184_v44 = vpop.permute.xlu0 %4183 }
0x1525   :  { %7296 = vpow2.f32 %v5900_v54  ;;  %v5901_v53 = vmul.f32 -1.442695, %v4224_v9  ;;  %v4225_v52 = vadd.f32 %v9104_v40, %v4184_v44 }
0x1526   :  { %v7289_v61 = vpop.eup %7288  ;;  %v4186_v34 = vpop.permute.xlu1 %4185 }
0x1527   :  { %v4249_v39 = vadd.f32 1.0, %v7289_v61  ;;  %7298 = vpow2.f32 %v5901_v53  ;;  %v5902_v10 = vmul.f32 -1.442695, %v4225_v52  ;;  %v4226_v0 = vadd.f32 %v9107_v41, %v4186_v34  ;;  %v9131_v52 = vld [vmem:[#allocation2 + $0x78] sm:$0xff] }
0x1528   :  { %v7291_v11 = vpop.eup %7290  ;;  %v4192_v21 = vpop.permute.xlu0 %4191 }
0x1529   :  { %v4250_v63 = vadd.f32 1.0, %v7291_v11  ;;  %v5903_v6 = vmul.f32 -1.442695, %v4226_v0  ;;  %7300 = vpow2.f32 %v5902_v10  ;;  %v4229_v56 = vadd.f32 %v9110_v14, %v4192_v21 }
0x152a   :  { %v7293_v29 = vpop.eup %7292  ;;  %v4194_v32 = vpop.permute.xlu1 %4193  ;;  %7302 = vrcp.f32 %v4249_v39 }
0x152b   :  { %v4247_v18 = vadd.f32 1.0, %v7293_v29  ;;  %7304 = vpow2.f32 %v5903_v6  ;;  %v4230_v48 = vadd.f32 %v9122_v31, %v4194_v32 }
0x152c   :  { %v7295_v3 = vpop.eup %7294  ;;  %v4188_v4 = vpop.permute.xlu0 %4187  ;;  %7306 = vrcp.f32 %v4250_v63 }
0x152d   :  { %v4248_v19 = vadd.f32 1.0, %v7295_v3  ;;  %v4227_v13 = vadd.f32 %v9113_v43, %v4188_v4  ;;  %7308 = vrcp.f32 %v4247_v18 }
0x152e   :  { %v4190_v1 = vpop.permute.xlu1 %4189  ;;  %7310 = vtanh.f32 %v4229_v56 }
0x152f   :  { %v7297_v36 = vpop.eup %7296  ;;  %v4228_v15 = vadd.f32 %v9116_v30, %v4190_v1  ;;  %7312 = vrcp.f32 %v4248_v19 }
0x1530   :  { %v4271_v46 = vadd.f32 1.0, %v7297_v36  ;;  %v4196_v57 = vpop.permute.xlu0 %4195  ;;  %7314 = vtanh.f32 %v4227_v13 }
0x1531   :  { %v7299_v25 = vpop.eup %7298  ;;  %v4231_v28 = vadd.f32 %v9119_v35, %v4196_v57 }
0x1532   :  { %7316 = vrcp.f32 %v4271_v46  ;;  %v4272_v62 = vadd.f32 1.0, %v7299_v25  ;;  %v4198_v22 = vpop.permute.xlu1 %4197 }
0x1533   :  { %7318 = vtanh.f32 %v4228_v15  ;;  %v5904_v24 = vmul.f32 -1.442695, %v4231_v28  ;;  %v4232_v37 = vadd.f32 %v9125_v45, %v4198_v22  ;;  %v7301_v51 = vpop.eup %7300 }
0x1534   :  { %7320 = vrcp.f32 %v4272_v62  ;;  %v4200_v16 = vpop.permute.xlu0 %4199  ;;  %v7303_v42 = vpop.eup %7302  ;;  %v4273_v12 = vadd.f32 1.0, %v7301_v51 }
0x1535   :  { %7322 = vpow2.f32 %v5904_v24  ;;  %v5905_v49 = vmul.f32 -1.442695, %v4232_v37  ;;  %v4233_v26 = vadd.f32 %v9128_v2, %v4200_v16  ;;  %v7305_v50 = vpop.eup %7304 }
0x1536   :  { %7324 = vtanh.f32 %v4230_v48  ;;  %v4202_v54 = vpop.permute.xlu1 %4201  ;;  %v7307_v9 = vpop.eup %7306  ;;  %v4274_v44 = vadd.f32 1.0, %v7305_v50 }
0x1537   :  { %7326 = vrcp.f32 %v4273_v12  ;;  %v5906_v53 = vmul.f32 -1.442695, %v4233_v26  ;;  %v4234_v61 = vadd.f32 %v9131_v52, %v4202_v54  ;;  %v7309_v34 = vpop.eup %7308 }
0x1538   :  { %7328 = vpow2.f32 %v5905_v49  ;;  %v7311_v39 = vpop.eup %7310  ;;  %v4316_v21 = vpop.permute.xlu0 %4315 }
0x1539   :  { %7330 = vrcp.f32 %v4274_v44  ;;  %v5907_v10 = vmul.f32 -1.442695, %v4234_v61  ;;  %v7313_v0 = vpop.eup %7312  ;;  %v4333_v28 = vmul.f32 %v7311_v39, %v7303_v42 }
0x153a   :  { %7332 = vpow2.f32 %v5906_v53  ;;  %v7315_v11 = vpop.eup %7314  ;;  %v4318_v18 = vpop.permute.xlu1 %4317 }
0x153b   :  { %7334 = vpow2.f32 %v5907_v10  ;;  %v4331_v29 = vmul.f32 %v7315_v11, %v7309_v34 }
0x153c   :  { %v7317_v63 = vpop.eup %7316  ;;  %v4320_v57 = vpop.permute.xlu0 %4319 }
0x153d   :  { %v7319_v6 = vpop.eup %7318  ;;  %v4327_v32 = vmul.f32 %v7317_v63, %v4316_v21 }
0x153e   :  { %v7321_v56 = vpop.eup %7320  ;;  %v4332_v19 = vmul.f32 %v7319_v6, %v7313_v0  ;;  %v4322_v24 = vpop.permute.xlu1 %4321 }
0x153f   :  { %v7323_v3 = vpop.eup %7322  ;;  %v9134_v4 = vadd.f32 %v4331_v29, %v4327_v32  ;;  %v4328_v13 = vmul.f32 %v7321_v56, %v4318_v18 }
0x1540   :  { %v7325_v1 = vpop.eup %7324  ;;  %v4299_v36 = vadd.f32 1.0, %v7323_v3 }
0x1541   :  { %v7327_v15 = vpop.eup %7326  ;;  %7336 = vtanh.f32 %v9134_v4  ;;  %v9137_v46 = vadd.f32 %v4332_v19, %v4328_v13  ;;  %v4334_v16 = vmul.f32 %v7325_v1, %v7307_v9 }
0x1542   :  { %v7329_v25 = vpop.eup %7328  ;;  %7338 = vrcp.f32 %v4299_v36  ;;  %v4329_v62 = vmul.f32 %v7327_v15, %v4320_v57 }
0x1543   :  { %v7331_v48 = vpop.eup %7330  ;;  %v4300_v22 = vadd.f32 1.0, %v7329_v25  ;;  %7340 = vtanh.f32 %v9137_v46 }
0x1544   :  { %v7333_v37 = vpop.eup %7332  ;;  %v9140_v51 = vadd.f32 %v4333_v28, %v4329_v62  ;;  %v4330_v12 = vmul.f32 %v7331_v48, %v4322_v24 }
0x1545   :  { %v7335_v49 = vpop.eup %7334  ;;  %7342 = vrcp.f32 %v4300_v22  ;;  %v4301_v26 = vadd.f32 1.0, %v7333_v37 }
0x1546   :  { %v4302_v50 = vadd.f32 1.0, %v7335_v49  ;;  %7344 = vtanh.f32 %v9140_v51  ;;  %v9143_v54 = vadd.f32 %v4334_v16, %v4330_v12 }
0x1547   :  { %7346 = vrcp.f32 %v4301_v26 }
0x1548   :  { %7348 = vrcp.f32 %v4302_v50 }
0x1549   :  { %7350 = vtanh.f32 %v9143_v54 }
0x154b   :  { %v7337_v42 = vpop.eup %7336 }
0x154c   :  { %v7339_v44 = vpop.eup %7338 }
0x154d   :  { %v7341_v53 = vpop.eup %7340  ;;  %v4343_v39 = vmul.f32 %v7339_v44, %v7337_v42 }
0x154f   :  { %v7343_v61 = vpop.eup %7342 }
0x1550   :  { %v7345_v34 = vpop.eup %7344  ;;  %v4344_v9 = vmul.f32 %v7343_v61, %v7341_v53 }
0x1551   :  { %v7347_v10 = vpop.eup %7346 }
0x1552   :  { %v7349_v0 = vpop.eup %7348  ;;  %v4347_v11 = vpack.c.bf16 %v4344_v9, %v4343_v39  ;;  %v4345_v63 = vmul.f32 %v7347_v10, %v7345_v34 }
0x1553   :  { %v7351_v21 = vpop.eup %7350 }
0x1554   :  { %4351 = vrot.lane.b32.xlu0 %v4347_v11, %s7703_s26  ;;  %v4346_v6 = vmul.f32 %v7351_v21, %v7349_v0 }
0x1556   :  { %v4348_v29 = vpack.c.bf16 %v4346_v6, %v4345_v63 }
0x1558   :  { %4353 = vrot.lane.b32.xlu1 %v4348_v29, %s7703_s26 }
0x15c6   :  { %v4352_v32 = vpop.permute.xlu0 %4351 }
0x15c7   :  { %6443 = vmatprep.subr.bf16.mxu0 %v4352_v32 }
0x15c8   :  { %6444 = vmatpush3.bf16.msra.mxu0 %v4352_v32 }
0x15ca   :  { %v4354_v18 = vpop.permute.xlu1 %4353 }
0x15cb   :  { %6445 = vmatprep.subr.bf16.mxu0 %v4354_v18 }
0x15cc   :  { %6446 = vmatpush3.bf16.msra.mxu0 %v4354_v18 }
0x15cf   :  { %6448 = vmatmul.mubr.msk.bf16.vlgmr.msra.gmra.mrb[112].mxu0 %vm405_vm1, %v8939_v23 }
0x15d0   :  { %6451 = vmatprep.mubr.msk.bf16.mxu0 %vm405_vm1, %v8946_v7 }
0x15d7   :  { %6452 = vmatmul.mubr.msk.bf16.gmra.mrb[116].mxu0 %vm405_vm1, %v8953_v47 }
0x15d8   :  { %6455 = vmatprep.mubr.msk.bf16.mxu0 %vm405_vm1, %v8960_v8 }
0x15df   :  { %6456 = vmatmul.mubr.msk.bf16.gmra.mrb[120].mxu0 %vm405_vm1, %v8967_v60 }
0x15e0   :  { %6459 = vmatprep.mubr.msk.bf16.mxu0 %vm405_vm1, %v8974_v27 }
0x15e7   :  { %6460 = vmatmul.mubr.msk.bf16.gmra.mrb[124].mxu0 %vm405_vm1, %v8981_v5 }
0x15e8   :  { %6487 = vmatprep.mubr.msk.bf16.mxu0 %vm405_vm1, %v8988_v59 }
0x16a2   :  { %v6449_v23 = vpop.f32.mrb[112].mxu0 }
0x16a3   :  { %4474 = vrot.lane.b32.xlu0 %v6449_v23, %s7704_s27  ;;  %v4391_v7 = vpop.f32.mrb[113].mxu0 }
0x16a4   :  { %v6450_v47 = vpop.f32.mrb[114].mxu0 }
0x16a5   :  { %4476 = vrot.lane.b32.xlu1 %v6450_v47, %s7704_s27  ;;  %v4394_v8 = vpop.f32.mrb[115].mxu0 }
0x16a7   :  { %4470 = vrot.lane.b32.xlu0 %v4391_v7, %s7704_s27 }
0x16a9   :  { %4472 = vrot.lane.b32.xlu1 %v4394_v8, %s7704_s27 }
0x16aa   :  { %v6453_v60 = vpop.f32.mrb[116].mxu0 }
0x16ab   :  { %v4407_v27 = vpop.f32.mrb[117].mxu0 }
0x16ac   :  { %4478 = vrot.lane.b32.xlu0 %v4407_v27, %s7704_s27  ;;  %v6454_v5 = vpop.f32.mrb[118].mxu0 }
0x16ad   :  { %v4410_v56 = vpop.f32.mrb[119].mxu0 }
0x16ae   :  { %4480 = vrot.lane.b32.xlu1 %v4410_v56, %s7704_s27 }
0x16b0   :  { %4482 = vrot.lane.b32.xlu0 %v6453_v60, %s7704_s27 }
0x16b2   :  { %4484 = vrot.lane.b32.xlu1 %v6454_v5, %s7704_s27  ;;  %v6457_v59 = vpop.f32.mrb[120].mxu0 }
0x16b3   :  { %v4423_v3 = vpop.f32.mrb[121].mxu0 }
0x16b4   :  { %4490 = vrot.lane.b32.xlu0 %v6457_v59, %s7704_s27  ;;  %v6458_v19 = vpop.f32.mrb[122].mxu0 }
0x16b5   :  { %v4426_v13 = vpop.f32.mrb[123].mxu0 }
0x16b6   :  { %4492 = vrot.lane.b32.xlu1 %v6458_v19, %s7704_s27 }
0x16b8   :  { %4486 = vrot.lane.b32.xlu0 %v4423_v3, %s7704_s27 }
0x16ba   :  { %4488 = vrot.lane.b32.xlu1 %v4426_v13, %s7704_s27  ;;  %v6461_v1 = vpop.f32.mrb[124].mxu0 }
0x16bb   :  { %v4439_v36 = vpop.f32.mrb[125].mxu0 }
0x16bc   :  { %4494 = vrot.lane.b32.xlu0 %v4439_v36, %s7704_s27  ;;  %v6462_v15 = vpop.f32.mrb[126].mxu0 }
0x16bd   :  { %v4442_v57 = vpop.f32.mrb[127].mxu0 }
0x16be   :  { %4496 = vrot.lane.b32.xlu1 %v4442_v57, %s7704_s27 }
0x16c0   :  { %4498 = vrot.lane.b32.xlu0 %v6461_v1, %s7704_s27 }
0x16c2   :  { %4500 = vrot.lane.b32.xlu1 %v6462_v15, %s7704_s27 }
0x16c4   :  { %4614 = vrot.lane.b32.xlu0 %v9134_v4, %s7698_s3 }
0x16c6   :  { %4616 = vrot.lane.b32.xlu1 %v9137_v46, %s7698_s3 }
0x16c8   :  { %4618 = vrot.lane.b32.xlu0 %v9140_v51, %s7698_s3 }
0x16ca   :  { %4620 = vrot.lane.b32.xlu1 %v9143_v54, %s7698_s3 }
0x1715   :  { %v4475_v25 = vpop.permute.xlu0 %4474 }
0x1716   :  { %v4520_v28 = vadd.f32 %v9086_v55, %v4475_v25 }
0x1717   :  { %v4477_v62 = vpop.permute.xlu1 %4476 }
0x1718   :  { %v5918_v48 = vmul.f32 -1.442695, %v4520_v28  ;;  %v4521_v22 = vadd.f32 %v9089_v33, %v4477_v62 }
0x1719   :  { %v4471_v24 = vpop.permute.xlu0 %4470 }
0x171a   :  { %7352 = vpow2.f32 %v5918_v48  ;;  %v5919_v37 = vmul.f32 -1.442695, %v4521_v22  ;;  %v4518_v4 = vadd.f32 %v9092_v58, %v4471_v24 }
0x171b   :  { %v4473_v16 = vpop.permute.xlu1 %4472 }
0x171c   :  { %7354 = vpow2.f32 %v5919_v37  ;;  %v5916_v46 = vmul.f32 -1.442695, %v4518_v4  ;;  %v4519_v51 = vadd.f32 %v9095_v17, %v4473_v16 }
0x171e   :  { %7356 = vpow2.f32 %v5916_v46  ;;  %v5917_v12 = vmul.f32 -1.442695, %v4519_v51  ;;  %v4479_v49 = vpop.permute.xlu0 %4478 }
0x171f   :  { %v4522_v26 = vadd.f32 %v9098_v20, %v4479_v49 }
0x1720   :  { %7358 = vpow2.f32 %v5917_v12  ;;  %v4481_v50 = vpop.permute.xlu1 %4480 }
0x1721   :  { %v5920_v54 = vmul.f32 -1.442695, %v4522_v26  ;;  %v4523_v42 = vadd.f32 %v9101_v38, %v4481_v50 }
0x1722   :  { %v4483_v44 = vpop.permute.xlu0 %4482 }
0x1723   :  { %7360 = vpow2.f32 %v5920_v54  ;;  %v5921_v53 = vmul.f32 -1.442695, %v4523_v42  ;;  %v4524_v61 = vadd.f32 %v9104_v40, %v4483_v44 }
0x1724   :  { %v7353_v34 = vpop.eup %7352  ;;  %v4485_v39 = vpop.permute.xlu1 %4484 }
0x1725   :  { %v4548_v9 = vadd.f32 1.0, %v7353_v34  ;;  %7362 = vpow2.f32 %v5921_v53  ;;  %v5922_v10 = vmul.f32 -1.442695, %v4524_v61  ;;  %v4525_v0 = vadd.f32 %v9107_v41, %v4485_v39 }
0x1726   :  { %v7355_v11 = vpop.eup %7354  ;;  %v4491_v21 = vpop.permute.xlu0 %4490 }
0x1727   :  { %v4549_v63 = vadd.f32 1.0, %v7355_v11  ;;  %v5923_v6 = vmul.f32 -1.442695, %v4525_v0  ;;  %7364 = vpow2.f32 %v5922_v10  ;;  %v4528_v23 = vadd.f32 %v9110_v14, %v4491_v21 }
0x1728   :  { %v7357_v29 = vpop.eup %7356  ;;  %v4493_v32 = vpop.permute.xlu1 %4492  ;;  %7366 = vrcp.f32 %v4548_v9 }
0x1729   :  { %v4546_v18 = vadd.f32 1.0, %v7357_v29  ;;  %7368 = vpow2.f32 %v5923_v6  ;;  %v4529_v36 = vadd.f32 %v9122_v31, %v4493_v32 }
0x172a   :  { %v7359_v7 = vpop.eup %7358  ;;  %v4487_v47 = vpop.permute.xlu0 %4486  ;;  %7370 = vrcp.f32 %v4549_v63 }
0x172b   :  { %v4547_v8 = vadd.f32 1.0, %v7359_v7  ;;  %v4526_v60 = vadd.f32 %v9113_v43, %v4487_v47  ;;  %7372 = vrcp.f32 %v4546_v18 }
0x172c   :  { %v4489_v27 = vpop.permute.xlu1 %4488  ;;  %7374 = vtanh.f32 %v4528_v23 }
0x172d   :  { %v7361_v5 = vpop.eup %7360  ;;  %v4527_v56 = vadd.f32 %v9116_v30, %v4489_v27  ;;  %7376 = vrcp.f32 %v4547_v8 }
0x172e   :  { %v4570_v59 = vadd.f32 1.0, %v7361_v5  ;;  %v4495_v3 = vpop.permute.xlu0 %4494  ;;  %7378 = vtanh.f32 %v4526_v60 }
0x172f   :  { %v7363_v19 = vpop.eup %7362  ;;  %v4530_v13 = vadd.f32 %v9119_v35, %v4495_v3 }
0x1730   :  { %7380 = vrcp.f32 %v4570_v59  ;;  %v4571_v1 = vadd.f32 1.0, %v7363_v19  ;;  %v4497_v15 = vpop.permute.xlu1 %4496 }
0x1731   :  { %7382 = vtanh.f32 %v4527_v56  ;;  %v5924_v57 = vmul.f32 -1.442695, %v4530_v13  ;;  %v4531_v25 = vadd.f32 %v9125_v45, %v4497_v15  ;;  %v7365_v28 = vpop.eup %7364 }
0x1732   :  { %7384 = vrcp.f32 %v4571_v1  ;;  %v4499_v62 = vpop.permute.xlu0 %4498  ;;  %v7367_v48 = vpop.eup %7366  ;;  %v4572_v22 = vadd.f32 1.0, %v7365_v28 }
0x1733   :  { %7386 = vpow2.f32 %v5924_v57  ;;  %v5925_v24 = vmul.f32 -1.442695, %v4531_v25  ;;  %v4532_v37 = vadd.f32 %v9128_v2, %v4499_v62  ;;  %v7369_v4 = vpop.eup %7368 }
0x1734   :  { %7388 = vtanh.f32 %v4529_v36  ;;  %v4501_v16 = vpop.permute.xlu1 %4500  ;;  %v7371_v46 = vpop.eup %7370  ;;  %v4573_v51 = vadd.f32 1.0, %v7369_v4 }
0x1735   :  { %7390 = vrcp.f32 %v4572_v22  ;;  %v5926_v12 = vmul.f32 -1.442695, %v4532_v37  ;;  %v4533_v49 = vadd.f32 %v9131_v52, %v4501_v16  ;;  %v7373_v26 = vpop.eup %7372 }
0x1736   :  { %7392 = vpow2.f32 %v5925_v24  ;;  %v7375_v50 = vpop.eup %7374  ;;  %v4615_v53 = vpop.permute.xlu0 %4614 }
0x1737   :  { %7394 = vrcp.f32 %v4573_v51  ;;  %v5927_v54 = vmul.f32 -1.442695, %v4533_v49  ;;  %v7377_v42 = vpop.eup %7376  ;;  %v4632_v8 = vmul.f32 %v7375_v50, %v7367_v48 }
0x1738   :  { %7396 = vpow2.f32 %v5926_v12  ;;  %v7379_v44 = vpop.eup %7378  ;;  %v4617_v10 = vpop.permute.xlu1 %4616 }
0x1739   :  { %7398 = vpow2.f32 %v5927_v54  ;;  %v4630_v39 = vmul.f32 %v7379_v44, %v7373_v26  ;;  %v9228_v44 = vld [vmem:[%s9506_s5 + $0x10] sm:$0xff]  }
0x173a   :  { %v7381_v61 = vpop.eup %7380  ;;  %v4619_v7 = vpop.permute.xlu0 %4618 }
0x173b   :  { %v7383_v34 = vpop.eup %7382  ;;  %v4626_v9 = vmul.f32 %v7381_v61, %v4615_v53  ;;  %v9235_v53 = vld [vmem:[%s9506_s5 + $0x18] sm:$0xff]   ;;  %v9242_v61 = vld [vmem:[%s9506_s5 + $0x20] sm:$0xff]  }
0x173c   :  { %v7385_v0 = vpop.eup %7384  ;;  %v4631_v63 = vmul.f32 %v7383_v34, %v7377_v42  ;;  %v4621_v56 = vpop.permute.xlu1 %4620  ;;  %v9221_v42 = vld [vmem:[%s9506_s5 + $0x8] sm:$0xff]  }
0x173d   :  { %v7387_v11 = vpop.eup %7386  ;;  %v9204_v21 = vadd.f32 %v4630_v39, %v4626_v9  ;;  %v4627_v6 = vmul.f32 %v7385_v0, %v4617_v10  ;;  %v9249_v34 = vld [vmem:[%s9506_s5 + $0x28] sm:$0xff]   ;;  %v9256_v39 = vld [vmem:[%s9506_s5 + $0x30] sm:$0xff]   ;;  %v9263_v9 = vld [vmem:[%s9506_s5 + $0x38] sm:$0xff]  }
0x173e   :  { %v7389_v29 = vpop.eup %7388  ;;  %v4598_v32 = vadd.f32 1.0, %v7387_v11  ;;  %v7656_v10 = vld [vmem:[%s9506_s5] sm:$0xff]   ;;  %s7713_s5 = smov 72  }
0x173f   :  { %v7391_v18 = vpop.eup %7390  ;;  %7400 = vtanh.f32 %v9204_v21  ;;  %v9207_v23 = vadd.f32 %v4631_v63, %v4627_v6  ;;  %v4633_v19 = vmul.f32 %v7389_v29, %v7371_v46 }
0x1740   :  { %v7393_v47 = vpop.eup %7392  ;;  %7402 = vrcp.f32 %v4598_v32  ;;  %v4628_v60 = vmul.f32 %v7391_v18, %v4619_v7 }
0x1741   :  { %v7395_v27 = vpop.eup %7394  ;;  %v4599_v5 = vadd.f32 1.0, %v7393_v47  ;;  %7404 = vtanh.f32 %v9207_v23 }
0x1742   :  { %v7397_v59 = vpop.eup %7396  ;;  %v9210_v3 = vadd.f32 %v4632_v8, %v4628_v60  ;;  %v4629_v13 = vmul.f32 %v7395_v27, %v4621_v56 }
0x1743   :  { %v7399_v1 = vpop.eup %7398  ;;  %7406 = vrcp.f32 %v4599_v5  ;;  %v4600_v36 = vadd.f32 1.0, %v7397_v59 }
0x1744   :  { %v4601_v15 = vadd.f32 1.0, %v7399_v1  ;;  %7408 = vtanh.f32 %v9210_v3  ;;  %v9213_v57 = vadd.f32 %v4633_v19, %v4629_v13 }
0x1745   :  { %7410 = vrcp.f32 %v4600_v36 }
0x1746   :  { %7412 = vrcp.f32 %v4601_v15 }
0x1747   :  { %7414 = vtanh.f32 %v9213_v57 }
0x1749   :  { %v7401_v25 = vpop.eup %7400 }
0x174a   :  { %v7403_v28 = vpop.eup %7402 }
0x174b   :  { %v7405_v62 = vpop.eup %7404  ;;  %v4642_v24 = vmul.f32 %v7403_v28, %v7401_v25 }
0x174d   :  { %v7407_v48 = vpop.eup %7406 }
0x174e   :  { %v7409_v22 = vpop.eup %7408  ;;  %v4643_v37 = vmul.f32 %v7407_v48, %v7405_v62 }
0x174f   :  { %v7411_v4 = vpop.eup %7410 }
0x1750   :  { %v7413_v16 = vpop.eup %7412  ;;  %v4646_v46 = vpack.c.bf16 %v4643_v37, %v4642_v24  ;;  %v4644_v12 = vmul.f32 %v7411_v4, %v7409_v22 }
0x1751   :  { %v7415_v51 = vpop.eup %7414 }
0x1752   :  { %4650 = vrot.lane.b32.xlu0 %v4646_v46, %s7705_s28  ;;  %v4645_v49 = vmul.f32 %v7415_v51, %v7413_v16 }
0x1754   :  { %v4647_v26 = vpack.c.bf16 %v4645_v49, %v4644_v12 }
0x1756   :  { %4652 = vrot.lane.b32.xlu1 %v4647_v26, %s7705_s28 }
0x17c4   :  { %v4651_v50 = vpop.permute.xlu0 %4650 }
0x17c5   :  { %6463 = vmatprep.subr.bf16.mxu1 %v4651_v50 }
0x17c6   :  { %6464 = vmatpush3.bf16.msra.mxu1 %v4651_v50 }
0x17c8   :  { %v4653_v54 = vpop.permute.xlu1 %4652 }
0x17c9   :  { %6465 = vmatprep.subr.bf16.mxu1 %v4653_v54 }
0x17ca   :  { %6466 = vmatpush3.bf16.msra.mxu1 %v4653_v54 }
0x17cd   :  { %6468 = vmatmul.mubr.msk.bf16.vlgmr.msra.gmra.mrb[112].mxu1 %vm405_vm1, %v9221_v42 }
0x17ce   :  { %6471 = vmatprep.mubr.msk.bf16.mxu1 %vm405_vm1, %v9228_v44 }
0x17d5   :  { %6472 = vmatmul.mubr.msk.bf16.gmra.mrb[116].mxu1 %vm405_vm1, %v9235_v53 }
0x17d6   :  { %6475 = vmatprep.mubr.msk.bf16.mxu1 %vm405_vm1, %v9242_v61 }
0x17dd   :  { %6476 = vmatmul.mubr.msk.bf16.gmra.mrb[120].mxu1 %vm405_vm1, %v9249_v34 }
0x17de   :  { %6479 = vmatprep.mubr.msk.bf16.mxu1 %vm405_vm1, %v9256_v39 }
0x17e5   :  { %6480 = vmatmul.mubr.msk.bf16.gmra.mrb[124].mxu1 %vm405_vm1, %v9263_v9 }
0x17e6   :  { %6507 = vmatprep.mubr.msk.bf16.mxu1 %vm405_vm1, %v7656_v10 }
0x18a0   :  { %v6469_v0 = vpop.f32.mrb[112].mxu1 }
0x18a1   :  { %4773 = vrot.lane.b32.xlu0 %v6469_v0, %s7706_s19  ;;  %v4690_v11 = vpop.f32.mrb[113].mxu1 }
0x18a2   :  { %v6470_v63 = vpop.f32.mrb[114].mxu1 }
0x18a3   :  { %4775 = vrot.lane.b32.xlu1 %v6470_v63, %s7706_s19  ;;  %v4693_v6 = vpop.f32.mrb[115].mxu1 }
0x18a5   :  { %4769 = vrot.lane.b32.xlu0 %v4690_v11, %s7706_s19 }
0x18a7   :  { %4771 = vrot.lane.b32.xlu1 %v4693_v6, %s7706_s19 }
0x18a8   :  { %v6473_v29 = vpop.f32.mrb[116].mxu1 }
0x18a9   :  { %v4706_v32 = vpop.f32.mrb[117].mxu1 }
0x18aa   :  { %4777 = vrot.lane.b32.xlu0 %v4706_v32, %s7706_s19  ;;  %v6474_v18 = vpop.f32.mrb[118].mxu1 }
0x18ab   :  { %v4709_v7 = vpop.f32.mrb[119].mxu1 }
0x18ac   :  { %4779 = vrot.lane.b32.xlu1 %v4709_v7, %s7706_s19 }
0x18ae   :  { %4781 = vrot.lane.b32.xlu0 %v6473_v29, %s7706_s19 }
0x18b0   :  { %4783 = vrot.lane.b32.xlu1 %v6474_v18, %s7706_s19  ;;  %v6477_v47 = vpop.f32.mrb[120].mxu1 }
0x18b1   :  { %v4722_v8 = vpop.f32.mrb[121].mxu1 }
0x18b2   :  { %4789 = vrot.lane.b32.xlu0 %v6477_v47, %s7706_s19  ;;  %v6478_v60 = vpop.f32.mrb[122].mxu1 }
0x18b3   :  { %v4725_v27 = vpop.f32.mrb[123].mxu1 }
0x18b4   :  { %4791 = vrot.lane.b32.xlu1 %v6478_v60, %s7706_s19 }
0x18b6   :  { %4785 = vrot.lane.b32.xlu0 %v4722_v8, %s7706_s19 }
0x18b8   :  { %4787 = vrot.lane.b32.xlu1 %v4725_v27, %s7706_s19  ;;  %v6481_v5 = vpop.f32.mrb[124].mxu1 }
0x18b9   :  { %v4738_v56 = vpop.f32.mrb[125].mxu1 }
0x18ba   :  { %4793 = vrot.lane.b32.xlu0 %v4738_v56, %s7706_s19  ;;  %v6482_v59 = vpop.f32.mrb[126].mxu1 }
0x18bb   :  { %v4741_v19 = vpop.f32.mrb[127].mxu1 }
0x18bc   :  { %4795 = vrot.lane.b32.xlu1 %v4741_v19, %s7706_s19 }
0x18be   :  { %4797 = vrot.lane.b32.xlu0 %v6481_v5, %s7706_s19 }
0x18c0   :  { %4799 = vrot.lane.b32.xlu1 %v6482_v59, %s7706_s19 }
0x18c2   :  { %4913 = vrot.lane.b32.xlu0 %v9204_v21, %s7698_s3 }
0x18c4   :  { %4915 = vrot.lane.b32.xlu1 %v9207_v23, %s7698_s3 }
0x18c6   :  { %4917 = vrot.lane.b32.xlu0 %v9210_v3, %s7698_s3 }
0x18c8   :  { %4919 = vrot.lane.b32.xlu1 %v9213_v57, %s7698_s3 }
0x1913   :  { %v4774_v13 = vpop.permute.xlu0 %4773 }
0x1914   :  { %v4819_v1 = vadd.f32 %v9086_v55, %v4774_v13 }
0x1915   :  { %v4776_v36 = vpop.permute.xlu1 %4775 }
0x1916   :  { %v5938_v15 = vmul.f32 -1.442695, %v4819_v1  ;;  %v4820_v25 = vadd.f32 %v9089_v33, %v4776_v36 }
0x1917   :  { %v4770_v28 = vpop.permute.xlu0 %4769 }
0x1918   :  { %7416 = vpow2.f32 %v5938_v15  ;;  %v5939_v62 = vmul.f32 -1.442695, %v4820_v25  ;;  %v4817_v21 = vadd.f32 %v9092_v58, %v4770_v28 }
0x1919   :  { %v4772_v48 = vpop.permute.xlu1 %4771 }
0x191a   :  { %7418 = vpow2.f32 %v5939_v62  ;;  %v5936_v23 = vmul.f32 -1.442695, %v4817_v21  ;;  %v4818_v3 = vadd.f32 %v9095_v17, %v4772_v48 }
0x191c   :  { %7420 = vpow2.f32 %v5936_v23  ;;  %v5937_v22 = vmul.f32 -1.442695, %v4818_v3  ;;  %v4778_v57 = vpop.permute.xlu0 %4777 }
0x191d   :  { %v4821_v24 = vadd.f32 %v9098_v20, %v4778_v57 }
0x191e   :  { %7422 = vpow2.f32 %v5937_v22  ;;  %v4780_v55 = vpop.permute.xlu1 %4779 }
0x191f   :  { %v5940_v37 = vmul.f32 -1.442695, %v4821_v24  ;;  %v4822_v33 = vadd.f32 %v9101_v38, %v4780_v55 }
0x1920   :  { %v4782_v4 = vpop.permute.xlu0 %4781 }
0x1921   :  { %7424 = vpow2.f32 %v5940_v37  ;;  %v5941_v16 = vmul.f32 -1.442695, %v4822_v33  ;;  %v4823_v58 = vadd.f32 %v9104_v40, %v4782_v4 }
0x1922   :  { %v7417_v46 = vpop.eup %7416  ;;  %v4784_v51 = vpop.permute.xlu1 %4783 }
0x1923   :  { %v4847_v12 = vadd.f32 1.0, %v7417_v46  ;;  %7426 = vpow2.f32 %v5941_v16  ;;  %v5942_v17 = vmul.f32 -1.442695, %v4823_v58  ;;  %v4824_v49 = vadd.f32 %v9107_v41, %v4784_v51 }
0x1924   :  { %v7419_v26 = vpop.eup %7418  ;;  %v4790_v50 = vpop.permute.xlu0 %4789 }
0x1925   :  { %v4848_v20 = vadd.f32 1.0, %v7419_v26  ;;  %v5943_v54 = vmul.f32 -1.442695, %v4824_v49  ;;  %7428 = vpow2.f32 %v5942_v17  ;;  %v4827_v11 = vadd.f32 %v9110_v14, %v4790_v50 }
0x1926   :  { %v7421_v10 = vpop.eup %7420  ;;  %v4792_v0 = vpop.permute.xlu1 %4791  ;;  %7430 = vrcp.f32 %v4847_v12 }
0x1927   :  { %v4845_v38 = vadd.f32 1.0, %v7421_v10  ;;  %7432 = vpow2.f32 %v5943_v54  ;;  %v4828_v27 = vadd.f32 %v9122_v31, %v4792_v0 }
0x1928   :  { %v7423_v63 = vpop.eup %7422  ;;  %v4786_v40 = vpop.permute.xlu0 %4785  ;;  %7434 = vrcp.f32 %v4848_v20 }
0x1929   :  { %v4846_v6 = vadd.f32 1.0, %v7423_v63  ;;  %v4825_v29 = vadd.f32 %v9113_v43, %v4786_v40  ;;  %7436 = vrcp.f32 %v4845_v38 }
0x192a   :  { %v4788_v41 = vpop.permute.xlu1 %4787  ;;  %7438 = vtanh.f32 %v4827_v11 }
0x192b   :  { %v7425_v32 = vpop.eup %7424  ;;  %v4826_v18 = vadd.f32 %v9116_v30, %v4788_v41  ;;  %7440 = vrcp.f32 %v4846_v6 }
0x192c   :  { %v4869_v7 = vadd.f32 1.0, %v7425_v32  ;;  %v4794_v47 = vpop.permute.xlu0 %4793  ;;  %7442 = vtanh.f32 %v4825_v29 }
0x192d   :  { %v7427_v8 = vpop.eup %7426  ;;  %v4829_v14 = vadd.f32 %v9119_v35, %v4794_v47 }
0x192e   :  { %7444 = vrcp.f32 %v4869_v7  ;;  %v4870_v60 = vadd.f32 1.0, %v7427_v8  ;;  %v4796_v5 = vpop.permute.xlu1 %4795 }
0x192f   :  { %7446 = vtanh.f32 %v4826_v18  ;;  %v5944_v43 = vmul.f32 -1.442695, %v4829_v14  ;;  %v4830_v56 = vadd.f32 %v9125_v45, %v4796_v5  ;;  %v7429_v59 = vpop.eup %7428 }
0x1930   :  { %7448 = vrcp.f32 %v4870_v60  ;;  %v4798_v19 = vpop.permute.xlu0 %4797  ;;  %v7431_v30 = vpop.eup %7430  ;;  %v4871_v13 = vadd.f32 1.0, %v7429_v59 }
0x1931   :  { %7450 = vpow2.f32 %v5944_v43  ;;  %v5945_v1 = vmul.f32 -1.442695, %v4830_v56  ;;  %v4831_v36 = vadd.f32 %v9128_v2, %v4798_v19  ;;  %v7433_v15 = vpop.eup %7432 }
0x1932   :  { %7452 = vtanh.f32 %v4828_v27  ;;  %v4800_v35 = vpop.permute.xlu1 %4799  ;;  %v7435_v25 = vpop.eup %7434  ;;  %v4872_v31 = vadd.f32 1.0, %v7433_v15 }
0x1933   :  { %7454 = vrcp.f32 %v4871_v13  ;;  %v5946_v28 = vmul.f32 -1.442695, %v4831_v36  ;;  %v4832_v62 = vadd.f32 %v9131_v52, %v4800_v35  ;;  %v7437_v21 = vpop.eup %7436 }
0x1934   :  { %7456 = vpow2.f32 %v5945_v1  ;;  %v7439_v45 = vpop.eup %7438  ;;  %v4914_v22 = vpop.permute.xlu0 %4913 }
0x1935   :  { %7458 = vrcp.f32 %v4872_v31  ;;  %v5947_v48 = vmul.f32 -1.442695, %v4832_v62  ;;  %v7441_v23 = vpop.eup %7440  ;;  %v4931_v50 = vmul.f32 %v7439_v45, %v7431_v30 }
0x1936   :  { %7460 = vpow2.f32 %v5946_v28  ;;  %v7443_v3 = vpop.eup %7442  ;;  %v4916_v37 = vpop.permute.xlu1 %4915 }
0x1937   :  { %7462 = vpow2.f32 %v5947_v48  ;;  %v4929_v24 = vmul.f32 %v7443_v3, %v7437_v21 }
0x1938   :  { %v7445_v2 = vpop.eup %7444  ;;  %v4918_v49 = vpop.permute.xlu0 %4917 }
0x1939   :  { %v7447_v57 = vpop.eup %7446  ;;  %v4925_v55 = vmul.f32 %v7445_v2, %v4914_v22 }
0x193a   :  { %v7449_v33 = vpop.eup %7448  ;;  %v4930_v52 = vmul.f32 %v7447_v57, %v7441_v23  ;;  %v4920_v0 = vpop.permute.xlu1 %4919 }
0x193b   :  { %v7451_v4 = vpop.eup %7450  ;;  %v9311_v16 = vadd.f32 %v4929_v24, %v4925_v55  ;;  %v4926_v58 = vmul.f32 %v7449_v33, %v4916_v37  ;;  %v9363_v33 = vld [vmem:[#allocation2 + $0x10] sm:$0xff] }
0x193c   :  { %v7453_v46 = vpop.eup %7452  ;;  %v4897_v51 = vadd.f32 1.0, %v7451_v4 }
0x193d   :  { %v7455_v12 = vpop.eup %7454  ;;  %7464 = vtanh.f32 %v9311_v16  ;;  %v9314_v17 = vadd.f32 %v4930_v52, %v4926_v58  ;;  %v4932_v63 = vmul.f32 %v7453_v46, %v7435_v25  ;;  %v9366_v46 = vld [vmem:[#allocation2 + $0x18] sm:$0xff] }
0x193e   :  { %v7457_v26 = vpop.eup %7456  ;;  %7466 = vrcp.f32 %v4897_v51  ;;  %v4927_v20 = vmul.f32 %v7455_v12, %v4918_v49 }
0x193f   :  { %v7459_v54 = vpop.eup %7458  ;;  %v4898_v10 = vadd.f32 1.0, %v7457_v26  ;;  %7468 = vtanh.f32 %v9314_v17 }
0x1940   :  { %v7461_v38 = vpop.eup %7460  ;;  %v9317_v11 = vadd.f32 %v4931_v50, %v4927_v20  ;;  %v4928_v40 = vmul.f32 %v7459_v54, %v4920_v0  ;;  %v9372_v20 = vld [vmem:[#allocation2 + $0x8] sm:$0xff] }
0x1941   :  { %v7463_v6 = vpop.eup %7462  ;;  %7470 = vrcp.f32 %v4898_v10  ;;  %v4899_v29 = vadd.f32 1.0, %v7461_v38  ;;  %v9375_v38 = vld [vmem:[#allocation2 + $0x20] sm:$0xff] }
0x1942   :  { %v4900_v41 = vadd.f32 1.0, %v7463_v6  ;;  %7472 = vtanh.f32 %v9317_v11  ;;  %v9320_v32 = vadd.f32 %v4932_v63, %v4928_v40  ;;  %v9378_v6 = vld [vmem:[#allocation2 + $0x28] sm:$0xff] }
0x1943   :  { %7474 = vrcp.f32 %v4899_v29 }
0x1944   :  { %7476 = vrcp.f32 %v4900_v41 }
0x1945   :  { %7478 = vtanh.f32 %v9320_v32 }
0x1947   :  { %v7465_v18 = vpop.eup %7464 }
0x1948   :  { %v7467_v7 = vpop.eup %7466 }
0x1949   :  { %v7469_v47 = vpop.eup %7468  ;;  %v4941_v60 = vmul.f32 %v7467_v7, %v7465_v18  ;;  %v9381_v18 = vld [vmem:[#allocation2 + $0x30] sm:$0xff] }
0x194b   :  { %v7471_v8 = vpop.eup %7470 }
0x194c   :  { %v7473_v14 = vpop.eup %7472  ;;  %v4942_v27 = vmul.f32 %v7471_v8, %v7469_v47 }
0x194d   :  { %v7475_v5 = vpop.eup %7474 }
0x194e   :  { %v7477_v43 = vpop.eup %7476  ;;  %v4945_v56 = vpack.c.bf16 %v4942_v27, %v4941_v60  ;;  %v4943_v19 = vmul.f32 %v7475_v5, %v7473_v14  ;;  %v9384_v27 = vld [vmem:[#allocation2 + $0x38] sm:$0xff] }
0x194f   :  { %v7479_v59 = vpop.eup %7478 }
0x1950   :  { %4949 = vrot.lane.b32.xlu0 %v4945_v56, %s7707_s20  ;;  %v4944_v30 = vmul.f32 %v7479_v59, %v7477_v43 }
0x1952   :  { %v4946_v13 = vpack.c.bf16 %v4944_v30, %v4943_v19 }
0x1954   :  { %4951 = vrot.lane.b32.xlu1 %v4946_v13, %s7707_s20 }
0x19c2   :  { %v4950_v1 = vpop.permute.xlu0 %4949 }
0x19c3   :  { %6483 = vmatprep.subr.bf16.mxu0 %v4950_v1 }
0x19c4   :  { %6484 = vmatpush3.bf16.msra.mxu0 %v4950_v1 }
0x19c6   :  { %v4952_v36 = vpop.permute.xlu1 %4951 }
0x19c7   :  { %6485 = vmatprep.subr.bf16.mxu0 %v4952_v36 }
0x19c8   :  { %6486 = vmatpush3.bf16.msra.mxu0 %v4952_v36  ;;  %v9387_v36 = vld [vmem:[#allocation2 + $0x50] sm:$0xff] }
0x19cb   :  { %6488 = vmatmul.mubr.msk.bf16.vlgmr.msra.gmra.mrb[128].mxu0 %vm405_vm1, %v9221_v42 }
0x19cc   :  { %6491 = vmatprep.mubr.msk.bf16.mxu0 %vm405_vm1, %v9228_v44 }
0x19d3   :  { %6492 = vmatmul.mubr.msk.bf16.gmra.mrb[132].mxu0 %vm405_vm1, %v9235_v53 }
0x19d4   :  { %6495 = vmatprep.mubr.msk.bf16.mxu0 %vm405_vm1, %v9242_v61 }
0x19db   :  { %6496 = vmatmul.mubr.msk.bf16.gmra.mrb[136].mxu0 %vm405_vm1, %v9249_v34 }
0x19dc   :  { %6499 = vmatprep.mubr.msk.bf16.mxu0 %vm405_vm1, %v9256_v39 }
0x19e3   :  { %6500 = vmatmul.mubr.msk.bf16.gmra.mrb[140].mxu0 %vm405_vm1, %v9263_v9 }
0x1a9e   :  { %v6489_v15 = vpop.f32.mrb[128].mxu0 }
0x1a9f   :  { %5072 = vrot.lane.b32.xlu0 %v6489_v15, %s7708_s11  ;;  %v4989_v35 = vpop.f32.mrb[129].mxu0 }
0x1aa0   :  { %v6490_v25 = vpop.f32.mrb[130].mxu0 }
0x1aa1   :  { %5074 = vrot.lane.b32.xlu1 %v6490_v25, %s7708_s11  ;;  %v4992_v31 = vpop.f32.mrb[131].mxu0 }
0x1aa3   :  { %5068 = vrot.lane.b32.xlu0 %v4989_v35, %s7708_s11 }
0x1aa5   :  { %5070 = vrot.lane.b32.xlu1 %v4992_v31, %s7708_s11 }
0x1aa6   :  { %v6493_v28 = vpop.f32.mrb[132].mxu0 }
0x1aa7   :  { %v5005_v62 = vpop.f32.mrb[133].mxu0 }
0x1aa8   :  { %5076 = vrot.lane.b32.xlu0 %v5005_v62, %s7708_s11  ;;  %v6494_v21 = vpop.f32.mrb[134].mxu0 }
0x1aa9   :  { %v5008_v45 = vpop.f32.mrb[135].mxu0 }
0x1aaa   :  { %5078 = vrot.lane.b32.xlu1 %v5008_v45, %s7708_s11 }
0x1aac   :  { %5080 = vrot.lane.b32.xlu0 %v6493_v28, %s7708_s11  ;;  %v9390_v28 = vld [vmem:[#allocation2 + $0x40] sm:$0xff] }
0x1aae   :  { %5082 = vrot.lane.b32.xlu1 %v6494_v21, %s7708_s11  ;;  %v6497_v48 = vpop.f32.mrb[136].mxu0 }
0x1aaf   :  { %v5021_v23 = vpop.f32.mrb[137].mxu0 }
0x1ab0   :  { %5088 = vrot.lane.b32.xlu0 %v6497_v48, %s7708_s11  ;;  %v6498_v3 = vpop.f32.mrb[138].mxu0  ;;  %v9393_v48 = vld [vmem:[#allocation2 + $0x48] sm:$0xff] }
0x1ab1   :  { %v5024_v22 = vpop.f32.mrb[139].mxu0 }
0x1ab2   :  { %5090 = vrot.lane.b32.xlu1 %v6498_v3, %s7708_s11 }
0x1ab4   :  { %5084 = vrot.lane.b32.xlu0 %v5021_v23, %s7708_s11 }
0x1ab6   :  { %5086 = vrot.lane.b32.xlu1 %v5024_v22, %s7708_s11  ;;  %v6501_v2 = vpop.f32.mrb[140].mxu0 }
0x1ab7   :  { %v5037_v57 = vpop.f32.mrb[141].mxu0 }
0x1ab8   :  { %5092 = vrot.lane.b32.xlu0 %v5037_v57, %s7708_s11  ;;  %v6502_v24 = vpop.f32.mrb[142].mxu0  ;;  %v9396_v57 = vld [vmem:[#allocation2 + $0x60] sm:$0xff] }
0x1ab9   :  { %v5040_v55 = vpop.f32.mrb[143].mxu0 }
0x1aba   :  { %5094 = vrot.lane.b32.xlu1 %v5040_v55, %s7708_s11 }
0x1abc   :  { %5096 = vrot.lane.b32.xlu0 %v6501_v2, %s7708_s11 }
0x1abe   :  { %5098 = vrot.lane.b32.xlu1 %v6502_v24, %s7708_s11 }
0x1ac0   :  { %5212 = vrot.lane.b32.xlu0 %v9311_v16, %s7698_s3 }
0x1ac2   :  { %5214 = vrot.lane.b32.xlu1 %v9314_v17, %s7698_s3  ;;  %v9369_v17 = vld [vmem:[#allocation2] sm:$0xff] }
0x1ac4   :  { %5216 = vrot.lane.b32.xlu0 %v9317_v11, %s7698_s3 }
0x1ac6   :  { %5218 = vrot.lane.b32.xlu1 %v9320_v32, %s7698_s3 }
0x1b11   :  { %v5073_v37 = vpop.permute.xlu0 %5072 }
0x1b12   :  { %v5118_v4 = vadd.f32 %v9363_v33, %v5073_v37  ;;  %v9399_v37 = vld [vmem:[#allocation2 + $0x58] sm:$0xff] }
0x1b13   :  { %v5075_v52 = vpop.permute.xlu1 %5074 }
0x1b14   :  { %v5958_v58 = vmul.f32 -1.442695, %v5118_v4  ;;  %v5119_v16 = vadd.f32 %v9366_v46, %v5075_v52 }
0x1b15   :  { %v5069_v51 = vpop.permute.xlu0 %5068 }
0x1b16   :  { %7480 = vpow2.f32 %v5958_v58  ;;  %v5959_v12 = vmul.f32 -1.442695, %v5119_v16  ;;  %v5116_v49 = vadd.f32 %v9369_v17, %v5069_v51  ;;  %v9402_v16 = vld [vmem:[#allocation2 + $0x68] sm:$0xff] }
0x1b17   :  { %v5071_v26 = vpop.permute.xlu1 %5070 }
0x1b18   :  { %7482 = vpow2.f32 %v5959_v12  ;;  %v5956_v50 = vmul.f32 -1.442695, %v5116_v49  ;;  %v5117_v54 = vadd.f32 %v9372_v20, %v5071_v26 }
0x1b1a   :  { %7484 = vpow2.f32 %v5956_v50  ;;  %v5957_v10 = vmul.f32 -1.442695, %v5117_v54  ;;  %v5077_v0 = vpop.permute.xlu0 %5076 }
0x1b1b   :  { %v5120_v11 = vadd.f32 %v9375_v38, %v5077_v0 }
0x1b1c   :  { %7486 = vpow2.f32 %v5957_v10  ;;  %v5079_v63 = vpop.permute.xlu1 %5078  ;;  %v9405_v10 = vld [vmem:[#allocation2 + $0x70] sm:$0xff] }
0x1b1d   :  { %v5960_v40 = vmul.f32 -1.442695, %v5120_v11  ;;  %v5121_v29 = vadd.f32 %v9378_v6, %v5079_v63 }
0x1b1e   :  { %v5081_v41 = vpop.permute.xlu0 %5080 }
0x1b1f   :  { %7488 = vpow2.f32 %v5960_v40  ;;  %v5961_v32 = vmul.f32 -1.442695, %v5121_v29  ;;  %v5122_v7 = vadd.f32 %v9381_v18, %v5081_v41 }
0x1b20   :  { %v7481_v47 = vpop.eup %7480  ;;  %v5083_v8 = vpop.permute.xlu1 %5082 }
0x1b21   :  { %v5146_v14 = vadd.f32 1.0, %v7481_v47  ;;  %7490 = vpow2.f32 %v5961_v32  ;;  %v5962_v60 = vmul.f32 -1.442695, %v5122_v7  ;;  %v5123_v5 = vadd.f32 %v9384_v27, %v5083_v8  ;;  %v9408_v32 = vld [vmem:[#allocation2 + $0x78] sm:$0xff] }
0x1b22   :  { %v7483_v43 = vpop.eup %7482  ;;  %v5089_v56 = vpop.permute.xlu0 %5088 }
0x1b23   :  { %v5147_v59 = vadd.f32 1.0, %v7483_v43  ;;  %v5963_v19 = vmul.f32 -1.442695, %v5123_v5  ;;  %7492 = vpow2.f32 %v5962_v60  ;;  %v5126_v15 = vadd.f32 %v9387_v36, %v5089_v56 }
0x1b24   :  { %v7485_v30 = vpop.eup %7484  ;;  %v5091_v13 = vpop.permute.xlu1 %5090  ;;  %7494 = vrcp.f32 %v5146_v14 }
0x1b25   :  { %v5144_v1 = vadd.f32 1.0, %v7485_v30  ;;  %7496 = vpow2.f32 %v5963_v19  ;;  %v5127_v4 = vadd.f32 %v9399_v37, %v5091_v13 }
0x1b26   :  { %v7487_v35 = vpop.eup %7486  ;;  %v5085_v25 = vpop.permute.xlu0 %5084  ;;  %7498 = vrcp.f32 %v5147_v59 }
0x1b27   :  { %v5145_v31 = vadd.f32 1.0, %v7487_v35  ;;  %v5124_v62 = vadd.f32 %v9390_v28, %v5085_v25  ;;  %7500 = vrcp.f32 %v5144_v1 }
0x1b28   :  { %v5087_v21 = vpop.permute.xlu1 %5086  ;;  %7502 = vtanh.f32 %v5126_v15 }
0x1b29   :  { %v7489_v45 = vpop.eup %7488  ;;  %v5125_v23 = vadd.f32 %v9393_v48, %v5087_v21  ;;  %7504 = vrcp.f32 %v5145_v31 }
0x1b2a   :  { %v5168_v3 = vadd.f32 1.0, %v7489_v45  ;;  %v5093_v22 = vpop.permute.xlu0 %5092  ;;  %7506 = vtanh.f32 %v5124_v62 }
0x1b2b   :  { %v7491_v2 = vpop.eup %7490  ;;  %v5128_v24 = vadd.f32 %v9396_v57, %v5093_v22 }
0x1b2c   :  { %7508 = vrcp.f32 %v5168_v3  ;;  %v5169_v55 = vadd.f32 1.0, %v7491_v2  ;;  %v5095_v52 = vpop.permute.xlu1 %5094 }
0x1b2d   :  { %7510 = vtanh.f32 %v5125_v23  ;;  %v5964_v58 = vmul.f32 -1.442695, %v5128_v24  ;;  %v5129_v51 = vadd.f32 %v9402_v16, %v5095_v52  ;;  %v7493_v12 = vpop.eup %7492 }
0x1b2e   :  { %7512 = vrcp.f32 %v5169_v55  ;;  %v5097_v49 = vpop.permute.xlu0 %5096  ;;  %v7495_v26 = vpop.eup %7494  ;;  %v5170_v50 = vadd.f32 1.0, %v7493_v12 }
0x1b2f   :  { %7514 = vpow2.f32 %v5964_v58  ;;  %v5965_v54 = vmul.f32 -1.442695, %v5129_v51  ;;  %v5130_v0 = vadd.f32 %v9405_v10, %v5097_v49  ;;  %v7497_v11 = vpop.eup %7496 }
0x1b30   :  { %7516 = vtanh.f32 %v5127_v4  ;;  %v5099_v63 = vpop.permute.xlu1 %5098  ;;  %v7499_v40 = vpop.eup %7498  ;;  %v5171_v29 = vadd.f32 1.0, %v7497_v11 }
0x1b31   :  { %7518 = vrcp.f32 %v5170_v50  ;;  %v5966_v41 = vmul.f32 -1.442695, %v5130_v0  ;;  %v5131_v7 = vadd.f32 %v9408_v32, %v5099_v63  ;;  %v7501_v47 = vpop.eup %7500 }
0x1b32   :  { %7520 = vpow2.f32 %v5965_v54  ;;  %v7503_v8 = vpop.eup %7502  ;;  %v5213_v43 = vpop.permute.xlu0 %5212 }
0x1b33   :  { %7522 = vrcp.f32 %v5171_v29  ;;  %v5967_v14 = vmul.f32 -1.442695, %v5131_v7  ;;  %v7505_v60 = vpop.eup %7504  ;;  %v5230_v2 = vmul.f32 %v7503_v8, %v7495_v26 }
0x1b34   :  { %7524 = vpow2.f32 %v5966_v41  ;;  %v7507_v5 = vpop.eup %7506  ;;  %v5215_v13 = vpop.permute.xlu1 %5214 }
0x1b35   :  { %7526 = vpow2.f32 %v5967_v14  ;;  %v5228_v19 = vmul.f32 %v7507_v5, %v7501_v47 }
0x1b36   :  { %v7509_v56 = vpop.eup %7508  ;;  %v5217_v3 = vpop.permute.xlu0 %5216 }
0x1b37   :  { %v7511_v59 = vpop.eup %7510  ;;  %v5224_v30 = vmul.f32 %v7509_v56, %v5213_v43 }
0x1b38   :  { %v7513_v1 = vpop.eup %7512  ;;  %v5229_v25 = vmul.f32 %v7511_v59, %v7505_v60  ;;  %v5219_v52 = vpop.permute.xlu1 %5218 }
0x1b39   :  { %v7515_v15 = vpop.eup %7514  ;;  %v9411_v35 = vadd.f32 %v5228_v19, %v5224_v30  ;;  %v5225_v31 = vmul.f32 %v7513_v1, %v5215_v13 }
0x1b3a   :  { %v7517_v62 = vpop.eup %7516  ;;  %v5196_v21 = vadd.f32 1.0, %v7515_v15 }
0x1b3b   :  { %v7519_v45 = vpop.eup %7518  ;;  %7528 = vtanh.f32 %v9411_v35  ;;  %v9414_v23 = vadd.f32 %v5229_v25, %v5225_v31  ;;  %v5231_v12 = vmul.f32 %v7517_v62, %v7499_v40 }
0x1b3c   :  { %v7521_v22 = vpop.eup %7520  ;;  %7530 = vrcp.f32 %v5196_v21  ;;  %v5226_v24 = vmul.f32 %v7519_v45, %v5217_v3 }
0x1b3d   :  { %v7523_v55 = vpop.eup %7522  ;;  %v5197_v4 = vadd.f32 1.0, %v7521_v22  ;;  %7532 = vtanh.f32 %v9414_v23  ;;  %v7711_v22 = vmov 0.0  }
0x1b3e   :  { %v7525_v58 = vpop.eup %7524  ;;  %v9417_v51 = vadd.f32 %v5230_v2, %v5226_v24  ;;  %v5227_v49 = vmul.f32 %v7523_v55, %v5219_v52  ;;  %6523 = vmatprep.subr.bf16.mxu0 %v7711_v22  ;;  %6527 = vmatprep.mubr.msk.bf16.mxu0 %vm7712_vm11, %v7711_v22 }
0x1b3f   :  { %v7527_v50 = vpop.eup %7526  ;;  %7534 = vrcp.f32 %v5197_v4  ;;  %v5198_v54 = vadd.f32 1.0, %v7525_v58 }
0x1b40   :  { %v5199_v0 = vadd.f32 1.0, %v7527_v50  ;;  %7536 = vtanh.f32 %v9417_v51  ;;  %v9420_v11 = vadd.f32 %v5231_v12, %v5227_v49 }
0x1b41   :  { %7538 = vrcp.f32 %v5198_v54 }
0x1b42   :  { %7540 = vrcp.f32 %v5199_v0 }
0x1b43   :  { %7542 = vtanh.f32 %v9420_v11 }
0x1b45   :  { %v7529_v26 = vpop.eup %7528 }
0x1b46   :  { %v7531_v63 = vpop.eup %7530 }
0x1b47   :  { %v7533_v29 = vpop.eup %7532  ;;  %v5240_v47 = vmul.f32 %v7531_v63, %v7529_v26 }
0x1b49   :  { %v7535_v41 = vpop.eup %7534 }
0x1b4a   :  { %v7537_v7 = vpop.eup %7536  ;;  %v5241_v40 = vmul.f32 %v7535_v41, %v7533_v29 }
0x1b4b   :  { %v7539_v8 = vpop.eup %7538 }
0x1b4c   :  { %v7541_v14 = vpop.eup %7540  ;;  %v5244_v60 = vpack.c.bf16 %v5241_v40, %v5240_v47  ;;  %v5242_v43 = vmul.f32 %v7539_v8, %v7537_v7 }
0x1b4d   :  { %v7543_v5 = vpop.eup %7542 }
0x1b4e   :  { %5248 = vrot.lane.b32.xlu0 %v5244_v60, %s7709_s2  ;;  %v5243_v56 = vmul.f32 %v7543_v5, %v7541_v14 }
0x1b50   :  { %v5245_v59 = vpack.c.bf16 %v5243_v56, %v5242_v43 }
0x1b52   :  { %5250 = vrot.lane.b32.xlu1 %v5245_v59, %s7709_s2  ;;  %s7714_s2 = smov [#allocation4]  }
0x1bc0   :  { %v5249_v19 = vpop.permute.xlu0 %5248 }
0x1bc1   :  { %6503 = vmatprep.subr.bf16.mxu1 %v5249_v19 }
0x1bc2   :  { %6504 = vmatpush3.bf16.msra.mxu1 %v5249_v19 }
0x1bc4   :  { %v5251_v30 = vpop.permute.xlu1 %5250 }
0x1bc5   :  { %6505 = vmatprep.subr.bf16.mxu1 %v5251_v30 }
0x1bc6   :  { %6506 = vmatpush3.bf16.msra.mxu1 %v5251_v30 }
0x1bc9   :  { %6508 = vmatmul.mubr.msk.bf16.vlgmr.msra.gmra.mrb[128].mxu1 %vm405_vm1, %v9221_v42 }
0x1bca   :  { %6511 = vmatprep.mubr.msk.bf16.mxu1 %vm405_vm1, %v9228_v44 }
0x1bd1   :  { %6512 = vmatmul.mubr.msk.bf16.gmra.mrb[132].mxu1 %vm405_vm1, %v9235_v53 }
0x1bd2   :  { %6515 = vmatprep.mubr.msk.bf16.mxu1 %vm405_vm1, %v9242_v61 }
0x1bd9   :  { %6516 = vmatmul.mubr.msk.bf16.gmra.mrb[136].mxu1 %vm405_vm1, %v9249_v34 }
0x1bda   :  { %6519 = vmatprep.mubr.msk.bf16.mxu1 %vm405_vm1, %v9256_v39 }
0x1be1   :  { %6520 = vmatmul.mubr.msk.bf16.gmra.mrb[140].mxu1 %vm405_vm1, %v9263_v9 }
0x1c9c   :  { %v6509_v13 = vpop.f32.mrb[128].mxu1 }
0x1c9d   :  { %5371 = vrot.lane.b32.xlu0 %v6509_v13, %s7710_s12  ;;  %v5288_v42 = vpop.f32.mrb[129].mxu1 }
0x1c9e   :  { %v6510_v44 = vpop.f32.mrb[130].mxu1 }
0x1c9f   :  { %5373 = vrot.lane.b32.xlu1 %v6510_v44, %s7710_s12  ;;  %v5291_v53 = vpop.f32.mrb[131].mxu1 }
0x1ca1   :  { %5367 = vrot.lane.b32.xlu0 %v5288_v42, %s7710_s12 }
0x1ca3   :  { %5369 = vrot.lane.b32.xlu1 %v5291_v53, %s7710_s12 }
0x1ca4   :  { %v6513_v61 = vpop.f32.mrb[132].mxu1 }
0x1ca5   :  { %v5304_v34 = vpop.f32.mrb[133].mxu1 }
0x1ca6   :  { %5375 = vrot.lane.b32.xlu0 %v5304_v34, %s7710_s12  ;;  %v6514_v39 = vpop.f32.mrb[134].mxu1 }
0x1ca7   :  { %v5307_v1 = vpop.f32.mrb[135].mxu1 }
0x1ca8   :  { %5377 = vrot.lane.b32.xlu1 %v5307_v1, %s7710_s12 }
0x1caa   :  { %5379 = vrot.lane.b32.xlu0 %v6513_v61, %s7710_s12 }
0x1cac   :  { %5381 = vrot.lane.b32.xlu1 %v6514_v39, %s7710_s12  ;;  %v6517_v9 = vpop.f32.mrb[136].mxu1 }
0x1cad   :  { %v5320_v15 = vpop.f32.mrb[137].mxu1 }
0x1cae   :  { %5387 = vrot.lane.b32.xlu0 %v6517_v9, %s7710_s12  ;;  %v6518_v25 = vpop.f32.mrb[138].mxu1 }
0x1caf   :  { %v5323_v31 = vpop.f32.mrb[139].mxu1 }
0x1cb0   :  { %5389 = vrot.lane.b32.xlu1 %v6518_v25, %s7710_s12 }
0x1cb2   :  { %5383 = vrot.lane.b32.xlu0 %v5320_v15, %s7710_s12 }
0x1cb4   :  { %5385 = vrot.lane.b32.xlu1 %v5323_v31, %s7710_s12  ;;  %v6521_v62 = vpop.f32.mrb[140].mxu1 }
0x1cb5   :  { %v5336_v21 = vpop.f32.mrb[141].mxu1 }
0x1cb6   :  { %5391 = vrot.lane.b32.xlu0 %v5336_v21, %s7710_s12  ;;  %v6522_v45 = vpop.f32.mrb[142].mxu1 }
0x1cb7   :  { %v5339_v3 = vpop.f32.mrb[143].mxu1 }
0x1cb8   :  { %5393 = vrot.lane.b32.xlu1 %v5339_v3, %s7710_s12 }
0x1cba   :  { %5395 = vrot.lane.b32.xlu0 %v6521_v62, %s7710_s12 }
0x1cbc   :  { %5397 = vrot.lane.b32.xlu1 %v6522_v45, %s7710_s12  ;;  %s5611_s12 = sshll.u32 %s7714_s2, 4  ;;  %s5612_s12 = int_to_ptr.vmem [resolvable:$true] %s5611_s12 }
0x1cbd   :  { %p7678_p1 = scmp.lt.s32.totalorder %s5612_s12, %s5612_s12 }
0x1cbe   :  { %5511 = vrot.lane.b32.xlu0 %v9411_v35, %s7698_s3 }
0x1cc0   :  { %5513 = vrot.lane.b32.xlu1 %v9414_v23, %s7698_s3 }
0x1cc2   :  { %5515 = vrot.lane.b32.xlu0 %v9417_v51, %s7698_s3 }
0x1cc4   :  { %5517 = vrot.lane.b32.xlu1 %v9420_v11, %s7698_s3 }
0x1d0f   :  { %v5372_v2 = vpop.permute.xlu0 %5371 }
0x1d10   :  { %v5417_v24 = vadd.f32 %v9363_v33, %v5372_v2 }
0x1d11   :  { %v5374_v55 = vpop.permute.xlu1 %5373 }
0x1d12   :  { %v5978_v4 = vmul.f32 -1.442695, %v5417_v24  ;;  %v5418_v52 = vadd.f32 %v9366_v46, %v5374_v55 }
0x1d13   :  { %v5368_v35 = vpop.permute.xlu0 %5367 }
0x1d14   :  { %7544 = vpow2.f32 %v5978_v4  ;;  %v5979_v58 = vmul.f32 -1.442695, %v5418_v52  ;;  %v5415_v23 = vadd.f32 %v9369_v17, %v5368_v35 }
0x1d15   :  { %v5370_v12 = vpop.permute.xlu1 %5369 }
0x1d16   :  { %7546 = vpow2.f32 %v5979_v58  ;;  %v5976_v51 = vmul.f32 -1.442695, %v5415_v23  ;;  %v5416_v49 = vadd.f32 %v9372_v20, %v5370_v12 }
0x1d18   :  { %7548 = vpow2.f32 %v5976_v51  ;;  %v5977_v50 = vmul.f32 -1.442695, %v5416_v49  ;;  %v5376_v54 = vpop.permute.xlu0 %5375 }
0x1d19   :  { %v5419_v0 = vadd.f32 %v9375_v38, %v5376_v54 }
0x1d1a   :  { %7550 = vpow2.f32 %v5977_v50  ;;  %v5378_v33 = vpop.permute.xlu1 %5377 }
0x1d1b   :  { %v5980_v11 = vmul.f32 -1.442695, %v5419_v0  ;;  %v5420_v46 = vadd.f32 %v9378_v6, %v5378_v33 }
0x1d1c   :  { %v5380_v26 = vpop.permute.xlu0 %5379 }
0x1d1d   :  { %7552 = vpow2.f32 %v5980_v11  ;;  %v5981_v63 = vmul.f32 -1.442695, %v5420_v46  ;;  %v5421_v17 = vadd.f32 %v9381_v18, %v5380_v26 }
0x1d1e   :  { %v7545_v29 = vpop.eup %7544  ;;  %v5382_v41 = vpop.permute.xlu1 %5381 }
0x1d1f   :  { %v5445_v7 = vadd.f32 1.0, %v7545_v29  ;;  %7554 = vpow2.f32 %v5981_v63  ;;  %v5982_v20 = vmul.f32 -1.442695, %v5421_v17  ;;  %v5422_v47 = vadd.f32 %v9384_v27, %v5382_v41 }
0x1d20   :  { %v7547_v40 = vpop.eup %7546  ;;  %v5388_v8 = vpop.permute.xlu0 %5387 }
0x1d21   :  { %v5446_v38 = vadd.f32 1.0, %v7547_v40  ;;  %v5983_v14 = vmul.f32 -1.442695, %v5422_v47  ;;  %7556 = vpow2.f32 %v5982_v20  ;;  %v5425_v43 = vadd.f32 %v9387_v36, %v5388_v8 }
0x1d22   :  { %v7549_v60 = vpop.eup %7548  ;;  %v5390_v5 = vpop.permute.xlu1 %5389  ;;  %7558 = vrcp.f32 %v5445_v7 }
0x1d23   :  { %v5443_v6 = vadd.f32 1.0, %v7549_v60  ;;  %7560 = vpow2.f32 %v5983_v14  ;;  %v5426_v34 = vadd.f32 %v9399_v37, %v5390_v5 }
0x1d24   :  { %v7551_v56 = vpop.eup %7550  ;;  %v5384_v18 = vpop.permute.xlu0 %5383  ;;  %7562 = vrcp.f32 %v5446_v38 }
0x1d25   :  { %v5444_v59 = vadd.f32 1.0, %v7551_v56  ;;  %v5423_v19 = vadd.f32 %v9390_v28, %v5384_v18  ;;  %7564 = vrcp.f32 %v5443_v6 }
0x1d26   :  { %v5386_v27 = vpop.permute.xlu1 %5385  ;;  %7566 = vtanh.f32 %v5425_v43 }
0x1d27   :  { %v7553_v30 = vpop.eup %7552  ;;  %v5424_v13 = vadd.f32 %v9393_v48, %v5386_v27  ;;  %7568 = vrcp.f32 %v5444_v59 }
0x1d28   :  { %v5467_v42 = vadd.f32 1.0, %v7553_v30  ;;  %v5392_v44 = vpop.permute.xlu0 %5391  ;;  %7570 = vtanh.f32 %v5423_v19 }
0x1d29   :  { %v7555_v53 = vpop.eup %7554  ;;  %v5427_v36 = vadd.f32 %v9396_v57, %v5392_v44 }
0x1d2a   :  { %7572 = vrcp.f32 %v5467_v42  ;;  %v5468_v61 = vadd.f32 1.0, %v7555_v53  ;;  %v5394_v39 = vpop.permute.xlu1 %5393 }
0x1d2b   :  { %7574 = vtanh.f32 %v5424_v13  ;;  %v5984_v28 = vmul.f32 -1.442695, %v5427_v36  ;;  %v5428_v1 = vadd.f32 %v9402_v16, %v5394_v39  ;;  %v7557_v9 = vpop.eup %7556  ;;  %v5546_v39 = vld [vmem:[%s9509_s8] sm:$0xf]  ;;  %s7673_s8 = scalar_lea.vmem %s5612_s12, 64 }
0x1d2c   :  { %7576 = vrcp.f32 %v5468_v61  ;;  %v5396_v15 = vpop.permute.xlu0 %5395  ;;  %v7559_v48 = vpop.eup %7558  ;;  %v5469_v25 = vadd.f32 1.0, %v7557_v9  ;;  %p7674_p0 = scmp.ne.s32.totalorder %s5612_s12, %s7673_s8  ;;  %p7679_p2 = scmp.lt.s32.totalorder %s7673_s8, %s7673_s8 }
0x1d2d   :  { %7578 = vpow2.f32 %v5984_v28  ;;  %v5985_v31 = vmul.f32 -1.442695, %v5428_v1  ;;  %v5429_v62 = vadd.f32 %v9405_v10, %v5396_v15  ;;  %v7561_v21 = vpop.eup %7560  ;;  %v5543_v15 = vld [vmem:[%s9508_s7] sm:$0x3] }
0x1d2e   :  { %7580 = vtanh.f32 %v5426_v34  ;;  %v5398_v57 = vpop.permute.xlu1 %5397  ;;  %v7563_v45 = vpop.eup %7562  ;;  %v5470_v37 = vadd.f32 1.0, %v7561_v21  ;;  %p7680_p3 = por %p7679_p2, %p7678_p1 }
0x1d2f   :  { %7582 = vrcp.f32 %v5469_v25  ;;  %v5986_v3 = vmul.f32 -1.442695, %v5429_v62  ;;  %v5430_v2 = vadd.f32 %v9408_v32, %v5398_v57  ;;  %v7565_v24 = vpop.eup %7564 }
0x1d30   :  { %7584 = vpow2.f32 %v5985_v31  ;;  %v7567_v16 = vpop.eup %7566  ;;  %v5512_v35 = vpop.permute.xlu0 %5511  ;;  %p7681_p4 = pnand %p7680_p3, %p7674_p0 }
0x1d31   :  { %7586 = vrcp.f32 %v5470_v37  ;;  %v5987_v55 = vmul.f32 -1.442695, %v5430_v2  ;;  %v7569_v4 = vpop.eup %7568  ;;  %v5529_v29 = vmul.f32 %v7567_v16, %v7559_v48 }
0x1d32   :  { %7588 = vpow2.f32 %v5986_v3  ;;  %v7571_v52 = vpop.eup %7570  ;;  %v5514_v51 = vpop.permute.xlu1 %5513 }
0x1d33   :  { %7590 = vpow2.f32 %v5987_v55  ;;  %v5527_v23 = vmul.f32 %v7571_v52, %v7565_v24 }
0x1d34   :  { %v7573_v10 = vpop.eup %7572  ;;  %v5516_v63 = vpop.permute.xlu0 %5515 }
0x1d35   :  { %v7575_v58 = vpop.eup %7574  ;;  %v5523_v12 = vmul.f32 %v7573_v10, %v5512_v35 }
0x1d36   :  { %v7577_v49 = vpop.eup %7576  ;;  %v5528_v0 = vmul.f32 %v7575_v58, %v7569_v4  ;;  %v5518_v47 = vpop.permute.xlu1 %5517 }
0x1d37   :  { %v7579_v50 = vpop.eup %7578  ;;  %v5531_v54 = vadd.f32 %v5527_v23, %v5523_v12  ;;  %v5524_v32 = vmul.f32 %v7577_v49, %v5514_v51 }
0x1d38   :  { %v7581_v33 = vpop.eup %7580  ;;  %v5495_v11 = vadd.f32 1.0, %v7579_v50 }
0x1d39   :  { %v7583_v46 = vpop.eup %7582  ;;  %7592 = vtanh.f32 %v5531_v54  ;;  %v5532_v26 = vadd.f32 %v5528_v0, %v5524_v32  ;;  %v5530_v38 = vmul.f32 %v7581_v33, %v7563_v45 }
0x1d3a   :  { %v7585_v17 = vpop.eup %7584  ;;  %7594 = vrcp.f32 %v5495_v11  ;;  %v5525_v41 = vmul.f32 %v7583_v46, %v5516_v63 }
0x1d3b   :  { %v7587_v7 = vpop.eup %7586  ;;  %v5496_v20 = vadd.f32 1.0, %v7585_v17  ;;  %7596 = vtanh.f32 %v5532_v26 }
0x1d3c   :  { %v7589_v40 = vpop.eup %7588  ;;  %v5533_v8 = vadd.f32 %v5529_v29, %v5525_v41  ;;  %v5526_v14 = vmul.f32 %v7587_v7, %v5518_v47 }
0x1d3d   :  { %v7591_v60 = vpop.eup %7590  ;;  %7598 = vrcp.f32 %v5496_v20  ;;  %v5497_v5 = vadd.f32 1.0, %v7589_v40 }
0x1d3e   :  { %v5498_v6 = vadd.f32 1.0, %v7591_v60  ;;  %7600 = vtanh.f32 %v5533_v8  ;;  %v5534_v43 = vadd.f32 %v5530_v38, %v5526_v14 }
0x1d3f   :  { %7602 = vrcp.f32 %v5497_v5 }
0x1d40   :  { %7604 = vrcp.f32 %v5498_v6 }
0x1d41   :  { %7606 = vtanh.f32 %v5534_v43 }
0x1d43   :  { %v7593_v56 = vpop.eup %7592 }
0x1d44   :  { %v7595_v18 = vpop.eup %7594 }
0x1d45   :  { %v7597_v59 = vpop.eup %7596  ;;  %v5539_v30 = vmul.f32 %v7595_v18, %v7593_v56 }
0x1d47   :  { %v7599_v19 = vpop.eup %7598 }
0x1d48   :  { %v7601_v27 = vpop.eup %7600  ;;  %v5540_v13 = vmul.f32 %v7599_v19, %v7597_v59 }
0x1d49   :  { %v7603_v42 = vpop.eup %7602 }
0x1d4a   :  { %v7605_v44 = vpop.eup %7604  ;;  %v5544_v53 = vpack.c.bf16 %v5540_v13, %v5539_v30  ;;  %v5541_v61 = vmul.f32 %v7603_v42, %v7601_v27 }
0x1d4b   :  { %v7607_v36 = vpop.eup %7606 }
0x1d4c   :  { %5554 = vrot.lane.b32.xlu0 %v5544_v53, %s7713_s5  ;;  %v5542_v34 = vmul.f32 %v7607_v36, %v7605_v44 }
0x1d4e   :  { %v5545_v28 = vpack.c.bf16 %v5542_v34, %v5541_v61 }
0x1d50   :  { %5549 = vperm.xlu0 %6549, %v5546_v39   ;;  %5556 = vrot.lane.b32.xlu1 %v5545_v28, %s7713_s5 }
0x1dbe   :  { %v5555_v1 = vpop.permute.xlu0 %5554 }
0x1dbf   :  { %6524 = vmatpush3.bf16.msra.mxu0 %v5555_v1 }
0x1dc0   :  { %6525 = vmatprep.subr.bf16.mxu0 %v7711_v22 }
0x1dc2   :  { %v5557_v9 = vpop.permute.xlu1 %5556 }
0x1dc3   :  { %6526 = vmatpush3.bf16.msra.mxu0 %v5557_v9 }
0x1dc6   :  { %6528 = vmatmul.mubr.msk.bf16.vlgmr.msra.gmra.mrb[144].mxu0 %vm405_vm1, %v5543_v15 }
0x1dcf   :  { %v5550_v48 = vpop.permute.xlu0 %5549 }
0x1e99   :  { %v5597_v25 = vpop.f32.mrb[144].mxu0 }
0x1e9a   :  { %v5598_v31 = vadd.f32 %v5597_v25, %v5550_v48  ;;  %v6529_v62 = vpop.f32.mrb[145].mxu0 }
0x1e9b   :  { %v5600_v21 = vpop.f32.mrb[146].mxu0 }
0x1e9c   :  { %v6530_v57 = vpop.f32.mrb[147].mxu0  ;;  %5604 = vst.msk [vmem:[#allocation4] sm:$0xf] %vm5603_vm12, %v5598_v31 }
0x1e9d   :  { %7684 = shalt.err (!%p7681_p4)
}
0x1e9e   :  { %s7685_s10 = scalar_lea.hbm %s9510_s9, 64 }
0x1e9f   :  { %p7686_p5 = scmp.ne.s32.totalorder %s9510_s9, %s7685_s10  ;;  %p7689_p6 = scmp.lt.u32.totalorder %s7685_s10, %s9510_s9 }
0x1ea1   :  { %p7691_p7 = pnand %p7689_p6, %p7686_p5 }
0x1ea3   :  { %7694 = shalt.err (!%p7691_p7)
}
0x1ea4   :  { %5614 = dma.vmem_to_hbm [thread:$0]  %s5612_s12, 64, %s9510_s9, [#allocation5]  }
0x1ea5   :  { %7695 = dma.done.wait [#allocation5], 64  }
0x1ea6   :  { %7696 = vsyncadd [#allocation5], 4294967232 }
0x1ea7   :  { %5618 = vsyncpa [#allocation5], 1 }

</bundles_post_ra>
